<compile_context>
chip_gen: v6e
topology: v6e:2x2x1
jax: 0.10.0
libtpu: 0.0.40
codegen_flags: <defaults>
</compile_context>

<pallas_src>
import functools

import jax
import jax.numpy as jnp
from jax.experimental import pallas as pl
from jax.experimental.pallas import tpu as pltpu


def _brm_kernel(H, W, C, x_ref, w1_ref, b1_ref, w2_ref, b2_ref, o_ref,
                xp1_ref, xp2_ref):
    """Fused: conv3x3 -> +bias -> ReLU -> conv3x3 -> +bias -> residual add."""
    x = x_ref[0]                                            # (H, W, C)

    # ---------------- conv1: in-kernel zero pad + im2col + one MXU matmul ----------
    xp1_ref[...] = jnp.zeros_like(xp1_ref)                  # cheap VMEM memset (border)
    xp1_ref[1:H + 1, 1:W + 1, :] = x
    xp1 = xp1_ref[...]                                      # (H+2, W+2, C)

    im1 = jnp.concatenate(
        [xp1[i:i + H, j:j + W, :].reshape(H * W, C)
         for i in range(3) for j in range(3)],
        axis=-1)                                            # (H*W, 9*C)
    r = jnp.dot(im1, w1_ref[...], preferred_element_type=jnp.float32)
    r = jnp.maximum(r + b1_ref[0], 0.0)                     # bias + ReLU, (H*W, C)

    # ---------------- conv2 on the VMEM-resident intermediate ----------------------
    xp2_ref[...] = jnp.zeros_like(xp2_ref)
    xp2_ref[1:H + 1, 1:W + 1, :] = r.reshape(H, W, C)
    xp2 = xp2_ref[...]

    im2 = jnp.concatenate(
        [xp2[i:i + H, j:j + W, :].reshape(H * W, C)
         for i in range(3) for j in range(3)],
        axis=-1)                                            # (H*W, 9*C)
    y = jnp.dot(im2, w2_ref[...], preferred_element_type=jnp.float32)
    y = y + b2_ref[0]

    # ---------------- residual add + lane-dense store ------------------------------
    o_ref[0] = x + y.reshape(H, W, C)


def boundary_refine_nhwc(x_nhwc, w1, b1, w2, b2):
    """x_nhwc: (N, H, W, C) f32; w*: (9*C, C); b*: (C,). Returns (N, H, W, C)."""
    N, H, W, C = x_nhwc.shape
    kern = functools.partial(_brm_kernel, H, W, C)
    return pl.pallas_call(
        kern,
        out_shape=jax.ShapeDtypeStruct((N, H, W, C), jnp.float32),
        grid=(N,),
        in_specs=[
            pl.BlockSpec((1, H, W, C), lambda n: (n, 0, 0, 0)),   # activations
            pl.BlockSpec((9 * C, C), lambda n: (0, 0)),           # w1 (fetched once)
            pl.BlockSpec((1, C), lambda n: (0, 0)),               # b1
            pl.BlockSpec((9 * C, C), lambda n: (0, 0)),           # w2
            pl.BlockSpec((1, C), lambda n: (0, 0)),               # b2
        ],
        out_specs=pl.BlockSpec((1, H, W, C), lambda n: (n, 0, 0, 0)),
        scratch_shapes=[
            pltpu.VMEM((H + 2, W + 2, C), jnp.float32),           # padded conv1 input
            pltpu.VMEM((H + 2, W + 2, C), jnp.float32),           # padded conv2 input
        ],
        compiler_params=pltpu.CompilerParams(
            dimension_semantics=("parallel",)),                   # one image per TC on v7x
    )(x_nhwc, w1, b1.reshape(1, C), w2, b2.reshape(1, C))


def boundary_refine_forward(x_nchw, params):
    """PyTorch-convention entry point: NCHW in, NCHW out."""
    x = jnp.transpose(x_nchw, (0, 2, 3, 1))                 # NHWC (lane-dense for C=128)
    y = boundary_refine_nhwc(x, params["w1"], params["b1"],
                             params["w2"], params["b2"])
    return jnp.transpose(y, (0, 3, 1, 2))


def init_params(key, dim):
    """Conv weights stored pre-flattened for the im2col matmul: (3,3,Ci,Co) -> (9*Ci, Co)."""
    k1, k2, k3, k4 = jax.random.split(key, 4)
    std = (9.0 * dim) ** -0.5
    w1 = std * jax.random.normal(k1, (3, 3, dim, dim), jnp.float32)
    w2 = std * jax.random.normal(k2, (3, 3, dim, dim), jnp.float32)
    b1 = 0.1 * jax.random.normal(k3, (dim,), jnp.float32)
    b2 = 0.1 * jax.random.normal(k4, (dim,), jnp.float32)
    return dict(
        w1=w1.reshape(9 * dim, dim), b1=b1,
        w2=w2.reshape(9 * dim, dim), b2=b2,
        w1_hwio=w1, w2_hwio=w2,        # HWIO copies only for the pure-JAX reference
    )


def _reference(x_nchw, params):
    """Pure-JAX (non-Pallas) reference, f32 HIGHEST precision."""
    x = jnp.transpose(x_nchw, (0, 2, 3, 1))
    H, W = x.shape[1], x.shape[2]

    def conv3x3(z, w_hwio, b):
        zp = jnp.pad(z, ((0, 0), (1, 1), (1, 1), (0, 0)))
        acc = jnp.zeros(z.shape[:3] + (w_hwio.shape[-1],), jnp.float32)
        for i in range(3):
            for j in range(3):
                acc = acc + jnp.einsum(
                    "nhwc,cd->nhwd", zp[:, i:i + H, j:j + W, :], w_hwio[i, j],
                    precision=jax.lax.Precision.HIGHEST)
        return acc + b

    r = jnp.maximum(conv3x3(x, params["w1_hwio"], params["b1"]), 0.0)
    y = x + conv3x3(r, params["w2_hwio"], params["b2"])
    return jnp.transpose(y, (0, 3, 1, 2))


if __name__ == "__main__":
    key = jax.random.PRNGKey(0)
    # C=128 chosen so every block / store is fully lane-dense; still tiny (x = 256 KiB).
    N, C, H, W = 2, 128, 16, 16

    kp, kx = jax.random.split(key)
    params = init_params(kp, C)
    x = jax.random.normal(kx, (N, C, H, W), jnp.float32)

    fwd = jax.jit(lambda a: boundary_refine_forward(a, params))
    out = jax.block_until_ready(fwd(x))

    assert out.shape == (N, C, H, W), out.shape
    assert out.dtype == jnp.float32

    ref = jax.block_until_ready(jax.jit(lambda a: _reference(a, params))(x))
    err = float(jnp.max(jnp.abs(out - ref)))
    # Loose bound only to stay robust to MXU f32 pass-count differences; any structural
    # bug (wrong tap/weight layout, missing bias/ReLU/residual) gives errors >= ~0.2.
    assert err < 5e-2, f"max abs error {err}"
    print("KERNEL_OK")
</pallas_src>

<mosaic_0001>
module attributes {stable_mosaic.version = 11 : i64} {
  func.func @_brm_kernel(%arg0: i32, %arg1: memref<1x16x16x128xf32, #tpu.memory_space<vmem>>, %arg2: memref<1152x128xf32, #tpu.memory_space<vmem>>, %arg3: memref<1x128xf32, #tpu.memory_space<vmem>>, %arg4: memref<1152x128xf32, #tpu.memory_space<vmem>>, %arg5: memref<1x128xf32, #tpu.memory_space<vmem>>, %arg6: memref<1x16x16x128xf32, #tpu.memory_space<vmem>>, %arg7: memref<18x18x128xf32, #tpu.memory_space<vmem>>, %arg8: memref<18x18x128xf32, #tpu.memory_space<vmem>>) attributes {dimension_semantics = [#tpu.dimension_semantics<parallel>], iteration_bounds = array<i64: 2>, scalar_prefetch = 0 : i64, scratch_operands = 2 : i64, tpu.core_type = #tpu.core_type<tc>, window_params = [{transform_indices = @transform_0, window_bounds = array<i64: 1, 16, 16, 128>}, {pipeline_mode = #tpu.pipeline_mode<synchronous>, transform_indices = @transform_1, window_bounds = array<i64: 1152, 128>}, {pipeline_mode = #tpu.pipeline_mode<synchronous>, transform_indices = @transform_2, window_bounds = array<i64: 1, 128>}, {pipeline_mode = #tpu.pipeline_mode<synchronous>, transform_indices = @transform_3, window_bounds = array<i64: 1152, 128>}, {pipeline_mode = #tpu.pipeline_mode<synchronous>, transform_indices = @transform_4, window_bounds = array<i64: 1, 128>}, {transform_indices = @transform_5, window_bounds = array<i64: 1, 16, 16, 128>}]} {
    %c0 = arith.constant 0 : index
    %c0_0 = arith.constant 0 : index
    %c0_1 = arith.constant 0 : index
    %c0_2 = arith.constant 0 : index
    %0 = vector.load %arg1[%c0, %c0_0, %c0_1, %c0_2] : memref<1x16x16x128xf32, #tpu.memory_space<vmem>>, vector<1x16x16x128xf32>
    %1 = vector.shape_cast %0 : vector<1x16x16x128xf32> to vector<16x16x128xf32>
    %cst = arith.constant 0.000000e+00 : f32
    %2 = vector.broadcast %cst : f32 to vector<18x18x128xf32>
    %c0_3 = arith.constant 0 : index
    %c0_4 = arith.constant 0 : index
    %c0_5 = arith.constant 0 : index
    %3 = vector.load %arg7[%c0_3, %c0_4, %c0_5] : memref<18x18x128xf32, #tpu.memory_space<vmem>>, vector<18x18x128xf32>
    tpu.vector_store %arg7[%c0_3, %c0_4, %c0_5], %2 {strides = array<i32>} : memref<18x18x128xf32, #tpu.memory_space<vmem>>, vector<18x18x128xf32>,
    %c1 = arith.constant 1 : index
    %c1_6 = arith.constant 1 : index
    %c0_7 = arith.constant 0 : index
    %4 = vector.load %arg7[%c1, %c1_6, %c0_7] : memref<18x18x128xf32, #tpu.memory_space<vmem>>, vector<16x16x128xf32>
    tpu.vector_store %arg7[%c1, %c1_6, %c0_7], %1 {strides = array<i32>} : memref<18x18x128xf32, #tpu.memory_space<vmem>>, vector<16x16x128xf32>,
    %c0_8 = arith.constant 0 : index
    %c0_9 = arith.constant 0 : index
    %c0_10 = arith.constant 0 : index
    %5 = vector.load %arg7[%c0_8, %c0_9, %c0_10] : memref<18x18x128xf32, #tpu.memory_space<vmem>>, vector<18x18x128xf32>
    %6 = vector.extract_strided_slice %5 {offsets = [0, 0, 0], sizes = [16, 16, 128], strides = [1, 1, 1]} : vector<18x18x128xf32> to vector<16x16x128xf32>
    %7 = vector.shape_cast %6 : vector<16x16x128xf32> to vector<256x128xf32>
    %8 = vector.extract_strided_slice %5 {offsets = [0, 1, 0], sizes = [16, 16, 128], strides = [1, 1, 1]} : vector<18x18x128xf32> to vector<16x16x128xf32>
    %9 = vector.shape_cast %8 : vector<16x16x128xf32> to vector<256x128xf32>
    %10 = vector.extract_strided_slice %5 {offsets = [0, 2, 0], sizes = [16, 16, 128], strides = [1, 1, 1]} : vector<18x18x128xf32> to vector<16x16x128xf32>
    %11 = vector.shape_cast %10 : vector<16x16x128xf32> to vector<256x128xf32>
    %12 = vector.extract_strided_slice %5 {offsets = [1, 0, 0], sizes = [16, 16, 128], strides = [1, 1, 1]} : vector<18x18x128xf32> to vector<16x16x128xf32>
    %13 = vector.shape_cast %12 : vector<16x16x128xf32> to vector<256x128xf32>
    %14 = vector.extract_strided_slice %5 {offsets = [1, 1, 0], sizes = [16, 16, 128], strides = [1, 1, 1]} : vector<18x18x128xf32> to vector<16x16x128xf32>
    %15 = vector.shape_cast %14 : vector<16x16x128xf32> to vector<256x128xf32>
    %16 = vector.extract_strided_slice %5 {offsets = [1, 2, 0], sizes = [16, 16, 128], strides = [1, 1, 1]} : vector<18x18x128xf32> to vector<16x16x128xf32>
    %17 = vector.shape_cast %16 : vector<16x16x128xf32> to vector<256x128xf32>
    %18 = vector.extract_strided_slice %5 {offsets = [2, 0, 0], sizes = [16, 16, 128], strides = [1, 1, 1]} : vector<18x18x128xf32> to vector<16x16x128xf32>
    %19 = vector.shape_cast %18 : vector<16x16x128xf32> to vector<256x128xf32>
    %20 = vector.extract_strided_slice %5 {offsets = [2, 1, 0], sizes = [16, 16, 128], strides = [1, 1, 1]} : vector<18x18x128xf32> to vector<16x16x128xf32>
    %21 = vector.shape_cast %20 : vector<16x16x128xf32> to vector<256x128xf32>
    %22 = vector.extract_strided_slice %5 {offsets = [2, 2, 0], sizes = [16, 16, 128], strides = [1, 1, 1]} : vector<18x18x128xf32> to vector<16x16x128xf32>
    %23 = vector.shape_cast %22 : vector<16x16x128xf32> to vector<256x128xf32>
    %24 = tpu.concatenate %7, %9, %11, %13, %15, %17, %19, %21, %23 in 1 : vector<256x128xf32>, vector<256x128xf32>, vector<256x128xf32>, vector<256x128xf32>, vector<256x128xf32>, vector<256x128xf32>, vector<256x128xf32>, vector<256x128xf32>, vector<256x128xf32> -> vector<256x1152xf32>
    %c0_11 = arith.constant 0 : index
    %c0_12 = arith.constant 0 : index
    %25 = vector.load %arg2[%c0_11, %c0_12] : memref<1152x128xf32, #tpu.memory_space<vmem>>, vector<1152x128xf32>
    %cst_13 = arith.constant dense<0.000000e+00> : vector<256x128xf32>
    %26 = tpu.matmul %24, %25, %cst_13 {dimension_numbers = #tpu.dot_dimension_numbers<[1], [0], [0], [1], [0, 0, 1, 1], [], []>} : vector<256x1152xf32>, vector<1152x128xf32>, vector<256x128xf32> -> vector<256x128xf32>
    %c0_14 = arith.constant 0 : index
    %c0_15 = arith.constant 0 : index
    %27 = vector.load %arg3[%c0_14, %c0_15] : memref<1x128xf32, #tpu.memory_space<vmem>>, vector<1x128xf32>
    %28 = vector.shape_cast %27 : vector<1x128xf32> to vector<128xf32>
    %29 = vector.shape_cast %28 : vector<128xf32> to vector<1x128xf32>
    %30 = vector.broadcast %29 : vector<1x128xf32> to vector<256x128xf32>
    %31 = arith.addf %26, %30 : vector<256x128xf32>
    %cst_16 = arith.constant 0.000000e+00 : f32
    %32 = vector.broadcast %cst_16 : f32 to vector<256x128xf32>
    %33 = arith.maximumf %31, %32 : vector<256x128xf32>
    %cst_17 = arith.constant 0.000000e+00 : f32
    %34 = vector.broadcast %cst_17 : f32 to vector<18x18x128xf32>
    %c0_18 = arith.constant 0 : index
    %c0_19 = arith.constant 0 : index
    %c0_20 = arith.constant 0 : index
    %35 = vector.load %arg8[%c0_18, %c0_19, %c0_20] : memref<18x18x128xf32, #tpu.memory_space<vmem>>, vector<18x18x128xf32>
    tpu.vector_store %arg8[%c0_18, %c0_19, %c0_20], %34 {strides = array<i32>} : memref<18x18x128xf32, #tpu.memory_space<vmem>>, vector<18x18x128xf32>,
    %36 = vector.shape_cast %33 : vector<256x128xf32> to vector<16x16x128xf32>
    %c1_21 = arith.constant 1 : index
    %c1_22 = arith.constant 1 : index
    %c0_23 = arith.constant 0 : index
    %37 = vector.load %arg8[%c1_21, %c1_22, %c0_23] : memref<18x18x128xf32, #tpu.memory_space<vmem>>, vector<16x16x128xf32>
    tpu.vector_store %arg8[%c1_21, %c1_22, %c0_23], %36 {strides = array<i32>} : memref<18x18x128xf32, #tpu.memory_space<vmem>>, vector<16x16x128xf32>,
    %c0_24 = arith.constant 0 : index
    %c0_25 = arith.constant 0 : index
    %c0_26 = arith.constant 0 : index
    %38 = vector.load %arg8[%c0_24, %c0_25, %c0_26] : memref<18x18x128xf32, #tpu.memory_space<vmem>>, vector<18x18x128xf32>
    %39 = vector.extract_strided_slice %38 {offsets = [0, 0, 0], sizes = [16, 16, 128], strides = [1, 1, 1]} : vector<18x18x128xf32> to vector<16x16x128xf32>
    %40 = vector.shape_cast %39 : vector<16x16x128xf32> to vector<256x128xf32>
    %41 = vector.extract_strided_slice %38 {offsets = [0, 1, 0], sizes = [16, 16, 128], strides = [1, 1, 1]} : vector<18x18x128xf32> to vector<16x16x128xf32>
    %42 = vector.shape_cast %41 : vector<16x16x128xf32> to vector<256x128xf32>
    %43 = vector.extract_strided_slice %38 {offsets = [0, 2, 0], sizes = [16, 16, 128], strides = [1, 1, 1]} : vector<18x18x128xf32> to vector<16x16x128xf32>
    %44 = vector.shape_cast %43 : vector<16x16x128xf32> to vector<256x128xf32>
    %45 = vector.extract_strided_slice %38 {offsets = [1, 0, 0], sizes = [16, 16, 128], strides = [1, 1, 1]} : vector<18x18x128xf32> to vector<16x16x128xf32>
    %46 = vector.shape_cast %45 : vector<16x16x128xf32> to vector<256x128xf32>
    %47 = vector.extract_strided_slice %38 {offsets = [1, 1, 0], sizes = [16, 16, 128], strides = [1, 1, 1]} : vector<18x18x128xf32> to vector<16x16x128xf32>
    %48 = vector.shape_cast %47 : vector<16x16x128xf32> to vector<256x128xf32>
    %49 = vector.extract_strided_slice %38 {offsets = [1, 2, 0], sizes = [16, 16, 128], strides = [1, 1, 1]} : vector<18x18x128xf32> to vector<16x16x128xf32>
    %50 = vector.shape_cast %49 : vector<16x16x128xf32> to vector<256x128xf32>
    %51 = vector.extract_strided_slice %38 {offsets = [2, 0, 0], sizes = [16, 16, 128], strides = [1, 1, 1]} : vector<18x18x128xf32> to vector<16x16x128xf32>
    %52 = vector.shape_cast %51 : vector<16x16x128xf32> to vector<256x128xf32>
    %53 = vector.extract_strided_slice %38 {offsets = [2, 1, 0], sizes = [16, 16, 128], strides = [1, 1, 1]} : vector<18x18x128xf32> to vector<16x16x128xf32>
    %54 = vector.shape_cast %53 : vector<16x16x128xf32> to vector<256x128xf32>
    %55 = vector.extract_strided_slice %38 {offsets = [2, 2, 0], sizes = [16, 16, 128], strides = [1, 1, 1]} : vector<18x18x128xf32> to vector<16x16x128xf32>
    %56 = vector.shape_cast %55 : vector<16x16x128xf32> to vector<256x128xf32>
    %57 = tpu.concatenate %40, %42, %44, %46, %48, %50, %52, %54, %56 in 1 : vector<256x128xf32>, vector<256x128xf32>, vector<256x128xf32>, vector<256x128xf32>, vector<256x128xf32>, vector<256x128xf32>, vector<256x128xf32>, vector<256x128xf32>, vector<256x128xf32> -> vector<256x1152xf32>
    %c0_27 = arith.constant 0 : index
    %c0_28 = arith.constant 0 : index
    %58 = vector.load %arg4[%c0_27, %c0_28] : memref<1152x128xf32, #tpu.memory_space<vmem>>, vector<1152x128xf32>
    %cst_29 = arith.constant dense<0.000000e+00> : vector<256x128xf32>
    %59 = tpu.matmul %57, %58, %cst_29 {dimension_numbers = #tpu.dot_dimension_numbers<[1], [0], [0], [1], [0, 0, 1, 1], [], []>} : vector<256x1152xf32>, vector<1152x128xf32>, vector<256x128xf32> -> vector<256x128xf32>
    %c0_30 = arith.constant 0 : index
    %c0_31 = arith.constant 0 : index
    %60 = vector.load %arg5[%c0_30, %c0_31] : memref<1x128xf32, #tpu.memory_space<vmem>>, vector<1x128xf32>
    %61 = vector.shape_cast %60 : vector<1x128xf32> to vector<128xf32>
    %62 = vector.shape_cast %61 : vector<128xf32> to vector<1x128xf32>
    %63 = vector.broadcast %62 : vector<1x128xf32> to vector<256x128xf32>
    %64 = arith.addf %59, %63 : vector<256x128xf32>
    %65 = vector.shape_cast %64 : vector<256x128xf32> to vector<16x16x128xf32>
    %66 = arith.addf %1, %65 : vector<16x16x128xf32>
    %c0_32 = arith.constant 0 : index
    %c0_33 = arith.constant 0 : index
    %c0_34 = arith.constant 0 : index
    %c0_35 = arith.constant 0 : index
    %67 = vector.load %arg6[%c0_32, %c0_33, %c0_34, %c0_35] : memref<1x16x16x128xf32, #tpu.memory_space<vmem>>, vector<1x16x16x128xf32>
    %68 = vector.shape_cast %67 : vector<1x16x16x128xf32> to vector<16x16x128xf32>
    %69 = vector.shape_cast %66 : vector<16x16x128xf32> to vector<1x16x16x128xf32>
    tpu.vector_store %arg6[%c0_32, %c0_33, %c0_34, %c0_35], %69 {strides = array<i32>} : memref<1x16x16x128xf32, #tpu.memory_space<vmem>>, vector<1x16x16x128xf32>,
    return
  }
  func.func @transform_0(%arg0: i32) -> (i32, i32, i32, i32) {
    %c0_i32 = arith.constant 0 : i32
    %c0_i32_0 = arith.constant 0 : i32
    %c0_i32_1 = arith.constant 0 : i32
    %c0_i32_2 = arith.constant 0 : i32
    return %arg0, %c0_i32, %c0_i32_0, %c0_i32_1 : i32, i32, i32, i32
  }
  func.func @transform_1(%arg0: i32) -> (i32, i32) {
    %c0_i32 = arith.constant 0 : i32
    %c0_i32_0 = arith.constant 0 : i32
    %c0_i32_1 = arith.constant 0 : i32
    return %c0_i32, %c0_i32_0 : i32, i32
  }
  func.func @transform_2(%arg0: i32) -> (i32, i32) {
    %c0_i32 = arith.constant 0 : i32
    %c0_i32_0 = arith.constant 0 : i32
    %c0_i32_1 = arith.constant 0 : i32
    return %c0_i32, %c0_i32_0 : i32, i32
  }
  func.func @transform_3(%arg0: i32) -> (i32, i32) {
    %c0_i32 = arith.constant 0 : i32
    %c0_i32_0 = arith.constant 0 : i32
    %c0_i32_1 = arith.constant 0 : i32
    return %c0_i32, %c0_i32_0 : i32, i32
  }
  func.func @transform_4(%arg0: i32) -> (i32, i32) {
    %c0_i32 = arith.constant 0 : i32
    %c0_i32_0 = arith.constant 0 : i32
    %c0_i32_1 = arith.constant 0 : i32
    return %c0_i32, %c0_i32_0 : i32, i32
  }
  func.func @transform_5(%arg0: i32) -> (i32, i32, i32, i32) {
    %c0_i32 = arith.constant 0 : i32
    %c0_i32_0 = arith.constant 0 : i32
    %c0_i32_1 = arith.constant 0 : i32
    %c0_i32_2 = arith.constant 0 : i32
    return %arg0, %c0_i32, %c0_i32_0, %c0_i32_1 : i32, i32, i32, i32
  }
}

</mosaic_0001>

<bundles_post_ra>
// kernel: _lambda_.1
= control target key start
LH: loop header
LB: loop body
LE: loop exit
PB: predicated region body
PF: predicated region fallthrough
CT: control target
= control target key end

     0   :  { %10 = vsyncpa [#allocation5], 0  ;;  %s6863_s0 = inlined_call_operand.hbm [shape: f32[2,16,16,128], index: 0, kind: input, shape index: {}]   ;;  %s6864_s1 = inlined_call_operand.hbm [shape: f32[1152,128], index: 1, kind: input, shape index: {}]   ;;  %s6865_s2 = inlined_call_operand.vmem [shape: f32[1,128], index: 2, kind: input, shape index: {}]   ;;  %s6866_s3 = inlined_call_operand.hbm [shape: f32[1152,128], index: 3, kind: input, shape index: {}]   ;;  %s6867_s4 = inlined_call_operand.vmem [shape: f32[1,128], index: 4, kind: input, shape index: {}]   ;;  %s6868_s5 = inlined_call_operand.hbm [shape: f32[2,16,16,128], index: 5, kind: output, shape index: {}]  }
   0x1   :  { %12 = vsyncpa [#allocation5 + $0x1], 0 }
   0x2   :  { %13 = vsyncpa [#allocation8], 0 }
   0x3   :  { %14 = vsyncpa [#allocation6], 0 }
   0x4   :  { %16 = vsyncpa [#allocation6 + $0x1], 0  ;;  %s4534_s18 = smov 0   ;;  %s4536_s19 = smov 0  }
   0x5   :  { %s4538_s20 = smov 0   ;;  %s4540_s21 = smov 0  }
   0x6 LB: > { %s4555_s22 = sadd.s32 4294967295, %s4493_s21   ;;  %s3954_s23 = sadd.s32 4294967294, %s4493_s21   ;;  %s4493_s21 = sphi %s4540_s21, %s7135_s21   ;;  %s4489_s20 = sphi %s4538_s20, %s7134_s20   ;;  %s4485_s19 = sphi %s4536_s19, %s7133_s19   ;;  %s4481_s18 = sphi %s4534_s18, %s7132_s18  }
   0x7   : > { %p42_p0 = scmp.ne.s32.totalorder %s4485_s19, %s4481_s18  ;;  %p6869_p1 = scmp.eq.s32.totalorder %s4555_s22, 0 }
   0x8   : > { %p150_p2 = scmp.eq.s32.totalorder %s4555_s22, 1  ;;  %p156_p3 = scmp.eq.s32.totalorder %s3954_s23, 1 }
   0x9   : > { %p4564_p4 = por %p6869_p1, %p42_p0  ;;  %p3955_p5 = scmp.ge.s32.totalorder %s4493_s21, 1 }
   0xa   : > { %p4569_p6 = por %p156_p3, %p42_p0  ;;  %p163_p7 = scmp.lt.s32.totalorder %s4493_s21, 3 }
   0xb   : > { %s6984_s24 = scalar_select %p4564_p4, 1, 0 }
   0xc   : > { %s6985_s25 = scalar_select %p4569_p6, 1, 0 }
   0xd   : > { %p4574_p8 = pnand %p3955_p5, %p163_p7  ;;  %s4495_s27 = smov [#allocation7]  }
   0xe   : > { %s175_s28 = sshll.u32 %s4495_s27, 4  ;;  %s4496_s30 = smov [#allocation9]   ;;  %s176_s28 = int_to_ptr.vmem [resolvable:$true] %s175_s28 }
   0xf   : > { %s6986_s26 = scalar_select %p4574_p8, 1, 0 }
  0x10   : > { %p4244_p9 = pneg %p4574_p8  ;;  %s191_s6 = sshll.u32 %s4496_s30, 4  ;;  %s192_s6 = int_to_ptr.vmem [resolvable:$true] %s191_s6 }
  0x11   : > { %s4356_s7 = scalar_lea.vmem %s176_s28, 18432  ;;  %p4364_p5 = scmp.lt.s32.totalorder %s176_s28, %s176_s28 }
  0x12   : > { %p4583_p11 = pnand %p4244_p9, %p6869_p1  ;;  %p4357_p13 = scmp.ne.s32.totalorder %s176_s28, %s4356_s7 }
  0x13   : > { %p4365_p7 = scmp.lt.s32.totalorder %s4356_s7, %s4356_s7 }
  0x14   : > { %p4347_p12 = pneg %p4583_p11 }
  0x15   : > { %p4366_p10 = por %p4365_p7, %p4364_p5 }
  0x16   : > { %p4359_p0 = pnand %p4357_p13, %p4347_p12 }
  0x18   : > { %p4360_p3 = pneg %p4359_p0 }
  0x1a   : > { %p4367_p9 = pnand %p4366_p10, %p4360_p3 }
  0x1c   : > { %4370 = shalt.err (!%p4367_p9)
}
  0x1d   : > { %s6870_s8 = smov 128   ;;  %s4498_s9 = smov 8  }
  0x1e   : > { %4247 = dma.hbm_to_vmem [thread:$0]  (!%p4583_p11), %s6864_s1, 18432, %s176_s28, [#allocation8], %s6870_s8, %s6870_s8, %s4498_s9  }
  0x1f   : > { %s4382_s12 = scalar_lea.vmem %s192_s6, 18432  ;;  %p4390_p10 = scmp.lt.s32.totalorder %s192_s6, %s192_s6 }
  0x20   : > { %p4383_p13 = scmp.ne.s32.totalorder %s192_s6, %s4382_s12  ;;  %p4391_p3 = scmp.lt.s32.totalorder %s4382_s12, %s4382_s12 }
  0x22   : > { %p4385_p0 = pnand %p4383_p13, %p4347_p12  ;;  %p4392_p7 = por %p4391_p3, %p4390_p10 }
  0x24   : > { %p4386_p5 = pneg %p4385_p0 }
  0x26   : > { %p4393_p9 = pnand %p4392_p7, %p4386_p5 }
  0x28   : > { %4396 = shalt.err (!%p4393_p9)
}
  0x29   : > { %4250 = dma.hbm_to_vmem [thread:$0]  (!%p4583_p11), %s6866_s3, 18432, %s192_s6, [#allocation8], %s6870_s8, %s6870_s8, %s4498_s9  }
  0x2a   : > { %s4612_s15 = sadd.s32 1, %s4493_s21   ;;  %s29_s16 = sadd.s32 1, %s4489_s20 }
  0x2b   : > { %s26_s17 = ssub.s32 %s4493_s21, %s4612_s15  ;;  %p36_p12 = scmp.ne.s32.totalorder %s4489_s20, %s4485_s19 }
  0x2c   : > { %p27_p13 = scmp.eq.s32.totalorder %s26_s17, 0  ;;  %p37_p0 = scmp.eq.s32.totalorder %s4493_s21, 0 }
  0x2d   : > { %p4622_p5 = por %p150_p2, %p36_p12  ;;  %p4261_p10 = scmp.lt.s32.totalorder %s4493_s21, 2 }
  0x2e   : > { %s4628_s27 = scalar_select %p27_p13, %s4489_s20, %s29_s16  }
  0x2f   : > { %s6988_s23 = scalar_select %p4622_p5, 1, 0 }
  0x30   : > { %p38_p3 = por %p37_p0, %p36_p12  ;;  %s208_s28 = sand.u32 1, %s4489_s20  }
  0x31   : > { %s3959_s29 = sshll.u32 %s208_s28, 8  ;;  %s3974_s30 = sshll.u32 %s4493_s21, 12 }
  0x32   : > { %s4635_s10 = scalar_lea.hbm %s6863_s0, %s3974_s30  ;;  %s212_s11 = scalar_lea.vmem [#allocation4], %s3959_s29 }
  0x33   : > { %s219_s12 = sshll.u32 %s212_s11, 4  ;;  %p4639_p2 = pnand %p4261_p10, %p38_p3  ;;  %s4637_s12 = int_to_ptr.vmem [resolvable:$true] %s219_s12 }
  0x34   : > { %s4643_s14 = scalar_lea.sflag [#allocation5], %s208_s28  ;;  %s4397_s16 = scalar_lea.hbm %s4635_s10, 4096 }
  0x35   : > { %p4398_p11 = scmp.ne.s32.totalorder %s4635_s10, %s4397_s16  ;;  %p4399_p7 = pneg %p4639_p2 }
  0x36   : > { %s4402_s29 = scalar_lea.hbm %s6863_s0, 8192  ;;  %p4403_p13 = scmp.lt.s32.totalorder %s4635_s10, %s6863_s0 }
  0x37   : > { %p4400_p9 = pnand %p4399_p7, %p4398_p11  ;;  %p4404_p0 = scmp.lt.s32.totalorder %s4402_s29, %s4397_s16 }
  0x39   : > { %p4401_p12 = pneg %p4400_p9  ;;  %p4405_p10 = por %p4404_p0, %p4403_p13 }
  0x3b   : > { %p4406_p3 = pnand %p4405_p10, %p4401_p12 }
  0x3d   : > { %4409 = shalt.err (!%p4406_p3)
}
  0x3e   : > { %s4410_s28 = scalar_lea.vmem %s4637_s12, 4096  ;;  %s4499_s11 = smov [#allocation4]  }
  0x3f   : > { %p4411_p1 = scmp.ne.s32.totalorder %s4637_s12, %s4410_s28  ;;  %s4415_s8 = sshll.u32 %s4499_s11, 4  ;;  %s4416_s8 = int_to_ptr.vmem [resolvable:$false] %s4415_s8 }
  0x40   : > { %s4417_s17 = scalar_lea.vmem %s4416_s8, 8192  ;;  %p4418_p9 = scmp.lt.s32.totalorder %s4637_s12, %s4416_s8 }
  0x41   : > { %p4413_p6 = pnand %p4411_p1, %p4399_p7  ;;  %p4419_p5 = scmp.lt.s32.totalorder %s4417_s17, %s4410_s28 }
  0x43   : > { %p4414_p11 = pneg %p4413_p6  ;;  %p4420_p4 = por %p4419_p5, %p4418_p9 }
  0x45   : > { %p4421_p8 = pnand %p4420_p4, %p4414_p11 }
  0x47   : > { %4424 = shalt.err (!%p4421_p8)
}
  0x48   : > { %s6990_s16 = smov 128   ;;  %p6991_p1 = scmp.ne.s32.totalorder %s6986_s26, 0 }
  0x49   : > { %4254 = dma.hbm_to_vmem [thread:$0]  (!%p4639_p2), %s4635_s10, 4096, %s4637_s12, %s4643_s14, %s6990_s16, %s6990_s16, %s4498_s9  }
  0x4a   : > { %231 = sbr.rel (%p6991_p1) target bundleno = 1141 (0x475), region = 40 }
  0x4f   : > { %s4670_s30 = sand.u32 1, %s4485_s19   ;;  %p6992_p4 = scmp.ne.s32.totalorder %s6984_s24, 0 }
  0x50   : > { %s3963_s8 = sshll.u32 %s4670_s30, 8  ;;  %s234_s29 = scalar_lea.sflag [#allocation5], %s4670_s30 }
  0x51   : > { %s4676_s13 = scalar_lea.vmem [#allocation4], %s3963_s8 }
  0x52   : > { %4468 = dma.done.wait (%p6992_p4), %s234_s29, 4096  }
  0x53   : > { %4470 = vsyncadd (%p6992_p4), %s234_s29, 4294963200  ;;  %p6993_p6 = scmp.eq.s32.totalorder %s4555_s22, 0 }
  0x55   : > { %4472 = dma.done.wait (%p6993_p6), [#allocation8], 36864   ;;  %p6994_p8 = pmov %p6993_p6 }
  0x56   : > { %vm493_vm0 = vcmask 1046528   ;;  %v4500_v0 = vmov 0.0   ;;  %v768_v2 = vld [vmem:[#allocation7 + $0x78] sm:$0xff]  ;;  %v767_v3 = vld [vmem:[#allocation7 + $0x70] sm:$0xff]  ;;  %v766_v6 = vld [vmem:[#allocation7 + $0x68] sm:$0xff]  ;;  %vm606_vm1 = vcmask 1045504  }
  0x57   : > { %4474 = vsyncadd (%p6994_p8), [#allocation8], 4294930432  ;;  %904 = vmatprep.subr.mxu0 %v4500_v0  ;;  %304 = vst [vmem:[#allocation2] sm:$0xff] %v4500_v0  ;;  %1129 = vmatprep.subr.mxu1 %v4500_v0  ;;  %v4790_v1 = vrot.slane %v4500_v0, 1  ;;  %v800_v4 = vld [vmem:[#allocation7 + $0x178] sm:$0xff]  ;;  %v799_v5 = vld [vmem:[#allocation7 + $0x170] sm:$0xff] }
  0x58   : > { %306 = vst [vmem:[#allocation2 + $0x10] sm:$0x3] %v4500_v0  ;;  %307 = vst [vmem:[#allocation2 + $0x18] sm:$0xff] %v4500_v0  ;;  %905 = vmatpush1.msra.mxu0 %v768_v2  ;;  %1130 = vmatpush1.msra.mxu1 %v800_v4  ;;  %v798_v7 = vld [vmem:[#allocation7 + $0x168] sm:$0xff]  ;;  %v765_v8 = vld [vmem:[#allocation7 + $0x60] sm:$0xff]  ;;  %s6746_s12 = scalar_lea.vmem [#allocation10], %s3963_s8 }
  0x59   : > { %308 = vst [vmem:[#allocation2 + $0x20] sm:$0xff] %v4500_v0  ;;  %309 = vst [vmem:[#allocation2 + $0x28] sm:$0x3] %v4500_v0  ;;  %968 = vmatprep.mubr.f32.mxu0 %v4790_v1  ;;  %906 = vmatprep.subr.mxu0 %v4500_v0  ;;  %v797_v9 = vld [vmem:[#allocation7 + $0x160] sm:$0xff]  ;;  %v764_v10 = vld [vmem:[#allocation7 + $0x58] sm:$0xff]  ;;  %s3975_s14 = sshll.u32 %s4555_s22, 12 }
  0x5a   : > { %310 = vst [vmem:[#allocation2 + $0x30] sm:$0xff] %v4500_v0  ;;  %311 = vst [vmem:[#allocation2 + $0x38] sm:$0xff] %v4500_v0  ;;  %1131 = vmatprep.subr.mxu1 %v4500_v0  ;;  %907 = vmatpush1.msra.mxu0 %v767_v3  ;;  %v796_v11 = vld [vmem:[#allocation7 + $0x158] sm:$0xff]  ;;  %v763_v12 = vld [vmem:[#allocation7 + $0x50] sm:$0xff]  ;;  %s3862_s6 = sshll.u32 %s6746_s12, 4  ;;  %s6816_s11 = scalar_lea.hbm %s6868_s5, %s3975_s14  ;;  %s6818_s6 = int_to_ptr.vmem [resolvable:$true] %s3862_s6 }
  0x5b   : > { %312 = vst [vmem:[#allocation2 + $0x40] sm:$0x3] %v4500_v0  ;;  %313 = vst [vmem:[#allocation2 + $0x48] sm:$0xff] %v4500_v0  ;;  %1132 = vmatpush1.msra.mxu1 %v799_v5  ;;  %908 = vmatprep.subr.mxu0 %v4500_v0  ;;  %v795_v13 = vld [vmem:[#allocation7 + $0x150] sm:$0xff]  ;;  %v762_v14 = vld [vmem:[#allocation7 + $0x48] sm:$0xff]  ;;  %s3849_s22 = scalar_lea.sflag [#allocation6], %s4670_s30 }
  0x5c   : > { %314 = vst [vmem:[#allocation2 + $0x50] sm:$0xff] %v4500_v0  ;;  %315 = vst [vmem:[#allocation2 + $0x58] sm:$0x3] %v4500_v0  ;;  %1133 = vmatprep.subr.mxu1 %v4500_v0  ;;  %909 = vmatpush1.msra.mxu0 %v766_v6  ;;  %v794_v15 = vld [vmem:[#allocation7 + $0x148] sm:$0xff]  ;;  %v761_v16 = vld [vmem:[#allocation7 + $0x40] sm:$0xff]  ;;  %s4425_s17 = scalar_lea.vmem %s6818_s6, 4096 }
  0x5d   : > { %316 = vst [vmem:[#allocation2 + $0x60] sm:$0xff] %v4500_v0  ;;  %317 = vst [vmem:[#allocation2 + $0x68] sm:$0xff] %v4500_v0  ;;  %1134 = vmatpush1.msra.mxu1 %v798_v7  ;;  %910 = vmatprep.subr.mxu0 %v4500_v0  ;;  %v793_v17 = vld [vmem:[#allocation7 + $0x140] sm:$0xff]  ;;  %v760_v18 = vld [vmem:[#allocation7 + $0x38] sm:$0xff]  ;;  %p4426_p5 = scmp.ne.s32.totalorder %s6818_s6, %s4425_s17  ;;  %p7129_p2 = scmp.ne.s32.totalorder %s6988_s23, 0 }
  0x5e   : > { %318 = vst [vmem:[#allocation2 + $0x70] sm:$0x3] %v4500_v0  ;;  %319 = vst [vmem:[#allocation2 + $0x78] sm:$0xff] %v4500_v0  ;;  %1135 = vmatprep.subr.mxu1 %v4500_v0  ;;  %911 = vmatpush1.msra.mxu0 %v765_v8  ;;  %v792_v19 = vld [vmem:[#allocation7 + $0x138] sm:$0xff]  ;;  %v759_v20 = vld [vmem:[#allocation7 + $0x30] sm:$0xff]  ;;  %s4501_s16 = smov [#allocation10]  }
  0x5f   : > { %320 = vst [vmem:[#allocation2 + $0x80] sm:$0xff] %v4500_v0  ;;  %321 = vst [vmem:[#allocation2 + $0x88] sm:$0x3] %v4500_v0  ;;  %1136 = vmatpush1.msra.mxu1 %v797_v9  ;;  %912 = vmatprep.subr.mxu0 %v4500_v0  ;;  %v791_v21 = vld [vmem:[#allocation7 + $0x130] sm:$0xff]  ;;  %v758_v22 = vld [vmem:[#allocation7 + $0x28] sm:$0xff]  ;;  %p4427_p7 = pnand %p4426_p5, %p7129_p2  ;;  %s4429_s8 = sshll.u32 %s4501_s16, 4  ;;  %s4430_s8 = int_to_ptr.vmem [resolvable:$false] %s4429_s8 }
  0x60   : > { %322 = vst [vmem:[#allocation2 + $0x90] sm:$0xff] %v4500_v0  ;;  %323 = vst [vmem:[#allocation2 + $0x98] sm:$0xff] %v4500_v0  ;;  %1137 = vmatprep.subr.mxu1 %v4500_v0  ;;  %913 = vmatpush1.msra.mxu0 %v764_v10  ;;  %v790_v23 = vld [vmem:[#allocation7 + $0x128] sm:$0xff]  ;;  %v757_v24 = vld [vmem:[#allocation7 + $0x20] sm:$0xff]  ;;  %s4431_s29 = scalar_lea.vmem %s4430_s8, 8192  ;;  %p4432_p13 = scmp.lt.s32.totalorder %s6818_s6, %s4430_s8 }
  0x61   : > { %324 = vst [vmem:[#allocation2 + $0xa0] sm:$0x3] %v4500_v0  ;;  %325 = vst [vmem:[#allocation2 + $0xa8] sm:$0xff] %v4500_v0  ;;  %1138 = vmatpush1.msra.mxu1 %v796_v11  ;;  %914 = vmatprep.subr.mxu0 %v4500_v0  ;;  %v789_v25 = vld [vmem:[#allocation7 + $0x120] sm:$0xff]  ;;  %v756_v27 = vld [vmem:[#allocation7 + $0x18] sm:$0xff]  ;;  %p4428_p12 = pneg %p4427_p7  ;;  %p4433_p0 = scmp.lt.s32.totalorder %s4431_s29, %s4425_s17 }
  0x62   : > { %326 = vst [vmem:[#allocation2 + $0xb0] sm:$0xff] %v4500_v0  ;;  %327 = vst [vmem:[#allocation2 + $0xb8] sm:$0x3] %v4500_v0  ;;  %1139 = vmatprep.subr.mxu1 %v4500_v0  ;;  %915 = vmatpush1.msra.mxu0 %v763_v12  ;;  %v272_v26 = vld [vmem:[%s4676_s13] sm:$0xff]  ;;  %v788_v28 = vld [vmem:[#allocation7 + $0x118] sm:$0xff] }
  0x63   : > { %328 = vst [vmem:[#allocation2 + $0xc0] sm:$0xff] %v4500_v0  ;;  %329 = vst [vmem:[#allocation2 + $0xc8] sm:$0xff] %v4500_v0  ;;  %1140 = vmatpush1.msra.mxu1 %v795_v13  ;;  %916 = vmatprep.subr.mxu0 %v4500_v0  ;;  %v273_v29 = vld [vmem:[%s4676_s13 + $0x8] sm:$0xff]  ;;  %v274_v30 = vld [vmem:[%s4676_s13 + $0x10] sm:$0xff]  ;;  %p4434_p10 = por %p4433_p0, %p4432_p13 }
  0x64   : > { %330 = vst [vmem:[#allocation2 + $0xd0] sm:$0x3] %v4500_v0  ;;  %331 = vst [vmem:[#allocation2 + $0xd8] sm:$0xff] %v4500_v0  ;;  %1141 = vmatprep.subr.mxu1 %v4500_v0  ;;  %917 = vmatpush1.msra.mxu0 %v762_v14  ;;  %v275_v31 = vld [vmem:[%s4676_s13 + $0x18] sm:$0xff]  ;;  %v755_v32 = vld [vmem:[#allocation7 + $0x10] sm:$0xff] }
  0x65   : > { %332 = vst [vmem:[#allocation2 + $0xe0] sm:$0xff] %v4500_v0  ;;  %333 = vst [vmem:[#allocation2 + $0xe8] sm:$0x3] %v4500_v0  ;;  %1142 = vmatpush1.msra.mxu1 %v794_v15  ;;  %918 = vmatprep.subr.mxu0 %v4500_v0  ;;  %v787_v33 = vld [vmem:[#allocation7 + $0x110] sm:$0xff]  ;;  %v276_v34 = vld [vmem:[%s4676_s13 + $0x20] sm:$0xff]  ;;  %p4435_p3 = pnand %p4434_p10, %p4428_p12 }
  0x66   : > { %334 = vst [vmem:[#allocation2 + $0xf0] sm:$0xff] %v4500_v0  ;;  %335 = vst [vmem:[#allocation2 + $0xf8] sm:$0xff] %v4500_v0  ;;  %1143 = vmatprep.subr.mxu1 %v4500_v0  ;;  %919 = vmatpush1.msra.mxu0 %v761_v16  ;;  %v277_v35 = vld [vmem:[%s4676_s13 + $0x28] sm:$0xff]  ;;  %v278_v36 = vld [vmem:[%s4676_s13 + $0x30] sm:$0xff] }
  0x67   : > { %336 = vst [vmem:[#allocation2 + $0x100] sm:$0x3] %v4500_v0  ;;  %337 = vst [vmem:[#allocation2 + $0x108] sm:$0xff] %v4500_v0  ;;  %1144 = vmatpush1.msra.mxu1 %v793_v17  ;;  %920 = vmatprep.subr.mxu0 %v4500_v0  ;;  %v754_v37 = vld [vmem:[#allocation7 + $0x8] sm:$0xff]  ;;  %v279_v39 = vld [vmem:[%s4676_s13 + $0x38] sm:$0xff] }
  0x68   : > { %338 = vst [vmem:[#allocation2 + $0x110] sm:$0xff] %v4500_v0  ;;  %339 = vst [vmem:[#allocation2 + $0x118] sm:$0x3] %v4500_v0  ;;  %1145 = vmatprep.subr.mxu1 %v4500_v0  ;;  %921 = vmatpush1.msra.mxu0 %v760_v18  ;;  %v786_v38 = vld [vmem:[#allocation7 + $0x108] sm:$0xff]  ;;  %v280_v40 = vld [vmem:[%s4676_s13 + $0x40] sm:$0xff] }
  0x69   : > { %340 = vst [vmem:[#allocation2 + $0x120] sm:$0xff] %v4500_v0  ;;  %341 = vst [vmem:[#allocation2 + $0x128] sm:$0xff] %v4500_v0  ;;  %1146 = vmatpush1.msra.mxu1 %v792_v19  ;;  %922 = vmatprep.subr.mxu0 %v4500_v0  ;;  %v281_v41 = vld [vmem:[%s4676_s13 + $0x48] sm:$0xff]  ;;  %v753_v42 = vld [vmem:[#allocation7] sm:$0xff] }
  0x6a   : > { %342 = vst [vmem:[#allocation2 + $0x130] sm:$0x3] %v4500_v0  ;;  %343 = vst [vmem:[#allocation2 + $0x138] sm:$0xff] %v4500_v0  ;;  %1147 = vmatprep.subr.mxu1 %v4500_v0  ;;  %923 = vmatpush1.msra.mxu0 %v759_v20  ;;  %v785_v43 = vld [vmem:[#allocation7 + $0x100] sm:$0xff]  ;;  %v282_v44 = vld [vmem:[%s4676_s13 + $0x50] sm:$0xff] }
  0x6b   : > { %344 = vst [vmem:[#allocation2 + $0x140] sm:$0xff] %v4500_v0  ;;  %345 = vst [vmem:[#allocation2 + $0x148] sm:$0x3] %v4500_v0  ;;  %1148 = vmatpush1.msra.mxu1 %v791_v21  ;;  %924 = vmatprep.subr.mxu0 %v4500_v0  ;;  %v283_v45 = vld [vmem:[%s4676_s13 + $0x58] sm:$0xff]  ;;  %v284_v48 = vld [vmem:[%s4676_s13 + $0x60] sm:$0xff] }
  0x6c   : > { %346 = vst [vmem:[#allocation2 + $0x150] sm:$0xff] %v4500_v0  ;;  %347 = vst [vmem:[#allocation2 + $0x158] sm:$0xff] %v4500_v0  ;;  %1149 = vmatprep.subr.mxu1 %v4500_v0  ;;  %925 = vmatpush1.msra.mxu0 %v758_v22  ;;  %v784_v46 = vld [vmem:[#allocation7 + $0xf8] sm:$0xff]  ;;  %v783_v49 = vld [vmem:[#allocation7 + $0xf0] sm:$0xff] }
  0x6d   : > { %348 = vst [vmem:[#allocation2 + $0x160] sm:$0x3] %v4500_v0  ;;  %349 = vst [vmem:[#allocation2 + $0x168] sm:$0xff] %v4500_v0  ;;  %1150 = vmatpush1.msra.mxu1 %v790_v23  ;;  %926 = vmatprep.subr.mxu0 %v4500_v0  ;;  %v816_v47 = vld [vmem:[#allocation7 + $0x1f8] sm:$0xff]  ;;  %v815_v50 = vld [vmem:[#allocation7 + $0x1f0] sm:$0xff] }
  0x6e   : > { %350 = vst [vmem:[#allocation2 + $0x170] sm:$0xff] %v4500_v0  ;;  %351 = vst [vmem:[#allocation2 + $0x178] sm:$0x3] %v4500_v0  ;;  %1151 = vmatprep.subr.mxu1 %v4500_v0  ;;  %927 = vmatpush1.msra.mxu0 %v757_v24  ;;  %v782_v51 = vld [vmem:[#allocation7 + $0xe8] sm:$0xff]  ;;  %v781_v53 = vld [vmem:[#allocation7 + $0xe0] sm:$0xff] }
  0x6f   : > { %352 = vst [vmem:[#allocation2 + $0x180] sm:$0xff] %v4500_v0  ;;  %353 = vst [vmem:[#allocation2 + $0x188] sm:$0xff] %v4500_v0  ;;  %1152 = vmatpush1.msra.mxu1 %v789_v25  ;;  %928 = vmatprep.subr.mxu0 %v4500_v0  ;;  %v814_v52 = vld [vmem:[#allocation7 + $0x1e8] sm:$0xff]  ;;  %v813_v54 = vld [vmem:[#allocation7 + $0x1e0] sm:$0xff] }
  0x70   : > { %354 = vst [vmem:[#allocation2 + $0x190] sm:$0x3] %v4500_v0  ;;  %357 = vst [vmem:[#allocation2 + $0x1a8] sm:$0x3] %v4500_v0  ;;  %1153 = vmatprep.subr.mxu1 %v4500_v0  ;;  %929 = vmatpush1.msra.mxu0 %v756_v27  ;;  %v285_v55 = vld [vmem:[%s4676_s13 + $0x68] sm:$0xff]  ;;  %v780_v56 = vld [vmem:[#allocation7 + $0xd8] sm:$0xff] }
  0x71   : > { %2063 = vst [vmem:[#allocation3 + $0x10] sm:$0x3] %v4500_v0  ;;  %2064 = vst [vmem:[#allocation3 + $0x18] sm:$0xff] %v4500_v0  ;;  %1154 = vmatpush1.msra.mxu1 %v788_v28  ;;  %930 = vmatprep.subr.mxu0 %v4500_v0  ;;  %v812_v57 = vld [vmem:[#allocation7 + $0x1d8] sm:$0xff]  ;;  %v286_v58 = vld [vmem:[%s4676_s13 + $0x70] sm:$0xff] }
  0x72   : > { %2065 = vst [vmem:[#allocation3 + $0x20] sm:$0xff] %v4500_v0  ;;  %2066 = vst [vmem:[#allocation3 + $0x28] sm:$0x3] %v4500_v0  ;;  %1155 = vmatprep.subr.mxu1 %v4500_v0  ;;  %931 = vmatpush1.msra.mxu0 %v755_v32  ;;  %v287_v59 = vld [vmem:[%s4676_s13 + $0x78] sm:$0xff]  ;;  %v779_v60 = vld [vmem:[#allocation7 + $0xd0] sm:$0xff] }
  0x73   : > { %2067 = vst [vmem:[#allocation3 + $0x30] sm:$0xff] %v4500_v0  ;;  %2068 = vst [vmem:[#allocation3 + $0x38] sm:$0xff] %v4500_v0  ;;  %1156 = vmatpush1.msra.mxu1 %v787_v33  ;;  %932 = vmatprep.subr.mxu0 %v4500_v0  ;;  %v811_v61 = vld [vmem:[#allocation7 + $0x1d0] sm:$0xff]  ;;  %v288_v62 = vld [vmem:[%s4676_s13 + $0x80] sm:$0xff] }
  0x74   : > { %2069 = vst [vmem:[#allocation3 + $0x40] sm:$0x3] %v4500_v0  ;;  %2070 = vst [vmem:[#allocation3 + $0x48] sm:$0xff] %v4500_v0  ;;  %1157 = vmatprep.subr.mxu1 %v4500_v0  ;;  %933 = vmatpush1.msra.mxu0 %v754_v37  ;;  %v289_v63 = vld [vmem:[%s4676_s13 + $0x88] sm:$0xff]  ;;  %v290_v4 = vld [vmem:[%s4676_s13 + $0x90] sm:$0xff] }
  0x75   : > { %2071 = vst [vmem:[#allocation3 + $0x50] sm:$0xff] %v4500_v0  ;;  %2072 = vst [vmem:[#allocation3 + $0x58] sm:$0x3] %v4500_v0  ;;  %1158 = vmatpush1.msra.mxu1 %v786_v38  ;;  %934 = vmatprep.subr.mxu0 %v4500_v0  ;;  %v778_v2 = vld [vmem:[#allocation7 + $0xc8] sm:$0xff]  ;;  %v291_v5 = vld [vmem:[%s4676_s13 + $0x98] sm:$0xff] }
  0x76   : > { %2073 = vst [vmem:[#allocation3 + $0x60] sm:$0xff] %v4500_v0  ;;  %2074 = vst [vmem:[#allocation3 + $0x68] sm:$0xff] %v4500_v0  ;;  %1159 = vmatprep.subr.mxu1 %v4500_v0  ;;  %935 = vmatpush1.msra.mxu0 %v753_v42  ;;  %v810_v3 = vld [vmem:[#allocation7 + $0x1c8] sm:$0xff]  ;;  %v777_v6 = vld [vmem:[#allocation7 + $0xc0] sm:$0xff] }
  0x77   : > { %2075 = vst [vmem:[#allocation3 + $0x70] sm:$0x3] %v4500_v0  ;;  %2076 = vst [vmem:[#allocation3 + $0x78] sm:$0xff] %v4500_v0  ;;  %1160 = vmatpush1.msra.mxu1 %v785_v43  ;;  %936 = vmatprep.subr.mxu0 %v4500_v0  ;;  %v809_v7 = vld [vmem:[#allocation7 + $0x1c0] sm:$0xff]  ;;  %v776_v9 = vld [vmem:[#allocation7 + $0xb8] sm:$0xff] }
  0x78   : > { %2077 = vst [vmem:[#allocation3 + $0x80] sm:$0xff] %v4500_v0  ;;  %2078 = vst [vmem:[#allocation3 + $0x88] sm:$0x3] %v4500_v0  ;;  %1161 = vmatprep.subr.mxu1 %v4500_v0  ;;  %937 = vmatpush2.msra.mxu0 %v784_v46  ;;  %v292_v8 = vld [vmem:[%s4676_s13 + $0xa0] sm:$0xff]  ;;  %v808_v10 = vld [vmem:[#allocation7 + $0x1b8] sm:$0xff] }
  0x79   : > { %2079 = vst [vmem:[#allocation3 + $0x90] sm:$0xff] %v4500_v0  ;;  %2080 = vst [vmem:[#allocation3 + $0x98] sm:$0xff] %v4500_v0  ;;  %1162 = vmatpush2.msra.mxu1 %v816_v47  ;;  %938 = vmatprep.subr.mxu0 %v4500_v0  ;;  %v775_v11 = vld [vmem:[#allocation7 + $0xb0] sm:$0xff]  ;;  %v293_v13 = vld [vmem:[%s4676_s13 + $0xa8] sm:$0xff] }
  0x7a   : > { %2081 = vst [vmem:[#allocation3 + $0xa0] sm:$0x3] %v4500_v0  ;;  %2082 = vst [vmem:[#allocation3 + $0xa8] sm:$0xff] %v4500_v0  ;;  %1163 = vmatprep.subr.mxu1 %v4500_v0  ;;  %939 = vmatpush2.msra.mxu0 %v783_v49  ;;  %v807_v12 = vld [vmem:[#allocation7 + $0x1b0] sm:$0xff]  ;;  %v774_v14 = vld [vmem:[#allocation7 + $0xa8] sm:$0xff] }
  0x7b   : > { %2083 = vst [vmem:[#allocation3 + $0xb0] sm:$0xff] %v4500_v0  ;;  %2084 = vst [vmem:[#allocation3 + $0xb8] sm:$0x3] %v4500_v0  ;;  %1164 = vmatpush2.msra.mxu1 %v815_v50  ;;  %940 = vmatprep.subr.mxu0 %v4500_v0  ;;  %v806_v15 = vld [vmem:[#allocation7 + $0x1a8] sm:$0xff]  ;;  %v294_v16 = vld [vmem:[%s4676_s13 + $0xb0] sm:$0xff] }
  0x7c   : > { %2085 = vst [vmem:[#allocation3 + $0xc0] sm:$0xff] %v4500_v0  ;;  %2086 = vst [vmem:[#allocation3 + $0xc8] sm:$0xff] %v4500_v0  ;;  %1165 = vmatprep.subr.mxu1 %v4500_v0  ;;  %941 = vmatpush2.msra.mxu0 %v782_v51  ;;  %v773_v17 = vld [vmem:[#allocation7 + $0xa0] sm:$0xff]  ;;  %v295_v19 = vld [vmem:[%s4676_s13 + $0xb8] sm:$0xff] }
  0x7d   : > { %2087 = vst [vmem:[#allocation3 + $0xd0] sm:$0x3] %v4500_v0  ;;  %2088 = vst [vmem:[#allocation3 + $0xd8] sm:$0xff] %v4500_v0  ;;  %1166 = vmatpush2.msra.mxu1 %v814_v52  ;;  %942 = vmatprep.subr.mxu0 %v4500_v0  ;;  %v805_v18 = vld [vmem:[#allocation7 + $0x1a0] sm:$0xff]  ;;  %v772_v20 = vld [vmem:[#allocation7 + $0x98] sm:$0xff] }
  0x7e   : > { %2089 = vst [vmem:[#allocation3 + $0xe0] sm:$0xff] %v4500_v0  ;;  %2090 = vst [vmem:[#allocation3 + $0xe8] sm:$0x3] %v4500_v0  ;;  %1167 = vmatprep.subr.mxu1 %v4500_v0  ;;  %943 = vmatpush2.msra.mxu0 %v781_v53  ;;  %v804_v21 = vld [vmem:[#allocation7 + $0x198] sm:$0xff]  ;;  %v296_v22 = vld [vmem:[%s4676_s13 + $0xc0] sm:$0xff] }
  0x7f   : > { %2091 = vst [vmem:[#allocation3 + $0xf0] sm:$0xff] %v4500_v0  ;;  %2092 = vst [vmem:[#allocation3 + $0xf8] sm:$0xff] %v4500_v0  ;;  %1168 = vmatpush2.msra.mxu1 %v813_v54  ;;  %944 = vmatprep.subr.mxu0 %v4500_v0  ;;  %v771_v23 = vld [vmem:[#allocation7 + $0x90] sm:$0xff]  ;;  %v770_v27 = vld [vmem:[#allocation7 + $0x88] sm:$0xff] }
  0x80   : > { %2093 = vst [vmem:[#allocation3 + $0x100] sm:$0x3] %v4500_v0  ;;  %2094 = vst [vmem:[#allocation3 + $0x108] sm:$0xff] %v4500_v0  ;;  %1169 = vmatprep.subr.mxu1 %v4500_v0  ;;  %945 = vmatpush2.msra.mxu0 %v780_v56  ;;  %v803_v24 = vld [vmem:[#allocation7 + $0x190] sm:$0xff]  ;;  %v802_v28 = vld [vmem:[#allocation7 + $0x188] sm:$0xff] }
  0x81   : > { %2095 = vst [vmem:[#allocation3 + $0x110] sm:$0xff] %v4500_v0  ;;  %2096 = vst [vmem:[#allocation3 + $0x118] sm:$0x3] %v4500_v0  ;;  %1170 = vmatpush2.msra.mxu1 %v812_v57  ;;  %946 = vmatprep.subr.mxu0 %v4500_v0  ;;  %v393_v25 = vld [vmem:[#allocation2 + $0x10] sm:$0x3]  ;;  %v769_v33 = vld [vmem:[#allocation7 + $0x80] sm:$0xff] }
  0x82   : > { %2097 = vst [vmem:[#allocation3 + $0x120] sm:$0xff] %v4500_v0  ;;  %2098 = vst [vmem:[#allocation3 + $0x128] sm:$0xff] %v4500_v0  ;;  %1171 = vmatprep.subr.mxu1 %v4500_v0  ;;  %947 = vmatpush2.msra.mxu0 %v779_v60  ;;  %v832_v37 = vld [vmem:[#allocation7 + $0x278] sm:$0xff]  ;;  %v610_v42 = vrot.slane %v393_v25, 2  ;;  %v830_v54 = vld [vmem:[#allocation7 + $0x268] sm:$0xff] }
  0x83   : > { %2099 = vst [vmem:[#allocation3 + $0x130] sm:$0x3] %v4500_v0  ;;  %2100 = vst [vmem:[#allocation3 + $0x138] sm:$0xff] %v4500_v0  ;;  %1172 = vmatpush2.msra.mxu1 %v811_v61  ;;  %948 = vmatprep.subr.mxu0 %v4500_v0  ;;  %v303_v52 = vld [vmem:[%s4676_s13 + $0xf8] sm:$0xff]  ;;  %v829_v56 = vld [vmem:[#allocation7 + $0x260] sm:$0xff] }
  0x84   : > { %2101 = vst [vmem:[#allocation3 + $0x140] sm:$0xff] %v4500_v0  ;;  %2102 = vst [vmem:[#allocation3 + $0x148] sm:$0x3] %v4500_v0  ;;  %1173 = vmatprep.subr.mxu1 %v4500_v0  ;;  %949 = vmatpush2.msra.mxu0 %v778_v2 }
  0x85   : > { %2103 = vst [vmem:[#allocation3 + $0x150] sm:$0xff] %v4500_v0  ;;  %2104 = vst [vmem:[#allocation3 + $0x158] sm:$0xff] %v4500_v0  ;;  %1174 = vmatpush2.msra.mxu1 %v810_v3  ;;  %950 = vmatprep.subr.mxu0 %v4500_v0  ;;  %v827_v3 = vld [vmem:[#allocation7 + $0x250] sm:$0xff] }
  0x86   : > { %2105 = vst [vmem:[#allocation3 + $0x160] sm:$0x3] %v4500_v0  ;;  %2106 = vst [vmem:[#allocation3 + $0x168] sm:$0xff] %v4500_v0  ;;  %1175 = vmatprep.subr.mxu1 %v4500_v0  ;;  %951 = vmatpush2.msra.mxu0 %v777_v6 }
  0x87   : > { %2107 = vst [vmem:[#allocation3 + $0x170] sm:$0xff] %v4500_v0  ;;  %2108 = vst [vmem:[#allocation3 + $0x178] sm:$0x3] %v4500_v0  ;;  %1176 = vmatpush2.msra.mxu1 %v809_v7  ;;  %952 = vmatprep.subr.mxu0 %v4500_v0 }
  0x88   : > { %2109 = vst [vmem:[#allocation3 + $0x180] sm:$0xff] %v4500_v0  ;;  %2110 = vst [vmem:[#allocation3 + $0x188] sm:$0xff] %v4500_v0  ;;  %1177 = vmatprep.subr.mxu1 %v4500_v0  ;;  %953 = vmatpush2.msra.mxu0 %v776_v9  ;;  %v826_v9 = vld [vmem:[#allocation7 + $0x248] sm:$0xff] }
  0x89   : > { %2111 = vst [vmem:[#allocation3 + $0x190] sm:$0x3] %v4500_v0  ;;  %2114 = vst [vmem:[#allocation3 + $0x1a8] sm:$0x3] %v4500_v0  ;;  %1178 = vmatpush2.msra.mxu1 %v808_v10  ;;  %954 = vmatprep.subr.mxu0 %v4500_v0 }
  0x8a   : > { %359 = vst [vmem:[#allocation2 + $0x19] sm:$0xff] %v272_v26  ;;  %360 = vst [vmem:[#allocation2 + $0x21] sm:$0xff] %v273_v29  ;;  %1179 = vmatprep.subr.mxu1 %v4500_v0  ;;  %955 = vmatpush2.msra.mxu0 %v775_v11  ;;  %v297_v26 = vld [vmem:[%s4676_s13 + $0xc8] sm:$0xff]  ;;  %v298_v29 = vld [vmem:[%s4676_s13 + $0xd0] sm:$0xff] }
  0x8b   : > { %361 = vst [vmem:[#allocation2 + $0x31] sm:$0xff] %v274_v30  ;;  %362 = vst [vmem:[#allocation2 + $0x39] sm:$0xff] %v275_v31  ;;  %1180 = vmatpush2.msra.mxu1 %v807_v12  ;;  %956 = vmatprep.subr.mxu0 %v4500_v0  ;;  %v607_v30 = vrot.slane %v4500_v0, 2  ;;  %v497_v31 = vrot.slane %v393_v25, 1 }
  0x8c   : > { %363 = vst [vmem:[#allocation2 + $0x49] sm:$0xff] %v276_v34  ;;  %364 = vst [vmem:[#allocation2 + $0x51] sm:$0xff] %v277_v35  ;;  %1181 = vmatprep.subr.mxu1 %v4500_v0  ;;  %957 = vmatpush2.msra.mxu0 %v774_v14  ;;  %v801_v34 = vld [vmem:[#allocation7 + $0x180] sm:$0xff]  ;;  %v299_v35 = vld [vmem:[%s4676_s13 + $0xd8] sm:$0xff] }
  0x8d   : > { %365 = vst [vmem:[#allocation2 + $0x61] sm:$0xff] %v278_v36  ;;  %366 = vst [vmem:[#allocation2 + $0x69] sm:$0xff] %v279_v39  ;;  %1182 = vmatpush2.msra.mxu1 %v806_v15  ;;  %958 = vmatprep.subr.mxu0 %v4500_v0 }
  0x8e   : > { %367 = vst [vmem:[#allocation2 + $0x79] sm:$0xff] %v280_v40  ;;  %368 = vst [vmem:[#allocation2 + $0x81] sm:$0xff] %v281_v41  ;;  %1183 = vmatprep.subr.mxu1 %v4500_v0  ;;  %959 = vmatpush2.msra.mxu0 %v773_v17  ;;  %v300_v40 = vld [vmem:[%s4676_s13 + $0xe0] sm:$0xff]  ;;  %v498_v41 = vsel %vm493_vm0, %v4790_v1, %v497_v31  ;;  %v302_v1 = vld [vmem:[%s4676_s13 + $0xf0] sm:$0xff] }
  0x8f   : > { %369 = vst [vmem:[#allocation2 + $0x91] sm:$0xff] %v282_v44  ;;  %370 = vst [vmem:[#allocation2 + $0x99] sm:$0xff] %v283_v45  ;;  %1184 = vmatpush2.msra.mxu1 %v805_v18  ;;  %960 = vmatprep.subr.mxu0 %v4500_v0  ;;  %v301_v44 = vld [vmem:[%s4676_s13 + $0xe8] sm:$0xff]  ;;  %v831_v45 = vld [vmem:[#allocation7 + $0x270] sm:$0xff] }
  0x90   : > { %371 = vst [vmem:[#allocation2 + $0xa9] sm:$0xff] %v284_v48  ;;  %372 = vst [vmem:[#allocation2 + $0xb1] sm:$0xff] %v285_v55  ;;  %1185 = vmatprep.subr.mxu1 %v4500_v0  ;;  %961 = vmatpush2.msra.mxu0 %v772_v20  ;;  %v611_v48 = vsel %vm606_vm1, %v607_v30, %v610_v42  ;;  %v824_v17 = vld [vmem:[#allocation7 + $0x238] sm:$0xff]  ;;  %v823_v20 = vld [vmem:[#allocation7 + $0x230] sm:$0xff] }
  0x91   : > { %373 = vst [vmem:[#allocation2 + $0xc1] sm:$0xff] %v286_v58  ;;  %374 = vst [vmem:[#allocation2 + $0xc9] sm:$0xff] %v287_v59  ;;  %1186 = vmatpush2.msra.mxu1 %v804_v21  ;;  %962 = vmatprep.subr.mxu0 %v4500_v0  ;;  %v4879_v32 = vld [vmem:[#allocation2 + $0x20] sm:$0xff]  ;;  %v394_v36 = vld [vmem:[#allocation2 + $0x18] sm:$0xff] }
  0x92   : > { %375 = vst [vmem:[#allocation2 + $0xd9] sm:$0xff] %v288_v62  ;;  %376 = vst [vmem:[#allocation2 + $0xe1] sm:$0xff] %v289_v63  ;;  %1187 = vmatprep.subr.mxu1 %v4500_v0  ;;  %963 = vmatpush2.msra.mxu0 %v771_v23  ;;  %v499_v38 = vrot.slane %v394_v36, 1  ;;  %v500_v39 = vrot.slane %v4879_v32, 1  ;;  %v396_v43 = vld [vmem:[#allocation2 + $0x28] sm:$0x3] }
  0x93   : > { %377 = vst [vmem:[#allocation2 + $0xf1] sm:$0xff] %v290_v4  ;;  %378 = vst [vmem:[#allocation2 + $0xf9] sm:$0xff] %v291_v5  ;;  %1188 = vmatpush2.msra.mxu1 %v803_v24  ;;  %964 = vmatprep.subr.mxu0 %v4500_v0  ;;  %v502_v47 = vrot.slane %v396_v43, 1  ;;  %v612_v49 = vrot.slane %v394_v36, 2  ;;  %v613_v50 = vrot.slane %v4879_v32, 2  ;;  %v4901_v51 = vld [vmem:[#allocation2 + $0x38] sm:$0xff] }
  0x94   : > { %379 = vst [vmem:[#allocation2 + $0x109] sm:$0xff] %v292_v8  ;;  %380 = vst [vmem:[#allocation2 + $0x111] sm:$0xff] %v293_v13  ;;  %1189 = vmatprep.subr.mxu1 %v4500_v0  ;;  %965 = vmatpush2.msra.mxu0 %v770_v27  ;;  %v4894_v46 = vsel %vm493_vm0, %v499_v38, %v500_v39  ;;  %v4905_v53 = vld [vmem:[#allocation2 + $0x30] sm:$0xff]  ;;  %v505_v58 = vrot.slane %v4901_v51, 1  ;;  %v615_v60 = vrot.slane %v396_v43, 2  ;;  %v828_v62 = vld [vmem:[#allocation7 + $0x258] sm:$0xff] }
  0x95   : > { %381 = vst [vmem:[#allocation2 + $0x121] sm:$0xff] %v294_v16  ;;  %382 = vst [vmem:[#allocation2 + $0x129] sm:$0xff] %v295_v19  ;;  %1190 = vmatpush2.msra.mxu1 %v802_v28  ;;  %966 = vmatprep.subr.mxu0 %v4500_v0  ;;  %v4911_v55 = vsel %vm493_vm0, %v500_v39, %v502_v47  ;;  %v504_v57 = vrot.slane %v4905_v53, 1  ;;  %v4917_v59 = vsel %vm606_vm1, %v612_v49, %v613_v50  ;;  %v399_v61 = vld [vmem:[#allocation2 + $0x40] sm:$0x3]  ;;  %v4932_v7 = vld [vmem:[#allocation2 + $0x50] sm:$0xff] }
  0x96   : > { %383 = vst [vmem:[#allocation2 + $0x139] sm:$0xff] %v296_v22  ;;  %384 = vst [vmem:[#allocation2 + $0x141] sm:$0xff] %v297_v26  ;;  %1191 = vmatprep.subr.mxu1 %v4500_v0  ;;  %967 = vmatpush2.msra.mxu0 %v769_v33  ;;  %v507_v2 = vrot.slane %v399_v61, 1  ;;  %v4928_v4 = vsel %vm606_vm1, %v613_v50, %v615_v60  ;;  %v617_v5 = vrot.slane %v4905_v53, 2  ;;  %v618_v6 = vrot.slane %v4901_v51, 2  ;;  %v4935_v8 = vld [vmem:[#allocation2 + $0x48] sm:$0xff] }
  0x97   : > { %385 = vst [vmem:[#allocation2 + $0x151] sm:$0xff] %v298_v29  ;;  %386 = vst [vmem:[#allocation2 + $0x159] sm:$0xff] %v299_v35  ;;  %1192 = vmatpush2.msra.mxu1 %v801_v34  ;;  %969 = vmatmul.mubr.f32.vlgmr.msra.gmra.mxu0 %v4500_v0  ;;  %v4923_v63 = vsel %vm493_vm0, %v504_v57, %v505_v58  ;;  %v509_v11 = vrot.slane %v4935_v8, 1  ;;  %v510_v12 = vrot.slane %v4932_v7, 1  ;;  %v825_v13 = vld [vmem:[#allocation7 + $0x240] sm:$0xff]  ;;  %v620_v15 = vrot.slane %v399_v61, 2 }
  0x98   : > { %387 = vst [vmem:[#allocation2 + $0x169] sm:$0xff] %v300_v40  ;;  %1354 = vmatprep.subr.mxu0 %v4500_v0  ;;  %1193 = vmatprep.mubr.f32.mxu1 %v394_v36  ;;  %388 = vst [vmem:[#allocation2 + $0x171] sm:$0xff] %v301_v44  ;;  %v4941_v10 = vsel %vm493_vm0, %v505_v58, %v507_v2  ;;  %v4948_v14 = vsel %vm606_vm1, %v617_v5, %v618_v6  ;;  %v402_v16 = vld [vmem:[#allocation2 + $0x58] sm:$0x3]  ;;  %v622_v22 = vrot.slane %v4935_v8, 2  ;;  %v4964_v24 = vld [vmem:[#allocation2 + $0x68] sm:$0xff] }
  0x99   : > { %1355 = vmatpush1.msra.mxu0 %v832_v37  ;;  %1194 = vmatmul.mubr.f32.vlgmr.msra.gmra.mxu1 %v607_v30  ;;  %389 = vst [vmem:[#allocation2 + $0x181] sm:$0xff] %v302_v1  ;;  %390 = vst [vmem:[#allocation2 + $0x189] sm:$0xff] %v303_v52  ;;  %v4955_v18 = vsel %vm493_vm0, %v509_v11, %v510_v12  ;;  %v512_v19 = vrot.slane %v402_v16, 1  ;;  %v4960_v21 = vsel %vm606_vm1, %v618_v6, %v620_v15  ;;  %v4967_v25 = vld [vmem:[#allocation2 + $0x60] sm:$0xff]  ;;  %v822_v26 = vld [vmem:[#allocation7 + $0x228] sm:$0xff] }
  0x9a   : > { %973 = vmatprep.mubr.f32.mxu0 %v498_v41  ;;  %1356 = vmatprep.subr.mxu0 %v4500_v0  ;;  %v623_v23 = vrot.slane %v4932_v7, 2  ;;  %v514_v28 = vrot.slane %v4967_v25, 1  ;;  %v515_v29 = vrot.slane %v4964_v24, 1  ;;  %v821_v30 = vld [vmem:[#allocation7 + $0x220] sm:$0xff]  ;;  %v405_v33 = vld [vmem:[#allocation2 + $0x70] sm:$0x3] }
  0x9b   : > { %1198 = vmatprep.mubr.f32.mxu1 %v4879_v32  ;;  %974 = vmatmul.mubr.f32.gmra.mxu0 %v4500_v0  ;;  %v4973_v27 = vsel %vm493_vm0, %v510_v12, %v512_v19  ;;  %v820_v34 = vld [vmem:[#allocation7 + $0x218] sm:$0xff]  ;;  %v819_v37 = vld [vmem:[#allocation7 + $0x210] sm:$0xff]  ;;  %v627_v39 = vrot.slane %v4967_v25, 2  ;;  %v628_v40 = vrot.slane %v4964_v24, 2  ;;  %v4996_v41 = vld [vmem:[#allocation2 + $0x80] sm:$0xff]  ;;  %v630_v49 = vrot.slane %v405_v33, 2 }
  0x9c   : > { %1579 = vmatprep.subr.mxu1 %v4500_v0  ;;  %1357 = vmatpush1.msra.mxu0 %v831_v45  ;;  %v4980_v31 = vsel %vm606_vm1, %v622_v22, %v623_v23  ;;  %v4987_v35 = vsel %vm493_vm0, %v514_v28, %v515_v29  ;;  %v4999_v42 = vld [vmem:[#allocation2 + $0x78] sm:$0xff]  ;;  %v818_v43 = vld [vmem:[#allocation7 + $0x208] sm:$0xff]  ;;  %v520_v47 = vrot.slane %v4996_v41, 1  ;;  %v817_v1 = vld [vmem:[#allocation7 + $0x200] sm:$0xff]  ;;  %v633_v60 = vrot.slane %v4996_v41, 2 }
  0x9d   : > { %978 = vmatprep.mubr.f32.mxu0 %v4894_v46  ;;  %1199 = vmatmul.mubr.f32.gmra.mxu1 %v611_v48  ;;  %v519_v45 = vrot.slane %v4999_v42, 1  ;;  %v5012_v48 = vsel %vm606_vm1, %v627_v39, %v628_v40  ;;  %v408_v50 = vld [vmem:[#allocation2 + $0x88] sm:$0x3]  ;;  %v864_v52 = vld [vmem:[#allocation7 + $0x378] sm:$0xff]  ;;  %v5021_v57 = vld [vmem:[#allocation2] sm:$0xff]  ;;  %v5026_v58 = vsel %vm606_vm1, %v628_v40, %v630_v49 }
  0x9e   : > { %1358 = vmatprep.subr.mxu0 %v4500_v0  ;;  %1203 = vmatprep.mubr.f32.mxu1 %v4905_v53  ;;  %v5030_v61 = vld [vmem:[#allocation2 + $0x98] sm:$0xff]  ;;  %v847_v2 = vld [vmem:[#allocation7 + $0x2f0] sm:$0xff]  ;;  %v635_v12 = vrot.slane %v408_v50, 2  ;;  %v862_v15 = vld [vmem:[#allocation7 + $0x368] sm:$0xff] }
  0x9f   : > { %1359 = vmatpush1.msra.mxu0 %v830_v54  ;;  %v5019_v54 = vsel %vm493_vm0, %v519_v45, %v520_v47  ;;  %1580 = vmatpush1.msra.mxu1 %v864_v52  ;;  %v846_v19 = vld [vmem:[#allocation7 + $0x2e8] sm:$0xff]  ;;  %v414_v39 = vld [vmem:[#allocation2 + $0xb8] sm:$0x3]  ;;  %v845_v40 = vld [vmem:[#allocation7 + $0x2e0] sm:$0xff] }
  0xa0   : > { %979 = vmatmul.mubr.f32.gmra.mxu0 %v394_v36  ;;  %1360 = vmatprep.subr.mxu0 %v4500_v0  ;;  %v517_v36 = vrot.slane %v405_v33, 1  ;;  %v5065_v28 = vld [vmem:[#allocation2 + $0xa8] sm:$0xff]  ;;  %v5097_v52 = vld [vmem:[#allocation2 + $0xc0] sm:$0xff] }
  0xa1   : > { %983 = vmatprep.mubr.f32.mxu0 %v4911_v55  ;;  %1361 = vmatpush1.msra.mxu0 %v829_v56  ;;  %v522_v56 = vrot.slane %v408_v50, 1  ;;  %v642_v49 = vrot.slane %v5065_v28, 2 }
  0xa2   : > { %1204 = vmatmul.mubr.f32.gmra.mxu1 %v4917_v59  ;;  %1362 = vmatprep.subr.mxu0 %v4500_v0  ;;  %v5005_v44 = vsel %vm493_vm0, %v515_v29, %v517_v36  ;;  %v861_v29 = vld [vmem:[#allocation7 + $0x360] sm:$0xff] }
  0xa3   : > { %1208 = vmatprep.mubr.f32.mxu1 %v4901_v51  ;;  %1363 = vmatpush1.msra.mxu0 %v828_v62  ;;  %v5033_v62 = vld [vmem:[#allocation2 + $0x90] sm:$0xff]  ;;  %v5039_v5 = vsel %vm493_vm0, %v520_v47, %v522_v56  ;;  %v532_v47 = vrot.slane %v414_v39, 1  ;;  %v858_v56 = vld [vmem:[#allocation7 + $0x348] sm:$0xff] }
  0xa4   : > { %984 = vmatmul.mubr.f32.gmra.mxu0 %v4879_v32  ;;  %1364 = vmatprep.subr.mxu0 %v4500_v0  ;;  %v625_v32 = vrot.slane %v402_v16, 2  ;;  %v524_v6 = vrot.slane %v5033_v62, 1  ;;  %v637_v22 = vrot.slane %v5033_v62, 2 }
  0xa5   : > { %988 = vmatprep.mubr.f32.mxu0 %v4923_v63  ;;  %1365 = vmatpush1.msra.mxu0 %v827_v3  ;;  %v863_v3 = vld [vmem:[#allocation7 + $0x370] sm:$0xff] }
  0xa6   : > { %1209 = vmatmul.mubr.f32.gmra.mxu1 %v4928_v4  ;;  %1366 = vmatprep.subr.mxu0 %v4500_v0  ;;  %v4992_v38 = vsel %vm606_vm1, %v623_v23, %v625_v32  ;;  %v638_v23 = vrot.slane %v5030_v61, 2  ;;  %v529_v32 = vrot.slane %v5065_v28, 1 }
  0xa7   : > { %1213 = vmatprep.mubr.f32.mxu1 %v4935_v8  ;;  %1367 = vmatpush1.msra.mxu0 %v826_v9  ;;  %v525_v9 = vrot.slane %v5030_v61, 1 }
  0xa8   : > { %989 = vmatmul.mubr.f32.gmra.mxu0 %v4905_v53  ;;  %1368 = vmatprep.subr.mxu0 %v4500_v0  ;;  %v5078_v36 = vsel %vm606_vm1, %v637_v22, %v638_v23 }
  0xa9   : > { %993 = vmatprep.mubr.f32.mxu0 %v4941_v10  ;;  %1369 = vmatpush1.msra.mxu0 %v825_v13  ;;  %v411_v13 = vld [vmem:[#allocation2 + $0xa0] sm:$0x3]  ;;  %v5053_v16 = vsel %vm493_vm0, %v524_v6, %v525_v9 }
  0xaa   : > { %1214 = vmatmul.mubr.f32.gmra.mxu1 %v4948_v14  ;;  %1370 = vmatprep.subr.mxu0 %v4500_v0 }
  0xab   : > { %1218 = vmatprep.mubr.f32.mxu1 %v4932_v7  ;;  %1371 = vmatpush1.msra.mxu0 %v824_v17  ;;  %v527_v17 = vrot.slane %v411_v13, 1 }
  0xac   : > { %994 = vmatmul.mubr.f32.gmra.mxu0 %v4901_v51  ;;  %1372 = vmatprep.subr.mxu0 %v4500_v0  ;;  %v848_v51 = vld [vmem:[#allocation7 + $0x2f8] sm:$0xff] }
  0xad   : > { %998 = vmatprep.mubr.f32.mxu0 %v4955_v18  ;;  %1373 = vmatpush1.msra.mxu0 %v823_v20  ;;  %v5058_v20 = vsel %vm606_vm1, %v633_v60, %v635_v12  ;;  %v417_v12 = vld [vmem:[#allocation2 + $0xd0] sm:$0x3] }
  0xae   : > { %1219 = vmatmul.mubr.f32.gmra.mxu1 %v4960_v21  ;;  %1374 = vmatprep.subr.mxu0 %v4500_v0 }
  0xaf   : > { %1223 = vmatprep.mubr.f32.mxu1 %v4967_v25  ;;  %1375 = vmatpush1.msra.mxu0 %v822_v26  ;;  %v5062_v26 = vld [vmem:[#allocation2 + $0xb0] sm:$0xff] }
  0xb0   : > { %999 = vmatmul.mubr.f32.gmra.mxu0 %v4935_v8  ;;  %1376 = vmatprep.subr.mxu0 %v4500_v0  ;;  %v530_v33 = vrot.slane %v5062_v26, 1  ;;  %v643_v50 = vrot.slane %v5062_v26, 2 }
  0xb1   : > { %1003 = vmatprep.mubr.f32.mxu0 %v4973_v27  ;;  %1377 = vmatpush1.msra.mxu0 %v821_v30  ;;  %v5071_v30 = vsel %vm493_vm0, %v525_v9, %v527_v17  ;;  %v645_v9 = vrot.slane %v414_v39, 2  ;;  %v537_v17 = vrot.slane %v417_v12, 1 }
  0xb2   : > { %1224 = vmatmul.mubr.f32.gmra.mxu1 %v4980_v31  ;;  %1378 = vmatprep.subr.mxu0 %v4500_v0  ;;  %v5085_v45 = vsel %vm493_vm0, %v529_v32, %v530_v33  ;;  %v5110_v6 = vsel %vm606_vm1, %v642_v49, %v643_v50  ;;  %v5126_v32 = vld [vmem:[#allocation2 + $0xe0] sm:$0xff]  ;;  %v650_v49 = vrot.slane %v417_v12, 2 }
  0xb3   : > { %1228 = vmatprep.mubr.f32.mxu1 %v4964_v24  ;;  %1379 = vmatpush1.msra.mxu0 %v820_v34  ;;  %v860_v34 = vld [vmem:[#allocation7 + $0x358] sm:$0xff]  ;;  %v5122_v22 = vsel %vm606_vm1, %v643_v50, %v645_v9  ;;  %6995 = vst [vmem:[#allocation14_spill] sm:$0xff] %v5126_v32  ;;  %v420_v50 = vld [vmem:[#allocation2 + $0xe8] sm:$0x3] }
  0xb4   : > { %1004 = vmatmul.mubr.f32.gmra.mxu0 %v4932_v7  ;;  %1380 = vmatprep.subr.mxu0 %v4500_v0 }
  0xb5   : > { %1008 = vmatprep.mubr.f32.mxu0 %v4987_v35  ;;  %1381 = vmatpush1.msra.mxu0 %v819_v37  ;;  %v640_v37 = vrot.slane %v411_v13, 2  ;;  %v857_v13 = vld [vmem:[#allocation7 + $0x340] sm:$0xff] }
  0xb6   : > { %1229 = vmatmul.mubr.f32.gmra.mxu1 %v4992_v38  ;;  %1382 = vmatprep.subr.mxu0 %v4500_v0 }
  0xb7   : > { %1233 = vmatprep.mubr.f32.mxu1 %v4999_v42  ;;  %1383 = vmatpush1.msra.mxu0 %v818_v43  ;;  %v859_v43 = vld [vmem:[#allocation7 + $0x350] sm:$0xff] }
  0xb8   : > { %1009 = vmatmul.mubr.f32.gmra.mxu0 %v4967_v25  ;;  %1384 = vmatprep.subr.mxu0 %v4500_v0  ;;  %v632_v0 = vrot.slane %v4999_v42, 2 }
  0xb9   : > { %1013 = vmatprep.mubr.f32.mxu0 %v5005_v44  ;;  %1385 = vmatpush1.msra.mxu0 %v817_v1  ;;  %v5090_v1 = vsel %vm606_vm1, %v638_v23, %v640_v37  ;;  %v647_v23 = vrot.slane %v5097_v52, 2  ;;  %v855_v37 = vld [vmem:[#allocation7 + $0x330] sm:$0xff] }
  0xba   : > { %1234 = vmatmul.mubr.f32.gmra.mxu1 %v5012_v48  ;;  %1386 = vmatprep.subr.mxu0 %v5021_v57  ;;  %v5046_v11 = vsel %vm606_vm1, %v632_v0, %v633_v60  ;;  %v5103_v0 = vsel %vm493_vm0, %v530_v33, %v532_v47  ;;  %v534_v60 = vrot.slane %v5097_v52, 1  ;;  %v5129_v33 = vld [vmem:[#allocation2 + $0xd8] sm:$0xff] }
  0xbb   : > { %1238 = vmatprep.mubr.f32.mxu1 %v4996_v41  ;;  %1387 = vmatpush2.msra.mxu0 %v848_v51  ;;  %v5094_v51 = vld [vmem:[#allocation2 + $0xc8] sm:$0xff]  ;;  %6996 = vst [vmem:[#allocation15_spill] sm:$0xff] %v5129_v33  ;;  %v652_v12 = vrot.slane %v5129_v33, 2 }
  0xbc   : > { %1014 = vmatmul.mubr.f32.gmra.mxu0 %v4964_v24  ;;  %1388 = vmatprep.subr.mxu0 %v5021_v57 }
  0xbd   : > { %1018 = vmatprep.mubr.f32.mxu0 %v5019_v54  ;;  %1581 = vmatprep.subr.mxu1 %v5021_v57 }
  0xbe   : > { %1239 = vmatmul.mubr.f32.gmra.mxu1 %v5026_v58  ;;  %1389 = vmatpush2.msra.mxu0 %v847_v2  ;;  %v535_v2 = vrot.slane %v5094_v51, 1 }
  0xbf   : > { %1243 = vmatprep.mubr.f32.mxu1 %v5033_v62  ;;  %1582 = vmatpush1.msra.mxu1 %v863_v3  ;;  %v844_v3 = vld [vmem:[#allocation7 + $0x2d8] sm:$0xff] }
  0xc0   : > { %1019 = vmatmul.mubr.f32.gmra.mxu0 %v4999_v42  ;;  %1583 = vmatprep.subr.mxu1 %v5021_v57  ;;  %v5135_v39 = vsel %vm493_vm0, %v535_v2, %v537_v17  ;;  %v5158_v17 = vld [vmem:[#allocation2 + $0xf8] sm:$0xff] }
  0xc1   : > { %1023 = vmatprep.mubr.f32.mxu0 %v5039_v5  ;;  %1390 = vmatprep.subr.mxu0 %v5021_v57  ;;  %6999 = vst [vmem:[#allocation18_spill] sm:$0xff] %v5158_v17 }
  0xc2   : > { %1244 = vmatmul.mubr.f32.gmra.mxu1 %v5046_v11  ;;  %1391 = vmatpush2.msra.mxu0 %v846_v19  ;;  %v856_v19 = vld [vmem:[#allocation7 + $0x338] sm:$0xff] }
  0xc3   : > { %1248 = vmatprep.mubr.f32.mxu1 %v5030_v61  ;;  %1584 = vmatpush1.msra.mxu1 %v862_v15  ;;  %v5117_v15 = vsel %vm493_vm0, %v534_v60, %v535_v2  ;;  %v542_v2 = vrot.slane %v420_v50, 1 }
  0xc4   : > { %1024 = vmatmul.mubr.f32.gmra.mxu0 %v4996_v41  ;;  %1585 = vmatprep.subr.mxu1 %v5021_v57 }
  0xc5   : > { %1028 = vmatprep.mubr.f32.mxu0 %v5053_v16  ;;  %1392 = vmatprep.subr.mxu0 %v5021_v57 }
  0xc6   : > { %1249 = vmatmul.mubr.f32.gmra.mxu1 %v5058_v20  ;;  %1393 = vmatpush2.msra.mxu0 %v845_v40  ;;  %v539_v40 = vrot.slane %v5129_v33, 1 }
  0xc7   : > { %1253 = vmatprep.mubr.f32.mxu1 %v5065_v28  ;;  %1586 = vmatpush1.msra.mxu1 %v861_v29  ;;  %v648_v29 = vrot.slane %v5094_v51, 2 }
  0xc8   : > { %1029 = vmatmul.mubr.f32.gmra.mxu0 %v5033_v62  ;;  %1587 = vmatprep.subr.mxu1 %v5021_v57 }
  0xc9   : > { %1033 = vmatprep.mubr.f32.mxu0 %v5071_v30  ;;  %1588 = vmatpush1.msra.mxu1 %v860_v34  ;;  %v843_v34 = vld [vmem:[#allocation7 + $0x2d0] sm:$0xff]  ;;  %v5142_v47 = vsel %vm606_vm1, %v647_v23, %v648_v29  ;;  %v5154_v9 = vsel %vm606_vm1, %v648_v29, %v650_v49  ;;  %v853_v23 = vld [vmem:[#allocation7 + $0x320] sm:$0xff] }
  0xca   : > { %1254 = vmatmul.mubr.f32.gmra.mxu1 %v5078_v36  ;;  %1589 = vmatprep.subr.mxu1 %v5021_v57  ;;  %6998 = vst [vmem:[#allocation17_spill] sm:$0xff] %v5154_v9 }
  0xcb   : > { %1258 = vmatprep.mubr.f32.mxu1 %v5062_v26  ;;  %1590 = vmatpush1.msra.mxu1 %v859_v43  ;;  %v540_v43 = vrot.slane %v5126_v32, 1 }
  0xcc   : > { %1034 = vmatmul.mubr.f32.gmra.mxu0 %v5030_v61  ;;  %1591 = vmatprep.subr.mxu1 %v5021_v57 }
  0xcd   : > { %1038 = vmatprep.mubr.f32.mxu0 %v5085_v45  ;;  %1394 = vmatprep.subr.mxu0 %v5021_v57  ;;  %v5149_v60 = vsel %vm493_vm0, %v539_v40, %v540_v43  ;;  %v5167_v29 = vsel %vm493_vm0, %v540_v43, %v542_v2  ;;  %v852_v40 = vld [vmem:[#allocation7 + $0x318] sm:$0xff]  ;;  %v841_v43 = vld [vmem:[#allocation7 + $0x2c0] sm:$0xff]  ;;  %v851_v2 = vld [vmem:[#allocation7 + $0x310] sm:$0xff] }
  0xce   : > { %1259 = vmatmul.mubr.f32.gmra.mxu1 %v5090_v1  ;;  %1395 = vmatpush2.msra.mxu0 %v844_v3  ;;  %6997 = vst [vmem:[#allocation16_spill] sm:$0xff] %v5149_v60  ;;  %v842_v3 = vld [vmem:[#allocation7 + $0x2c8] sm:$0xff]  ;;  %7001 = vst [vmem:[#allocation20_spill] sm:$0xff] %v5167_v29 }
  0xcf   : > { %1263 = vmatprep.mubr.f32.mxu1 %v5097_v52  ;;  %1592 = vmatpush1.msra.mxu1 %v858_v56  ;;  %v854_v56 = vld [vmem:[#allocation7 + $0x328] sm:$0xff] }
  0xd0   : > { %1039 = vmatmul.mubr.f32.gmra.mxu0 %v5065_v28  ;;  %1593 = vmatprep.subr.mxu1 %v5021_v57 }
  0xd1   : > { %1043 = vmatprep.mubr.f32.mxu0 %v5103_v0  ;;  %1396 = vmatprep.subr.mxu0 %v5021_v57 }
  0xd2   : > { %1264 = vmatmul.mubr.f32.gmra.mxu1 %v5110_v6  ;;  %1397 = vmatpush2.msra.mxu0 %v843_v34 }
  0xd3   : > { %1268 = vmatprep.mubr.f32.mxu1 %v5094_v51  ;;  %1594 = vmatpush1.msra.mxu1 %v857_v13  ;;  %v653_v13 = vrot.slane %v5126_v32, 2 }
  0xd4   : > { %1044 = vmatmul.mubr.f32.gmra.mxu0 %v5062_v26  ;;  %1595 = vmatprep.subr.mxu1 %v5021_v57 }
  0xd5   : > { %1048 = vmatprep.mubr.f32.mxu0 %v5117_v15  ;;  %1596 = vmatpush1.msra.mxu1 %v856_v19  ;;  %v5161_v19 = vld [vmem:[#allocation2 + $0xf0] sm:$0xff]  ;;  %v5174_v49 = vsel %vm606_vm1, %v652_v12, %v653_v13 }
  0xd6   : > { %1269 = vmatmul.mubr.f32.gmra.mxu1 %v5122_v22  ;;  %1597 = vmatprep.subr.mxu1 %v5021_v57  ;;  %7000 = vst [vmem:[#allocation19_spill] sm:$0xff] %v5161_v19  ;;  %v544_v34 = vrot.slane %v5161_v19, 1  ;;  %7002 = vst [vmem:[#allocation21_spill] sm:$0xff] %v5174_v49  ;;  %v657_v12 = vrot.slane %v5161_v19, 2 }
  0xd7   : > { %1273 = vmatprep.mubr.f32.mxu1 %v5129_v33  ;;  %1598 = vmatpush1.msra.mxu1 %v855_v37  ;;  %v545_v37 = vrot.slane %v5158_v17, 1 }
  0xd8   : > { %1049 = vmatmul.mubr.f32.gmra.mxu0 %v5097_v52  ;;  %1599 = vmatprep.subr.mxu1 %v5021_v57 }
  0xd9   : > { %1053 = vmatprep.mubr.f32.mxu0 %v5135_v39  ;;  %1398 = vmatprep.subr.mxu0 %v5021_v57 }
  0xda   : > { %1274 = vmatmul.mubr.f32.gmra.mxu1 %v5142_v47  ;;  %1399 = vmatpush2.msra.mxu0 %v842_v3  ;;  %v5181_v3 = vsel %vm493_vm0, %v544_v34, %v545_v37  ;;  %v850_v34 = vld [vmem:[#allocation7 + $0x308] sm:$0xff] }
  0xdb   : > { %1278 = vmatprep.mubr.f32.mxu1 %v5126_v32  ;;  %1600 = vmatpush1.msra.mxu1 %v854_v56  ;;  %v655_v56 = vrot.slane %v420_v50, 2  ;;  %7003 = vst [vmem:[#allocation22_spill] sm:$0xff] %v5181_v3 }
  0xdc   : > { %1054 = vmatmul.mubr.f32.gmra.mxu0 %v5094_v51  ;;  %1601 = vmatprep.subr.mxu1 %v5021_v57 }
  0xdd   : > { %1058 = vmatprep.mubr.f32.mxu0 %v5149_v60  ;;  %1400 = vmatprep.subr.mxu0 %v5021_v57  ;;  %v423_v60 = vld [vmem:[#allocation2 + $0x100] sm:$0x3]  ;;  %v5186_v50 = vsel %vm606_vm1, %v653_v13, %v655_v56 }
  0xde   : > { %1279 = vmatmul.mubr.f32.gmra.mxu1 %v5154_v9  ;;  %v547_v9 = vrot.slane %v423_v60, 1  ;;  %7004 = vst [vmem:[#allocation23_spill] sm:$0xff] %v5186_v50  ;;  %1401 = vmatpush2.msra.mxu0 %v841_v43  ;;  %v840_v43 = vld [vmem:[#allocation7 + $0x2b8] sm:$0xff] }
  0xdf   : > { %1283 = vmatprep.mubr.f32.mxu1 %v5161_v19  ;;  %1602 = vmatpush1.msra.mxu1 %v853_v23  ;;  %v658_v23 = vrot.slane %v5158_v17, 2 }
  0xe0   : > { %1059 = vmatmul.mubr.f32.gmra.mxu0 %v5129_v33  ;;  %1603 = vmatprep.subr.mxu1 %v5021_v57  ;;  %v5199_v13 = vsel %vm493_vm0, %v545_v37, %v547_v9  ;;  %v849_v9 = vld [vmem:[#allocation7 + $0x300] sm:$0xff]  ;;  %v880_v33 = vld [vmem:[#allocation7 + $0x3f8] sm:$0xff] }
  0xe1   : > { %1063 = vmatprep.mubr.f32.mxu0 %v5167_v29  ;;  %1604 = vmatpush1.msra.mxu1 %v852_v40  ;;  %v5190_v29 = vld [vmem:[#allocation2 + $0x110] sm:$0xff]  ;;  %v5193_v40 = vld [vmem:[#allocation2 + $0x108] sm:$0xff]  ;;  %7007 = vst [vmem:[#allocation26_spill] sm:$0xff] %v5199_v13 }
  0xe2   : > { %1284 = vmatmul.mubr.f32.gmra.mxu1 %v5174_v49  ;;  %1605 = vmatprep.subr.mxu1 %v5021_v57  ;;  %7005 = vst [vmem:[#allocation24_spill] sm:$0xff] %v5190_v29  ;;  %7006 = vst [vmem:[#allocation25_spill] sm:$0xff] %v5193_v40  ;;  %v549_v56 = vrot.slane %v5193_v40, 1  ;;  %v550_v49 = vrot.slane %v5190_v29, 1 }
  0xe3   : > { %1288 = vmatprep.mubr.f32.mxu1 %v5158_v17  ;;  %1606 = vmatpush1.msra.mxu1 %v851_v2  ;;  %v5206_v2 = vsel %vm606_vm1, %v657_v12, %v658_v23  ;;  %v662_v12 = vrot.slane %v5193_v40, 2 }
  0xe4   : > { %1064 = vmatmul.mubr.f32.gmra.mxu0 %v5126_v32  ;;  %1607 = vmatprep.subr.mxu1 %v5021_v57  ;;  %7008 = vst [vmem:[#allocation27_spill] sm:$0xff] %v5206_v2  ;;  %v426_v32 = vld [vmem:[#allocation2 + $0x118] sm:$0x3]  ;;  %v5213_v37 = vsel %vm493_vm0, %v549_v56, %v550_v49  ;;  %v5225_v56 = vld [vmem:[#allocation2 + $0x120] sm:$0xff] }
  0xe5   : > { %1068 = vmatprep.mubr.f32.mxu0 %v5181_v3  ;;  %1402 = vmatprep.subr.mxu0 %v5021_v57  ;;  %v660_v3 = vrot.slane %v423_v60, 2  ;;  %7009 = vst [vmem:[#allocation28_spill] sm:$0xff] %v5213_v37  ;;  %7012 = vst [vmem:[#allocation31_spill] sm:$0xff] %v5225_v56 }
  0xe6   : > { %1289 = vmatmul.mubr.f32.gmra.mxu1 %v5186_v50  ;;  %1403 = vmatpush2.msra.mxu0 %v840_v43  ;;  %v552_v50 = vrot.slane %v426_v32, 1  ;;  %v839_v43 = vld [vmem:[#allocation7 + $0x2b0] sm:$0xff] }
  0xe7   : > { %1293 = vmatprep.mubr.f32.mxu1 %v5193_v40  ;;  %1608 = vmatpush1.msra.mxu1 %v850_v34  ;;  %v5218_v60 = vsel %vm606_vm1, %v658_v23, %v660_v3  ;;  %v663_v34 = vrot.slane %v5190_v29, 2  ;;  %v554_v23 = vrot.slane %v5225_v56, 1 }
  0xe8   : > { %1069 = vmatmul.mubr.f32.gmra.mxu0 %v5161_v19  ;;  %1609 = vmatprep.subr.mxu1 %v5021_v57  ;;  %7010 = vst [vmem:[#allocation29_spill] sm:$0xff] %v5218_v60  ;;  %v5231_v3 = vsel %vm493_vm0, %v550_v49, %v552_v50  ;;  %v665_v19 = vrot.slane %v426_v32, 2 }
  0xe9   : > { %1073 = vmatprep.mubr.f32.mxu0 %v5199_v13  ;;  %1404 = vmatprep.subr.mxu0 %v5021_v57  ;;  %v5222_v13 = vld [vmem:[#allocation2 + $0x128] sm:$0xff]  ;;  %7013 = vst [vmem:[#allocation32_spill] sm:$0xff] %v5231_v3 }
  0xea   : > { %1294 = vmatmul.mubr.f32.gmra.mxu1 %v5206_v2  ;;  %7011 = vst [vmem:[#allocation30_spill] sm:$0xff] %v5222_v13  ;;  %v879_v2 = vld [vmem:[#allocation7 + $0x3f0] sm:$0xff]  ;;  %1405 = vmatpush2.msra.mxu0 %v839_v43  ;;  %v5250_v32 = vsel %vm606_vm1, %v663_v34, %v665_v19  ;;  %v668_v43 = vrot.slane %v5222_v13, 2 }
  0xeb   : > { %1298 = vmatprep.mubr.f32.mxu1 %v5190_v29  ;;  %1610 = vmatpush1.msra.mxu1 %v849_v9  ;;  %v555_v9 = vrot.slane %v5222_v13, 1  ;;  %7016 = vst [vmem:[#allocation35_spill] sm:$0xff] %v5250_v32 }
  0xec   : > { %1074 = vmatmul.mubr.f32.gmra.mxu0 %v5158_v17  ;;  %1611 = vmatprep.subr.mxu1 %v5021_v57  ;;  %v5238_v17 = vsel %vm606_vm1, %v662_v12, %v663_v34  ;;  %v838_v12 = vld [vmem:[#allocation7 + $0x2a8] sm:$0xff] }
  0xed   : > { %1078 = vmatprep.mubr.f32.mxu0 %v5213_v37  ;;  %1612 = vmatpush2.msra.mxu1 %v880_v33  ;;  %7014 = vst [vmem:[#allocation33_spill] sm:$0xff] %v5238_v17  ;;  %v429_v37 = vld [vmem:[#allocation2 + $0x130] sm:$0x3]  ;;  %v878_v33 = vld [vmem:[#allocation7 + $0x3e8] sm:$0xff]  ;;  %v5245_v49 = vsel %vm493_vm0, %v554_v23, %v555_v9  ;;  %v5257_v23 = vld [vmem:[#allocation2 + $0x138] sm:$0xff] }
  0xee   : > { %1299 = vmatmul.mubr.f32.gmra.mxu1 %v5218_v60  ;;  %1613 = vmatprep.subr.mxu1 %v5021_v57  ;;  %7015 = vst [vmem:[#allocation34_spill] sm:$0xff] %v5245_v49  ;;  %v557_v50 = vrot.slane %v429_v37, 1  ;;  %v559_v34 = vrot.slane %v5257_v23, 1  ;;  %v670_v60 = vrot.slane %v429_v37, 2  ;;  %v672_v37 = vrot.slane %v5257_v23, 2 }
  0xef   : > { %1303 = vmatprep.mubr.f32.mxu1 %v5225_v56  ;;  %1614 = vmatpush2.msra.mxu1 %v879_v2  ;;  %v667_v2 = vrot.slane %v5225_v56, 2 }
  0xf0   : > { %1079 = vmatmul.mubr.f32.gmra.mxu0 %v5193_v40  ;;  %1615 = vmatprep.subr.mxu1 %v5021_v57  ;;  %v5263_v19 = vsel %vm493_vm0, %v555_v9, %v557_v50  ;;  %v837_v9 = vld [vmem:[#allocation7 + $0x2a0] sm:$0xff]  ;;  %v875_v50 = vld [vmem:[#allocation7 + $0x3d0] sm:$0xff] }
  0xf1   : > { %1083 = vmatprep.mubr.f32.mxu0 %v5231_v3  ;;  %1406 = vmatprep.subr.mxu0 %v5021_v57  ;;  %v5254_v3 = vld [vmem:[#allocation2 + $0x140] sm:$0xff]  ;;  %7018 = vst [vmem:[#allocation37_spill] sm:$0xff] %v5263_v19 }
  0xf2   : > { %1304 = vmatmul.mubr.f32.gmra.mxu1 %v5238_v17  ;;  %7017 = vst [vmem:[#allocation36_spill] sm:$0xff] %v5254_v3  ;;  %v877_v17 = vld [vmem:[#allocation7 + $0x3e0] sm:$0xff]  ;;  %1407 = vmatpush2.msra.mxu0 %v838_v12  ;;  %v560_v40 = vrot.slane %v5254_v3, 1  ;;  %v432_v12 = vld [vmem:[#allocation2 + $0x148] sm:$0x3] }
  0xf3   : > { %1308 = vmatprep.mubr.f32.mxu1 %v5222_v13  ;;  %1616 = vmatpush2.msra.mxu1 %v878_v33  ;;  %v876_v33 = vld [vmem:[#allocation7 + $0x3d8] sm:$0xff] }
  0xf4   : > { %1084 = vmatmul.mubr.f32.gmra.mxu0 %v5190_v29  ;;  %1617 = vmatprep.subr.mxu1 %v5021_v57  ;;  %v5270_v29 = vsel %vm606_vm1, %v667_v2, %v668_v43  ;;  %v673_v2 = vrot.slane %v5254_v3, 2 }
  0xf5   : > { %1088 = vmatprep.mubr.f32.mxu0 %v5245_v49  ;;  %1408 = vmatprep.subr.mxu0 %v5021_v57  ;;  %7019 = vst [vmem:[#allocation38_spill] sm:$0xff] %v5270_v29  ;;  %v562_v49 = vrot.slane %v432_v12, 1 }
  0xf6   : > { %1309 = vmatmul.mubr.f32.gmra.mxu1 %v5250_v32  ;;  %v5277_v32 = vsel %vm493_vm0, %v559_v34, %v560_v40  ;;  %1409 = vmatpush2.msra.mxu0 %v837_v9  ;;  %v874_v34 = vld [vmem:[#allocation7 + $0x3c8] sm:$0xff]  ;;  %v836_v9 = vld [vmem:[#allocation7 + $0x298] sm:$0xff] }
  0xf7   : > { %1313 = vmatprep.mubr.f32.mxu1 %v5257_v23  ;;  %1618 = vmatpush2.msra.mxu1 %v877_v17  ;;  %7020 = vst [vmem:[#allocation39_spill] sm:$0xff] %v5277_v32  ;;  %v5282_v17 = vsel %vm606_vm1, %v668_v43, %v670_v60  ;;  %v5295_v60 = vsel %vm493_vm0, %v560_v40, %v562_v49  ;;  %v873_v40 = vld [vmem:[#allocation7 + $0x3c0] sm:$0xff] }
  0xf8   : > { %1089 = vmatmul.mubr.f32.gmra.mxu0 %v5225_v56  ;;  %1619 = vmatprep.subr.mxu1 %v5021_v57  ;;  %7021 = vst [vmem:[#allocation40_spill] sm:$0xff] %v5282_v17  ;;  %7023 = vst [vmem:[#allocation42_spill] sm:$0xff] %v5295_v60  ;;  %v872_v56 = vld [vmem:[#allocation7 + $0x3b8] sm:$0xff] }
  0xf9   : > { %1093 = vmatprep.mubr.f32.mxu0 %v5263_v19  ;;  %1620 = vmatpush2.msra.mxu1 %v876_v33  ;;  %v5286_v19 = vld [vmem:[#allocation2 + $0x158] sm:$0xff]  ;;  %v5289_v33 = vld [vmem:[#allocation2 + $0x150] sm:$0xff] }
  0xfa   : > { %1314 = vmatmul.mubr.f32.gmra.mxu1 %v5270_v29  ;;  %1621 = vmatprep.subr.mxu1 %v5021_v57  ;;  %7022 = vst [vmem:[#allocation41_spill] sm:$0xff] %v5286_v19  ;;  %v564_v43 = vrot.slane %v5289_v33, 1  ;;  %v565_v29 = vrot.slane %v5286_v19, 1 }
  0xfb   : > { %1318 = vmatprep.mubr.f32.mxu1 %v5254_v3  ;;  %1622 = vmatpush2.msra.mxu1 %v875_v50  ;;  %v5302_v50 = vsel %vm606_vm1, %v672_v37, %v673_v2  ;;  %v677_v37 = vrot.slane %v5289_v33, 2 }
  0xfc   : > { %1094 = vmatmul.mubr.f32.gmra.mxu0 %v5222_v13  ;;  %1623 = vmatprep.subr.mxu1 %v5021_v57  ;;  %7024 = vst [vmem:[#allocation43_spill] sm:$0xff] %v5302_v50  ;;  %v435_v13 = vld [vmem:[#allocation2 + $0x160] sm:$0x3]  ;;  %v5309_v49 = vsel %vm493_vm0, %v564_v43, %v565_v29  ;;  %v5321_v43 = vld [vmem:[#allocation2 + $0x168] sm:$0xff] }
  0xfd   : > { %1098 = vmatprep.mubr.f32.mxu0 %v5277_v32  ;;  %1410 = vmatprep.subr.mxu0 %v5021_v57  ;;  %v675_v32 = vrot.slane %v432_v12, 2  ;;  %7025 = vst [vmem:[#allocation44_spill] sm:$0xff] %v5309_v49 }
  0xfe   : > { %1319 = vmatmul.mubr.f32.gmra.mxu1 %v5282_v17  ;;  %1411 = vmatpush2.msra.mxu0 %v836_v9  ;;  %v567_v17 = vrot.slane %v435_v13, 1  ;;  %v5318_v9 = vld [vmem:[#allocation2 + $0x170] sm:$0xff] }
  0xff   : > { %1323 = vmatprep.mubr.f32.mxu1 %v5289_v33  ;;  %1624 = vmatpush2.msra.mxu1 %v874_v34  ;;  %v5314_v12 = vsel %vm606_vm1, %v673_v2, %v675_v32  ;;  %v678_v34 = vrot.slane %v5286_v19, 2  ;;  %v569_v2 = vrot.slane %v5321_v43, 1 }
 0x100   : > { %1099 = vmatmul.mubr.f32.gmra.mxu0 %v5257_v23  ;;  %1625 = vmatprep.subr.mxu1 %v5021_v57  ;;  %7026 = vst [vmem:[#allocation45_spill] sm:$0xff] %v5314_v12  ;;  %v5327_v32 = vsel %vm493_vm0, %v565_v29, %v567_v17  ;;  %v834_v17 = vld [vmem:[#allocation7 + $0x288] sm:$0xff] }
 0x101   : > { %1103 = vmatprep.mubr.f32.mxu0 %v5295_v60  ;;  %1412 = vmatprep.subr.mxu0 %v5021_v57  ;;  %v871_v60 = vld [vmem:[#allocation7 + $0x3b0] sm:$0xff] }
 0x102   : > { %1324 = vmatmul.mubr.f32.gmra.mxu1 %v5302_v50  ;;  %v835_v50 = vld [vmem:[#allocation7 + $0x290] sm:$0xff] }
 0x103   : > { %1328 = vmatprep.mubr.f32.mxu1 %v5286_v19  ;;  %1626 = vmatpush2.msra.mxu1 %v873_v40  ;;  %v570_v40 = vrot.slane %v5318_v9, 1 }
 0x104   : > { %1104 = vmatmul.mubr.f32.gmra.mxu0 %v5254_v3  ;;  %1627 = vmatprep.subr.mxu1 %v5021_v57  ;;  %v5334_v3 = vsel %vm606_vm1, %v677_v37, %v678_v34 }
 0x105   : > { %1108 = vmatprep.mubr.f32.mxu0 %v5309_v49  ;;  %1628 = vmatpush2.msra.mxu1 %v872_v56  ;;  %7027 = vst [vmem:[#allocation46_spill] sm:$0xff] %v5334_v3  ;;  %v680_v49 = vrot.slane %v435_v13, 2  ;;  %v438_v56 = vld [vmem:[#allocation2 + $0x178] sm:$0x3]  ;;  %v5341_v29 = vsel %vm493_vm0, %v569_v2, %v570_v40  ;;  %v5352_v2 = vld [vmem:[#allocation2 + $0x180] sm:$0xff] }
 0x106   : > { %1329 = vmatmul.mubr.f32.gmra.mxu1 %v5314_v12  ;;  %1629 = vmatprep.subr.mxu1 %v5021_v57  ;;  %v870_v12 = vld [vmem:[#allocation7 + $0x3a8] sm:$0xff]  ;;  %v572_v37 = vrot.slane %v438_v56, 1 }
 0x107   : > { %1333 = vmatprep.mubr.f32.mxu1 %v5321_v43  ;;  %1413 = vmatpush2.msra.mxu0 %v835_v50  ;;  %v5346_v13 = vsel %vm606_vm1, %v678_v34, %v680_v49  ;;  %v683_v50 = vrot.slane %v5318_v9, 2 }
 0x108   : > { %1109 = vmatmul.mubr.f32.gmra.mxu0 %v5289_v33  ;;  %1630 = vmatpush2.msra.mxu1 %v871_v60  ;;  %7028 = vst [vmem:[#allocation47_spill] sm:$0xff] %v5346_v13  ;;  %v682_v60 = vrot.slane %v5321_v43, 2  ;;  %v5357_v49 = vsel %vm493_vm0, %v570_v40, %v572_v37  ;;  %v867_v40 = vld [vmem:[#allocation7 + $0x390] sm:$0xff]  ;;  %v866_v37 = vld [vmem:[#allocation7 + $0x388] sm:$0xff] }
 0x109   : > { %1113 = vmatprep.mubr.f32.mxu0 %v5327_v32  ;;  %1631 = vmatprep.subr.mxu1 %v5021_v57 }
 0x10a   : > { %1334 = vmatmul.mubr.f32.gmra.mxu1 %v5334_v3  ;;  %1414 = vmatprep.subr.mxu0 %v5021_v57  ;;  %v869_v3 = vld [vmem:[#allocation7 + $0x3a0] sm:$0xff]  ;;  %v5362_v34 = vsel %vm606_vm1, %v682_v60, %v683_v50 }
 0x10b   : > { %1338 = vmatprep.mubr.f32.mxu1 %v5318_v9  ;;  %1632 = vmatpush2.msra.mxu1 %v870_v12  ;;  %v868_v12 = vld [vmem:[#allocation7 + $0x398] sm:$0xff]  ;;  %v865_v60 = vld [vmem:[#allocation7 + $0x380] sm:$0xff] }
 0x10c   : > { %1114 = vmatmul.mubr.f32.gmra.mxu0 %v5286_v19  ;;  %1633 = vmatprep.subr.mxu1 %v5021_v57  ;;  %v685_v19 = vrot.slane %v438_v56, 2  ;;  %v896_v56 = vld [vmem:[#allocation7 + $0x478] sm:$0xff] }
 0x10d   : > { %1118 = vmatprep.mubr.f32.mxu0 %v5341_v29  ;;  %1415 = vmatpush2.msra.mxu0 %v834_v17  ;;  %v5366_v17 = vld [vmem:[#allocation2 + $0x188] sm:$0xff] }
 0x10e   : > { %1339 = vmatmul.mubr.f32.gmra.mxu1 %v5346_v13  ;;  %1416 = vmatprep.subr.mxu0 %v5021_v57  ;;  %v833_v13 = vld [vmem:[#allocation7 + $0x280] sm:$0xff] }
 0x10f   : > { %1343 = vmatprep.mubr.f32.mxu1 %v5352_v2  ;;  %1634 = vmatpush2.msra.mxu1 %v869_v3  ;;  %v5373_v3 = vsel %vm606_vm1, %v683_v50, %v685_v19  ;;  %v895_v19 = vld [vmem:[#allocation7 + $0x470] sm:$0xff]  ;;  %v889_v50 = vld [vmem:[#allocation7 + $0x440] sm:$0xff] }
 0x110   : > { %1119 = vmatmul.mubr.f32.gmra.mxu0 %v5321_v43  ;;  %1635 = vmatprep.subr.mxu1 %v5021_v57 }
 0x111   : > { %1123 = vmatprep.mubr.f32.mxu0 %v5357_v49  ;;  %1636 = vmatpush2.msra.mxu1 %v868_v12  ;;  %v7039_v12 = vld [vmem:[#allocation27_spill] sm:$0xff] }
 0x112   : > { %1344 = vmatmul.mubr.f32.gmra.mxu1 %v5362_v34  ;;  %1637 = vmatprep.subr.mxu1 %v5021_v57 }
 0x113   : > { %1348 = vmatprep.mubr.f32.mxu1 %v5366_v17  ;;  %1417 = vmatpush2.msra.mxu0 %v833_v13  ;;  %v4305_v13 = vld [vmem:[#allocation2 + $0x38] sm:$0xff] }
 0x114   : > { %1124 = vmatmul.mubr.f32.gmra.mxu0 %v5318_v9  ;;  %1638 = vmatpush2.msra.mxu1 %v867_v40 }
 0x115   : > { %1639 = vmatprep.subr.mxu1 %v5021_v57  ;;  %1418 = vmatprep.mubr.f32.mxu0 %v4917_v59  ;;  %v894_v59 = vld [vmem:[#allocation7 + $0x468] sm:$0xff] }
 0x116   : > { %1349 = vmatmul.mubr.f32.gmra.mxu1 %v5373_v3  ;;  %4072 = vmatprep.subr.mxu0 %v896_v56 }
 0x117   : > { %1640 = vmatpush2.msra.mxu1 %v866_v37  ;;  %1643 = vmatprep.mubr.f32.mxu1 %v4923_v63  ;;  %v7040_v37 = vld [vmem:[#allocation18_spill] sm:$0xff] }
 0x118   : > { %1419 = vmatmul.mubr.f32.vlgmr.msra.gmra.mxu0 %v4894_v46  ;;  %1641 = vmatprep.subr.mxu1 %v5021_v57  ;;  %v893_v46 = vld [vmem:[#allocation7 + $0x460] sm:$0xff] }
 0x119   : > { %1642 = vmatpush2.msra.mxu1 %v865_v60  ;;  %4073 = vmatpush3.msra.mxu0 %v896_v56 }
 0x11a   : > { %1644 = vmatmul.mubr.f32.vlgmr.msra.gmra.mxu1 %v4905_v53  ;;  %1423 = vmatprep.mubr.f32.mxu0 %v4928_v4  ;;  %v892_v53 = vld [vmem:[#allocation7 + $0x458] sm:$0xff]  ;;  %v890_v4 = vld [vmem:[#allocation7 + $0x448] sm:$0xff] }
 0x11b   : > { %1648 = vmatprep.mubr.f32.mxu1 %v4941_v10  ;;  %4074 = vmatprep.subr.mxu0 %v895_v19 }
 0x11c   : > { %1424 = vmatmul.mubr.f32.gmra.mxu0 %v4911_v55  ;;  %2659 = vmatprep.subr.mxu1 %v5021_v57  ;;  %v891_v55 = vld [vmem:[#allocation7 + $0x450] sm:$0xff] }
 0x11d   : > { %1428 = vmatprep.mubr.f32.mxu0 %v4948_v14  ;;  %4075 = vmatpush3.msra.mxu0 %v895_v19  ;;  %v7041_v19 = vld [vmem:[#allocation28_spill] sm:$0xff] }
 0x11e   : > { %1649 = vmatmul.mubr.f32.gmra.mxu1 %v4305_v13  ;;  %4076 = vmatprep.subr.mxu0 %v894_v59 }
 0x11f   : > { %1653 = vmatprep.mubr.f32.mxu1 %v4955_v18  ;;  %4077 = vmatpush3.msra.mxu0 %v894_v59 }
 0x120   : > { %1429 = vmatmul.mubr.f32.gmra.mxu0 %v4923_v63  ;;  %4078 = vmatprep.subr.mxu0 %v893_v46  ;;  %v888_v63 = vld [vmem:[#allocation7 + $0x438] sm:$0xff] }
 0x121   : > { %1433 = vmatprep.mubr.f32.mxu0 %v4960_v21  ;;  %4079 = vmatpush3.msra.mxu0 %v893_v46 }
 0x122   : > { %1654 = vmatmul.mubr.f32.gmra.mxu1 %v4935_v8  ;;  %4080 = vmatprep.subr.mxu0 %v892_v53  ;;  %v887_v8 = vld [vmem:[#allocation7 + $0x430] sm:$0xff] }
 0x123   : > { %1658 = vmatprep.mubr.f32.mxu1 %v4973_v27  ;;  %4081 = vmatpush3.msra.mxu0 %v892_v53  ;;  %v7042_v53 = vld [vmem:[#allocation29_spill] sm:$0xff] }
 0x124   : > { %1434 = vmatmul.mubr.f32.gmra.mxu0 %v4941_v10  ;;  %4082 = vmatprep.subr.mxu0 %v891_v55  ;;  %v886_v10 = vld [vmem:[#allocation7 + $0x428] sm:$0xff] }
 0x125   : > { %1438 = vmatprep.mubr.f32.mxu0 %v4980_v31  ;;  %4083 = vmatpush3.msra.mxu0 %v891_v55 }
 0x126   : > { %1659 = vmatmul.mubr.f32.gmra.mxu1 %v4932_v7  ;;  %4084 = vmatprep.subr.mxu0 %v890_v4  ;;  %v885_v7 = vld [vmem:[#allocation7 + $0x420] sm:$0xff] }
 0x127   : > { %1663 = vmatprep.mubr.f32.mxu1 %v4987_v35  ;;  %4085 = vmatpush3.msra.mxu0 %v890_v4 }
 0x128   : > { %1439 = vmatmul.mubr.f32.gmra.mxu0 %v4955_v18  ;;  %4086 = vmatprep.subr.mxu0 %v889_v50  ;;  %v884_v18 = vld [vmem:[#allocation7 + $0x418] sm:$0xff] }
 0x129   : > { %1443 = vmatprep.mubr.f32.mxu0 %v4992_v38  ;;  %4087 = vmatpush3.msra.mxu0 %v889_v50  ;;  %v7043_v50 = vld [vmem:[#allocation25_spill] sm:$0xff] }
 0x12a   : > { %1664 = vmatmul.mubr.f32.gmra.mxu1 %v4967_v25  ;;  %4088 = vmatprep.subr.mxu0 %v888_v63  ;;  %v883_v25 = vld [vmem:[#allocation7 + $0x410] sm:$0xff] }
 0x12b   : > { %1668 = vmatprep.mubr.f32.mxu1 %v5005_v44  ;;  %4089 = vmatpush3.msra.mxu0 %v888_v63 }
 0x12c   : > { %1444 = vmatmul.mubr.f32.gmra.mxu0 %v4973_v27  ;;  %4090 = vmatprep.subr.mxu0 %v887_v8  ;;  %v882_v27 = vld [vmem:[#allocation7 + $0x408] sm:$0xff] }
 0x12d   : > { %1448 = vmatprep.mubr.f32.mxu0 %v5012_v48  ;;  %4091 = vmatpush3.msra.mxu0 %v887_v8  ;;  %v7044_v8 = vld [vmem:[#allocation32_spill] sm:$0xff] }
 0x12e   : > { %1669 = vmatmul.mubr.f32.gmra.mxu1 %v4964_v24  ;;  %4092 = vmatprep.subr.mxu0 %v886_v10  ;;  %v881_v24 = vld [vmem:[#allocation7 + $0x400] sm:$0xff] }
 0x12f   : > { %1673 = vmatprep.mubr.f32.mxu1 %v5019_v54  ;;  %4093 = vmatpush3.msra.mxu0 %v886_v10 }
 0x130   : > { %1449 = vmatmul.mubr.f32.gmra.mxu0 %v4987_v35  ;;  %4094 = vmatprep.subr.mxu0 %v885_v7  ;;  %v7029_v35 = vld [vmem:[#allocation16_spill] sm:$0xff] }
 0x131   : > { %1453 = vmatprep.mubr.f32.mxu0 %v5026_v58  ;;  %4095 = vmatpush3.msra.mxu0 %v885_v7 }
 0x132   : > { %1674 = vmatmul.mubr.f32.gmra.mxu1 %v4999_v42  ;;  %4096 = vmatprep.subr.mxu0 %v884_v18  ;;  %v7031_v42 = vld [vmem:[#allocation15_spill] sm:$0xff] }
 0x133   : > { %1678 = vmatprep.mubr.f32.mxu1 %v5039_v5  ;;  %4097 = vmatpush3.msra.mxu0 %v884_v18 }
 0x134   : > { %1454 = vmatmul.mubr.f32.gmra.mxu0 %v5005_v44  ;;  %4098 = vmatprep.subr.mxu0 %v883_v25  ;;  %v7032_v44 = vld [vmem:[#allocation20_spill] sm:$0xff] }
 0x135   : > { %1458 = vmatprep.mubr.f32.mxu0 %v5046_v11  ;;  %4099 = vmatpush3.msra.mxu0 %v883_v25  ;;  %v7045_v25 = vld [vmem:[#allocation33_spill] sm:$0xff] }
 0x136   : > { %1679 = vmatmul.mubr.f32.gmra.mxu1 %v4996_v41  ;;  %4100 = vmatprep.subr.mxu0 %v882_v27  ;;  %v7030_v41 = vld [vmem:[#allocation17_spill] sm:$0xff] }
 0x137   : > { %1683 = vmatprep.mubr.f32.mxu1 %v5053_v16  ;;  %4101 = vmatpush3.msra.mxu0 %v882_v27  ;;  %v2523_v27 = vld [vmem:[#allocation9 + $0x78] sm:$0xff] }
 0x138   : > { %1459 = vmatmul.mubr.f32.gmra.mxu0 %v5019_v54  ;;  %4102 = vmatprep.subr.mxu0 %v881_v24  ;;  %v7033_v54 = vld [vmem:[#allocation21_spill] sm:$0xff] }
 0x139   : > { %1463 = vmatprep.mubr.f32.mxu0 %v5058_v20  ;;  %4103 = vmatpush3.msra.mxu0 %v881_v24 }
 0x13a   : > { %1684 = vmatmul.mubr.f32.gmra.mxu1 %v5033_v62  ;;  %2884 = vmatprep.subr.mxu0 %v5021_v57  ;;  %v7034_v57 = vld [vmem:[#allocation14_spill] sm:$0xff] }
 0x13b   : > { %1688 = vmatprep.mubr.f32.mxu1 %v5071_v30  ;;  %v7035_v62 = vld [vmem:[#allocation22_spill] sm:$0xff]  ;;  %2660 = vmatpush1.msra.mxu1 %v2523_v27  ;;  %v7054_v27 = vld [vmem:[#allocation40_spill] sm:$0xff] }
 0x13c   : > { %1464 = vmatmul.mubr.f32.gmra.mxu0 %v5039_v5 }
 0x13d   : > { %1468 = vmatprep.mubr.f32.mxu0 %v5078_v36 }
 0x13e   : > { %1689 = vmatmul.mubr.f32.gmra.mxu1 %v5030_v61  ;;  %v5448_v61 = vld [vmem:[%s6865_s2] ss:$0 sm:$0xff] }
 0x13f   : > { %1693 = vmatprep.mubr.f32.mxu1 %v5085_v45 }
 0x140   : > { %1469 = vmatmul.mubr.f32.gmra.mxu0 %v5053_v16 }
 0x141   : > { %1473 = vmatprep.mubr.f32.mxu0 %v5090_v1 }
 0x142   : > { %1694 = vmatmul.mubr.f32.gmra.mxu1 %v5065_v28 }
 0x143   : > { %1698 = vmatprep.mubr.f32.mxu1 %v5103_v0 }
 0x144   : > { %1474 = vmatmul.mubr.f32.gmra.mxu0 %v5071_v30 }
 0x145   : > { %1478 = vmatprep.mubr.f32.mxu0 %v5110_v6 }
 0x146   : > { %1699 = vmatmul.mubr.f32.gmra.mxu1 %v5062_v26  ;;  %v7036_v26 = vld [vmem:[#allocation23_spill] sm:$0xff] }
 0x147   : > { %1703 = vmatprep.mubr.f32.mxu1 %v5117_v15 }
 0x148   : > { %1479 = vmatmul.mubr.f32.gmra.mxu0 %v5085_v45  ;;  %v7037_v45 = vld [vmem:[#allocation19_spill] sm:$0xff] }
 0x149   : > { %1483 = vmatprep.mubr.f32.mxu0 %v5122_v22 }
 0x14a   : > { %1704 = vmatmul.mubr.f32.gmra.mxu1 %v5097_v52  ;;  %v7038_v52 = vld [vmem:[#allocation26_spill] sm:$0xff] }
 0x14b   : > { %1708 = vmatprep.mubr.f32.mxu1 %v5135_v39 }
 0x14c   : > { %1484 = vmatmul.mubr.f32.gmra.mxu0 %v5103_v0 }
 0x14d   : > { %1488 = vmatprep.mubr.f32.mxu0 %v5142_v47 }
 0x14e   : > { %1709 = vmatmul.mubr.f32.gmra.mxu1 %v5094_v51 }
 0x14f   : > { %1713 = vmatprep.mubr.f32.mxu1 %v7029_v35 }
 0x150   : > { %1489 = vmatmul.mubr.f32.gmra.mxu0 %v5117_v15 }
 0x151   : > { %1493 = vmatprep.mubr.f32.mxu0 %v7030_v41 }
 0x152   : > { %1714 = vmatmul.mubr.f32.gmra.mxu1 %v7031_v42  ;;  %v7046_v42 = vld [vmem:[#allocation24_spill] sm:$0xff] }
 0x153   : > { %1718 = vmatprep.mubr.f32.mxu1 %v7032_v44 }
 0x154   : > { %1494 = vmatmul.mubr.f32.gmra.mxu0 %v5135_v39 }
 0x155   : > { %1498 = vmatprep.mubr.f32.mxu0 %v7033_v54 }
 0x156   : > { %1719 = vmatmul.mubr.f32.gmra.mxu1 %v7034_v57  ;;  %v7047_v57 = vld [vmem:[#allocation34_spill] sm:$0xff] }
 0x157   : > { %1723 = vmatprep.mubr.f32.mxu1 %v7035_v62  ;;  %v970_v5 = vpop.f32.mrf.mxu0 }
 0x158   : > { %1499 = vmatmul.mubr.f32.gmra.mxu0 %v7029_v35  ;;  %v971_v16 = vadd.f32 %v5448_v61, %v970_v5 }
 0x159   : > { %1503 = vmatprep.mubr.f32.mxu0 %v7036_v26  ;;  %v972_v28 = vpop.f32.mrf.mxu0  ;;  %v1195_v30 = vpop.f32.mrf.mxu1 }
 0x15a   : > { %1724 = vmatmul.mubr.f32.gmra.mxu1 %v7037_v45  ;;  %v5455_v51 = vadd.f32 %v1195_v30, %v971_v16  ;;  %v5480_v16 = vld [vmem:[#allocation2] sm:$0xff]  ;;  %v7048_v30 = vld [vmem:[#allocation35_spill] sm:$0xff]  ;;  %v2522_v45 = vld [vmem:[#allocation9 + $0x70] sm:$0xff] }
 0x15b   : > { %1728 = vmatprep.mubr.f32.mxu1 %v7038_v52  ;;  %v975_v0 = vpop.f32.mrf.mxu0  ;;  %v1197_v15 = vpop.f32.mrf.mxu1  ;;  %2661 = vmatprep.subr.mxu1 %v5480_v16 }
 0x15c   : > { %1504 = vmatmul.mubr.f32.gmra.mxu0 %v7032_v44  ;;  %v976_v39 = vadd.f32 %v5448_v61, %v975_v0  ;;  %v7049_v15 = vld [vmem:[#allocation31_spill] sm:$0xff]  ;;  %2662 = vmatpush1.msra.mxu1 %v2522_v45 }
 0x15d   : > { %1508 = vmatprep.mubr.f32.mxu0 %v7039_v12  ;;  %v977_v40 = vpop.f32.mrf.mxu0  ;;  %v1200_v56 = vpop.f32.mrf.mxu1  ;;  %2663 = vmatprep.subr.mxu1 %v5480_v16 }
 0x15e   : > { %1729 = vmatmul.mubr.f32.gmra.mxu1 %v7040_v37  ;;  %v5462_v60 = vadd.f32 %v1200_v56, %v976_v39  ;;  %v7050_v40 = vld [vmem:[#allocation37_spill] sm:$0xff] }
 0x15f   : > { %1733 = vmatprep.mubr.f32.mxu1 %v7041_v19  ;;  %v1202_v46 = vpop.f32.mrf.mxu1 }
 0x160   : > { %v980_v59 = vpop.f32.mrf.mxu0  ;;  %1509 = vmatmul.mubr.f32.gmra.mxu0 %v7035_v62  ;;  %v2521_v46 = vld [vmem:[#allocation9 + $0x68] sm:$0xff] }
 0x161   : > { %v981_v13 = vadd.f32 %v5448_v61, %v980_v59  ;;  %1513 = vmatprep.mubr.f32.mxu0 %v7042_v53  ;;  %v7051_v59 = vld [vmem:[#allocation38_spill] sm:$0xff]  ;;  %2664 = vmatpush1.msra.mxu1 %v2521_v46 }
 0x162   : > { %v982_v55 = vpop.f32.mrf.mxu0  ;;  %v1205_v4 = vpop.f32.mrf.mxu1  ;;  %1734 = vmatmul.mubr.f32.gmra.mxu1 %v7043_v50  ;;  %2665 = vmatprep.subr.mxu1 %v5480_v16 }
 0x163   : > { %v5469_v63 = vadd.f32 %v1205_v4, %v981_v13  ;;  %1738 = vmatprep.mubr.f32.mxu1 %v7044_v8  ;;  %v7052_v4 = vld [vmem:[#allocation30_spill] sm:$0xff] }
 0x164   : > { %v985_v10 = vpop.f32.mrf.mxu0  ;;  %v1207_v7 = vpop.f32.mrf.mxu1  ;;  %1514 = vmatmul.mubr.f32.gmra.mxu0 %v7038_v52 }
 0x165   : > { %v986_v18 = vadd.f32 %v5448_v61, %v985_v10  ;;  %1518 = vmatprep.mubr.f32.mxu0 %v7045_v25  ;;  %v7053_v10 = vld [vmem:[#allocation39_spill] sm:$0xff] }
 0x166   : > { %v987_v24 = vpop.f32.mrf.mxu0  ;;  %v1210_v35 = vpop.f32.mrf.mxu1  ;;  %1739 = vmatmul.mubr.f32.gmra.mxu1 %v7046_v42 }
 0x167   : > { %v5476_v44 = vadd.f32 %v1210_v35, %v986_v18  ;;  %1743 = vmatprep.mubr.f32.mxu1 %v7047_v57  ;;  %v2520_v24 = vld [vmem:[#allocation9 + $0x60] sm:$0xff] }
 0x168   : > { %v990_v62 = vpop.f32.mrf.mxu0  ;;  %v1212_v5 = vpop.f32.mrf.mxu1  ;;  %1519 = vmatmul.mubr.f32.gmra.mxu0 %v7041_v19  ;;  %2666 = vmatpush1.msra.mxu1 %v2520_v24 }
 0x169   : > { %v991_v28 = vadd.f32 %v5448_v61, %v990_v62  ;;  %1523 = vmatprep.mubr.f32.mxu0 %v7048_v30  ;;  %v7055_v5 = vld [vmem:[#allocation42_spill] sm:$0xff]  ;;  %2667 = vmatprep.subr.mxu1 %v5480_v16 }
 0x16a   : > { %v992_v52 = vpop.f32.mrf.mxu0  ;;  %v1215_v0 = vpop.f32.mrf.mxu1  ;;  %1744 = vmatmul.mubr.f32.gmra.mxu1 %v7049_v15 }
 0x16b   : > { %v5486_v39 = vadd.f32 %v1215_v0, %v991_v28  ;;  %1748 = vmatprep.mubr.f32.mxu1 %v7050_v40  ;;  %v7056_v52 = vld [vmem:[#allocation43_spill] sm:$0xff]  ;;  %v2519_v0 = vld [vmem:[#allocation9 + $0x58] sm:$0xff] }
 0x16c   : > { %v995_v56 = vpop.f32.mrf.mxu0  ;;  %v1217_v37 = vpop.f32.mrf.mxu1  ;;  %1524 = vmatmul.mubr.f32.gmra.mxu0 %v7044_v8  ;;  %2668 = vmatpush1.msra.mxu1 %v2519_v0  ;;  %v7061_v0 = vld [vmem:[#allocation41_spill] sm:$0xff] }
 0x16d   : > { %v996_v19 = vadd.f32 %v5448_v61, %v995_v56  ;;  %1528 = vmatprep.mubr.f32.mxu0 %v7051_v59  ;;  %v7057_v37 = vld [vmem:[#allocation36_spill] sm:$0xff]  ;;  %2669 = vmatprep.subr.mxu1 %v5480_v16 }
 0x16e   : > { %v997_v13 = vpop.f32.mrf.mxu0  ;;  %v1220_v55 = vpop.f32.mrf.mxu1  ;;  %1749 = vmatmul.mubr.f32.gmra.mxu1 %v7052_v4  ;;  %v2518_v4 = vld [vmem:[#allocation9 + $0x50] sm:$0xff] }
 0x16f   : > { %v5494_v50 = vadd.f32 %v1220_v55, %v996_v19  ;;  %1753 = vmatprep.mubr.f32.mxu1 %v7053_v10  ;;  %v7058_v19 = vld [vmem:[#allocation44_spill] sm:$0xff]  ;;  %v7059_v55 = vld [vmem:[#allocation45_spill] sm:$0xff]  ;;  %2670 = vmatpush1.msra.mxu1 %v2518_v4  ;;  %v2516_v4 = vld [vmem:[#allocation9 + $0x40] sm:$0xff] }
 0x170   : > { %v1000_v7 = vpop.f32.mrf.mxu0  ;;  %v1222_v18 = vpop.f32.mrf.mxu1  ;;  %1529 = vmatmul.mubr.f32.gmra.mxu0 %v7047_v57  ;;  %2671 = vmatprep.subr.mxu1 %v5480_v16 }
 0x171   : > { %v1001_v8 = vadd.f32 %v5448_v61, %v1000_v7  ;;  %1533 = vmatprep.mubr.f32.mxu0 %v7054_v27 }
 0x172   : > { %v1002_v35 = vpop.f32.mrf.mxu0  ;;  %v1225_v42 = vpop.f32.mrf.mxu1  ;;  %1754 = vmatmul.mubr.f32.gmra.mxu1 %v5257_v23 }
 0x173   : > { %v5502_v62 = vadd.f32 %v1225_v42, %v1001_v8  ;;  %1758 = vmatprep.mubr.f32.mxu1 %v7055_v5  ;;  %v7060_v42 = vld [vmem:[#allocation46_spill] sm:$0xff] }
 0x174   : > { %v1005_v28 = vpop.f32.mrf.mxu0  ;;  %v1227_v45 = vpop.f32.mrf.mxu1  ;;  %1534 = vmatmul.mubr.f32.gmra.mxu0 %v7050_v40 }
 0x175   : > { %v1006_v57 = vadd.f32 %v5448_v61, %v1005_v28  ;;  %1538 = vmatprep.mubr.f32.mxu0 %v7056_v52  ;;  %v2517_v28 = vld [vmem:[#allocation9 + $0x48] sm:$0xff] }
 0x176   : > { %v1007_v15 = vpop.f32.mrf.mxu0  ;;  %v1230_v56 = vpop.f32.mrf.mxu1  ;;  %1759 = vmatmul.mubr.f32.gmra.mxu1 %v7057_v37  ;;  %v723_v37 = vrot.slane %v5366_v17, 1 }
 0x177   : > { %v5510_v23 = vadd.f32 %v1230_v56, %v1006_v57  ;;  %1763 = vmatprep.mubr.f32.mxu1 %v7058_v19  ;;  %2672 = vmatpush1.msra.mxu1 %v2517_v28 }
 0x178   : > { %v1010_v46 = vpop.f32.mrf.mxu0  ;;  %v1232_v13 = vpop.f32.mrf.mxu1  ;;  %1539 = vmatmul.mubr.f32.gmra.mxu0 %v7053_v10  ;;  %2673 = vmatprep.subr.mxu1 %v5480_v16 }
 0x179   : > { %v1011_v40 = vadd.f32 %v5448_v61, %v1010_v46  ;;  %1543 = vmatprep.mubr.f32.mxu0 %v7059_v55  ;;  %v7062_v13 = vld [vmem:[#allocation47_spill] sm:$0xff]  ;;  %2674 = vmatpush1.msra.mxu1 %v2516_v4 }
 0x17a   : > { %v1012_v7 = vpop.f32.mrf.mxu0  ;;  %v1235_v18 = vpop.f32.mrf.mxu1  ;;  %1764 = vmatmul.mubr.f32.gmra.mxu1 %v5289_v33  ;;  %2675 = vmatprep.subr.mxu1 %v5480_v16 }
 0x17b   : > { %v5518_v8 = vadd.f32 %v1235_v18, %v1011_v40  ;;  %1768 = vmatprep.mubr.f32.mxu1 %v5327_v32  ;;  %v441_v40 = vld [vmem:[#allocation2 + $0x190] sm:$0x3] }
 0x17c   : > { %v1015_v24 = vpop.f32.mrf.mxu0  ;;  %v1237_v35 = vpop.f32.mrf.mxu1  ;;  %1544 = vmatmul.mubr.f32.gmra.mxu0 %v7055_v5  ;;  %v722_v5 = vrot.slane %v5352_v2, 1  ;;  %v725_v28 = vrot.slane %v441_v40, 1 }
 0x17d   : > { %v1016_v10 = vadd.f32 %v5448_v61, %v1015_v24  ;;  %1548 = vmatprep.mubr.f32.mxu0 %v7060_v42 }
 0x17e   : > { %v1017_v45 = vpop.f32.mrf.mxu0  ;;  %v1240_v57 = vpop.f32.mrf.mxu1  ;;  %1769 = vmatmul.mubr.f32.gmra.mxu1 %v7061_v0  ;;  %v726_v4 = vsel %vm493_vm0, %v723_v37, %v725_v28 }
 0x17f   : > { %v5526_v33 = vadd.f32 %v1240_v57, %v1016_v10  ;;  %1773 = vmatprep.mubr.f32.mxu1 %v5341_v29  ;;  %v724_v10 = vsel %vm493_vm0, %v722_v5, %v723_v37  ;;  %v2515_v57 = vld [vmem:[#allocation9 + $0x38] sm:$0xff]  ;;  %v732_v37 = vrot.slane %v441_v40, 2 }
 0x180   : > { %v1020_v15 = vpop.f32.mrf.mxu0  ;;  %v1242_v56 = vpop.f32.mrf.mxu1  ;;  %1549 = vmatmul.mubr.f32.gmra.mxu0 %v7058_v19  ;;  %2676 = vmatpush1.msra.mxu1 %v2515_v57 }
 0x181   : > { %v1021_v46 = vadd.f32 %v5448_v61, %v1020_v15  ;;  %1553 = vmatprep.mubr.f32.mxu0 %v7062_v13  ;;  %v729_v15 = vrot.slane %v5352_v2, 2  ;;  %v730_v56 = vrot.slane %v5366_v17, 2  ;;  %2677 = vmatprep.subr.mxu1 %v5480_v16 }
 0x182   : > { %v1022_v7 = vpop.f32.mrf.mxu0  ;;  %v1245_v18 = vpop.f32.mrf.mxu1  ;;  %1774 = vmatmul.mubr.f32.gmra.mxu1 %v5321_v43 }
 0x183   : > { %v5536_v24 = vadd.f32 %v1245_v18, %v1021_v46  ;;  %1778 = vmatprep.mubr.f32.mxu1 %v5357_v49  ;;  %v5552_v7 = vrot.slane %v5480_v16, 1  ;;  %v5557_v18 = vld [vmem:[#allocation2 + $0x1a8] sm:$0x3]  ;;  %v5572_v40 = vsel %vm606_vm1, %v730_v56, %v732_v37 }
 0x184   : > { %v1025_v19 = vpop.f32.mrf.mxu0  ;;  %v1247_v35 = vpop.f32.mrf.mxu1  ;;  %1554 = vmatmul.mubr.f32.gmra.mxu0 %v5327_v32 }
 0x185   : > { %v1026_v45 = vadd.f32 %v5448_v61, %v1025_v19  ;;  %1558 = vmatprep.mubr.f32.mxu0 %v5362_v34  ;;  %v2514_v19 = vld [vmem:[#allocation9 + $0x30] sm:$0xff] }
 0x186   : > { %v1027_v43 = vpop.f32.mrf.mxu0  ;;  %v1250_v0 = vpop.f32.mrf.mxu1  ;;  %1779 = vmatmul.mubr.f32.gmra.mxu1 %v5318_v9 }
 0x187   : > { %v5547_v46 = vadd.f32 %v1250_v0, %v1026_v45  ;;  %1783 = vmatprep.mubr.f32.mxu1 %v724_v10  ;;  %2678 = vmatpush1.msra.mxu1 %v2514_v19  ;;  %v742_v0 = vrot.slane %v5557_v18, 1 }
 0x188   : > { %v1030_v32 = vpop.f32.mrf.mxu0  ;;  %v1252_v5 = vpop.f32.mrf.mxu1  ;;  %1559 = vmatmul.mubr.f32.gmra.mxu0 %v5341_v29  ;;  %v5561_v29 = vsel %vm606_vm1, %v729_v15, %v730_v56  ;;  %2679 = vmatprep.subr.mxu1 %v5480_v16 }
 0x189   : > { %v1031_v9 = vadd.f32 %v5448_v61, %v1030_v32  ;;  %1563 = vmatprep.mubr.f32.mxu0 %v5373_v3 }
 0x18a   : > { %v1032_v35 = vpop.f32.mrf.mxu0  ;;  %v1255_v45 = vpop.f32.mrf.mxu1  ;;  %1784 = vmatmul.mubr.f32.gmra.mxu1 %v5352_v2  ;;  %v2513_v2 = vld [vmem:[#allocation9 + $0x28] sm:$0xff] }
 0x18b   : > { %v5563_v28 = vadd.f32 %v1255_v45, %v1031_v9  ;;  %1788 = vmatprep.mubr.f32.mxu1 %v726_v4  ;;  %2680 = vmatpush1.msra.mxu1 %v2513_v2  ;;  %v743_v35 = vsel %vm493_vm0, %v5552_v7, %v742_v0 }
 0x18c   : > { %v1035_v57 = vpop.f32.mrf.mxu0  ;;  %v1257_v43 = vpop.f32.mrf.mxu1  ;;  %1564 = vmatmul.mubr.f32.gmra.mxu0 %v5357_v49  ;;  %2681 = vmatprep.subr.mxu1 %v5480_v16 }
 0x18d   : > { %v1036_v32 = vadd.f32 %v5448_v61, %v1035_v57  ;;  %1568 = vmatprep.mubr.f32.mxu0 %v5561_v29 }
 0x18e   : > { %v1037_v15 = vpop.f32.mrf.mxu0  ;;  %v1260_v5 = vpop.f32.mrf.mxu1  ;;  %1789 = vmatmul.mubr.f32.gmra.mxu1 %v5366_v17  ;;  %v2512_v17 = vld [vmem:[#allocation9 + $0x20] sm:$0xff] }
 0x18f   : > { %v5574_v9 = vadd.f32 %v1260_v5, %v1036_v32  ;;  %1793 = vmatprep.mubr.f32.mxu1 %v5552_v7  ;;  %2682 = vmatpush1.msra.mxu1 %v2512_v17  ;;  %v2511_v32 = vld [vmem:[#allocation9 + $0x18] sm:$0xff] }
 0x190   : > { %v1040_v49 = vpop.f32.mrf.mxu0  ;;  %v1262_v19 = vpop.f32.mrf.mxu1  ;;  %1569 = vmatmul.mubr.f32.gmra.mxu0 %v724_v10  ;;  %2683 = vmatprep.subr.mxu1 %v5480_v16 }
 0x191   : > { %v1041_v45 = vadd.f32 %v5448_v61, %v1040_v49  ;;  %1573 = vmatprep.mubr.f32.mxu0 %v5572_v40  ;;  %2684 = vmatpush1.msra.mxu1 %v2511_v32 }
 0x192   : > { %v1042_v56 = vpop.f32.mrf.mxu0  ;;  %v1265_v37 = vpop.f32.mrf.mxu1  ;;  %1794 = vmatmul.mubr.f32.gmra.mxu1 %v5480_v16  ;;  %2685 = vmatprep.subr.mxu1 %v5480_v16 }
 0x193   : > { %v5583_v57 = vadd.f32 %v1265_v37, %v1041_v45  ;;  %1798 = vmatprep.mubr.f32.mxu1 %v743_v35  ;;  %v2510_v35 = vld [vmem:[#allocation9 + $0x10] sm:$0xff] }
 0x194   : > { %v1045_v43 = vpop.f32.mrf.mxu0  ;;  %v1267_v10 = vpop.f32.mrf.mxu1  ;;  %1574 = vmatmul.mubr.f32.gmra.mxu0 %v726_v4  ;;  %2686 = vmatpush1.msra.mxu1 %v2510_v35 }
 0x195   : > { %v1046_v0 = vadd.f32 %v5448_v61, %v1045_v43  ;;  %4104 = vmatprep.mubr.f32.mxu0 %v4948_v14  ;;  %2687 = vmatprep.subr.mxu1 %v5480_v16  ;;  %v2509_v43 = vld [vmem:[#allocation9 + $0x8] sm:$0xff] }
 0x196   : > { %v1047_v2 = vpop.f32.mrf.mxu0  ;;  %v1270_v15 = vpop.f32.mrf.mxu1  ;;  %1799 = vmatmul.mubr.f32.gmra.mxu1 %v5480_v16 }
 0x197   : > { %v5589_v5 = vadd.f32 %v1270_v15, %v1046_v0  ;;  %2688 = vmatpush1.msra.mxu1 %v2509_v43  ;;  %v2555_v43 = vld [vmem:[#allocation9 + $0x178] sm:$0xff]  ;;  %2723 = vmatprep.mubr.f32.mxu1 %v5552_v7 }
 0x198   : > { %v1050_v49 = vpop.f32.mrf.mxu0  ;;  %v1272_v19 = vpop.f32.mrf.mxu1  ;;  %4105 = vmatmul.mubr.f32.vlgmr.msra.gmra.mxu0 %v4960_v21  ;;  %2689 = vmatprep.subr.mxu1 %v5480_v16 }
 0x199   : > { %v1051_v4 = vadd.f32 %v5448_v61, %v1050_v49  ;;  %4107 = vmatprep.mubr.f32.mxu0 %v4980_v31  ;;  %2885 = vmatpush1.msra.mxu0 %v2555_v43  ;;  %v2550_v43 = vld [vmem:[#allocation9 + $0x150] sm:$0xff] }
 0x19a   : > { %v1052_v14 = vpop.f32.mrf.mxu0  ;;  %v1275_v45 = vpop.f32.mrf.mxu1  ;;  %2886 = vmatprep.subr.mxu0 %v5480_v16 }
 0x19b   : > { %v5595_v17 = vadd.f32 %v1275_v45, %v1051_v4 }
 0x19c   : > { %v1055_v56 = vpop.f32.mrf.mxu0  ;;  %v1277_v37 = vpop.f32.mrf.mxu1  ;;  %4108 = vmatmul.mubr.f32.gmra.mxu0 %v4992_v38  ;;  %v2508_v38 = vld [vmem:[#allocation9] sm:$0xff] }
 0x19d   : > { %v1056_v21 = vadd.f32 %v5448_v61, %v1055_v56  ;;  %4110 = vmatprep.mubr.f32.mxu0 %v5012_v48  ;;  %2690 = vmatpush1.msra.mxu1 %v2508_v38 }
 0x19e   : > { %v1057_v10 = vpop.f32.mrf.mxu0  ;;  %v1280_v0 = vpop.f32.mrf.mxu1  ;;  %2691 = vmatprep.subr.mxu1 %v5480_v16 }
 0x19f   : > { %v5601_v31 = vadd.f32 %v1280_v0, %v1056_v21 }
 0x1a0   : > { %v1060_v32 = vpop.f32.mrf.mxu0  ;;  %v1282_v2 = vpop.f32.mrf.mxu1  ;;  %4111 = vmatmul.mubr.f32.gmra.mxu0 %v5026_v58  ;;  %v2539_v58 = vld [vmem:[#allocation9 + $0xf8] sm:$0xff] }
 0x1a1   : > { %v1061_v15 = vadd.f32 %v5448_v61, %v1060_v32  ;;  %4113 = vmatprep.mubr.f32.mxu0 %v5046_v11  ;;  %2692 = vmatpush2.msra.mxu1 %v2539_v58  ;;  %v2554_v32 = vld [vmem:[#allocation9 + $0x170] sm:$0xff] }
 0x1a2   : > { %v1062_v49 = vpop.f32.mrf.mxu0  ;;  %v1285_v19 = vpop.f32.mrf.mxu1  ;;  %2693 = vmatprep.subr.mxu1 %v5480_v16  ;;  %2887 = vmatpush1.msra.mxu0 %v2554_v32 }
 0x1a3   : > { %v5607_v48 = vadd.f32 %v1285_v19, %v1061_v15  ;;  %2888 = vmatprep.subr.mxu0 %v5480_v16  ;;  %v2537_v49 = vld [vmem:[#allocation9 + $0xe8] sm:$0xff] }
 0x1a4   : > { %v1065_v4 = vpop.f32.mrf.mxu0  ;;  %v1287_v35 = vpop.f32.mrf.mxu1  ;;  %4114 = vmatmul.mubr.f32.gmra.mxu0 %v5058_v20  ;;  %v2538_v20 = vld [vmem:[#allocation9 + $0xf0] sm:$0xff] }
 0x1a5   : > { %v1066_v14 = vadd.f32 %v5448_v61, %v1065_v4  ;;  %4116 = vmatprep.mubr.f32.mxu0 %v5078_v36  ;;  %2694 = vmatpush2.msra.mxu1 %v2538_v20  ;;  %v2552_v35 = vld [vmem:[#allocation9 + $0x160] sm:$0xff] }
 0x1a6   : > { %v1067_v45 = vpop.f32.mrf.mxu0  ;;  %v1290_v56 = vpop.f32.mrf.mxu1  ;;  %2695 = vmatprep.subr.mxu1 %v5480_v16 }
 0x1a7   : > { %v5613_v11 = vadd.f32 %v1290_v56, %v1066_v14  ;;  %2696 = vmatpush2.msra.mxu1 %v2537_v49  ;;  %v2536_v56 = vld [vmem:[#allocation9 + $0xe0] sm:$0xff] }
 0x1a8   : > { %v1070_v37 = vpop.f32.mrf.mxu0  ;;  %v1292_v21 = vpop.f32.mrf.mxu1  ;;  %4117 = vmatmul.mubr.f32.gmra.mxu0 %v5090_v1  ;;  %2697 = vmatprep.subr.mxu1 %v5480_v16 }
 0x1a9   : > { %v1071_v10 = vadd.f32 %v5448_v61, %v1070_v37  ;;  %4119 = vmatprep.mubr.f32.mxu0 %v5110_v6  ;;  %v2553_v6 = vld [vmem:[#allocation9 + $0x168] sm:$0xff]  ;;  %2698 = vmatpush2.msra.mxu1 %v2536_v56 }
 0x1aa   : > { %v1072_v36 = vpop.f32.mrf.mxu0  ;;  %v1295_v0 = vpop.f32.mrf.mxu1  ;;  %2889 = vmatpush1.msra.mxu0 %v2553_v6  ;;  %2699 = vmatprep.subr.mxu1 %v5480_v16  ;;  %v2533_v56 = vld [vmem:[#allocation9 + $0xc8] sm:$0xff] }
 0x1ab   : > { %v5620_v2 = vadd.f32 %v1295_v0, %v1071_v10  ;;  %2890 = vmatprep.subr.mxu0 %v5480_v16  ;;  %v2535_v0 = vld [vmem:[#allocation9 + $0xd8] sm:$0xff] }
 0x1ac   : > { %v1075_v15 = vpop.f32.mrf.mxu0  ;;  %v1297_v1 = vpop.f32.mrf.mxu1  ;;  %4120 = vmatmul.mubr.f32.gmra.mxu0 %v5122_v22  ;;  %2700 = vmatpush2.msra.mxu1 %v2535_v0 }
 0x1ad   : > { %v1076_v38 = vadd.f32 %v5448_v61, %v1075_v15  ;;  %4122 = vmatprep.mubr.f32.mxu0 %v5142_v47  ;;  %2891 = vmatpush1.msra.mxu0 %v2552_v35  ;;  %v2551_v47 = vld [vmem:[#allocation9 + $0x158] sm:$0xff]  ;;  %v2548_v1 = vld [vmem:[#allocation9 + $0x140] sm:$0xff] }
 0x1ae   : > { %v1077_v19 = vpop.f32.mrf.mxu0  ;;  %v1300_v4 = vpop.f32.mrf.mxu1  ;;  %2892 = vmatprep.subr.mxu0 %v5480_v16  ;;  %2701 = vmatprep.subr.mxu1 %v5480_v16 }
 0x1af   : > { %v5628_v14 = vadd.f32 %v1300_v4, %v1076_v38  ;;  %2893 = vmatpush1.msra.mxu0 %v2551_v47  ;;  %v2534_v19 = vld [vmem:[#allocation9 + $0xd0] sm:$0xff] }
 0x1b0   : > { %v1080_v22 = vpop.f32.mrf.mxu0  ;;  %v1302_v58 = vpop.f32.mrf.mxu1  ;;  %4123 = vmatmul.mubr.f32.gmra.mxu0 %v7030_v41  ;;  %2894 = vmatprep.subr.mxu0 %v5480_v16 }
 0x1b1   : > { %v1081_v45 = vadd.f32 %v5448_v61, %v1080_v22  ;;  %4125 = vmatprep.mubr.f32.mxu0 %v7033_v54  ;;  %2895 = vmatpush1.msra.mxu0 %v2550_v43  ;;  %v2549_v54 = vld [vmem:[#allocation9 + $0x148] sm:$0xff]  ;;  %v2546_v22 = vld [vmem:[#allocation9 + $0x130] sm:$0xff]  ;;  %v2544_v43 = vld [vmem:[#allocation9 + $0x120] sm:$0xff] }
 0x1b2   : > { %v1082_v37 = vpop.f32.mrf.mxu0  ;;  %v1305_v21 = vpop.f32.mrf.mxu1  ;;  %2896 = vmatprep.subr.mxu0 %v5480_v16  ;;  %2702 = vmatpush2.msra.mxu1 %v2534_v19 }
 0x1b3   : > { %v5636_v10 = vadd.f32 %v1305_v21, %v1081_v45  ;;  %2897 = vmatpush1.msra.mxu0 %v2549_v54  ;;  %2703 = vmatprep.subr.mxu1 %v5480_v16 }
 0x1b4   : > { %v1085_v41 = vpop.f32.mrf.mxu0  ;;  %v1307_v20 = vpop.f32.mrf.mxu1  ;;  %4126 = vmatmul.mubr.f32.gmra.mxu0 %v7036_v26  ;;  %2898 = vmatprep.subr.mxu0 %v5480_v16 }
 0x1b5   : > { %v1086_v36 = vadd.f32 %v5448_v61, %v1085_v41  ;;  %4128 = vmatprep.mubr.f32.mxu0 %v7039_v12  ;;  %2899 = vmatpush1.msra.mxu0 %v2548_v1  ;;  %v2547_v12 = vld [vmem:[#allocation9 + $0x138] sm:$0xff] }
 0x1b6   : > { %v1087_v32 = vpop.f32.mrf.mxu0  ;;  %v1310_v15 = vpop.f32.mrf.mxu1  ;;  %2900 = vmatprep.subr.mxu0 %v5480_v16  ;;  %2704 = vmatpush2.msra.mxu1 %v2533_v56  ;;  %v5684_v56 = vrot.slane %v5480_v16, 2 }
 0x1b7   : > { %v5644_v6 = vadd.f32 %v1310_v15, %v1086_v36  ;;  %2901 = vmatpush1.msra.mxu0 %v2547_v12  ;;  %2705 = vmatprep.subr.mxu1 %v5480_v16  ;;  %v2532_v36 = vld [vmem:[#allocation9 + $0xc0] sm:$0xff]  ;;  %v2542_v15 = vld [vmem:[#allocation9 + $0x110] sm:$0xff]  ;;  %v2531_v12 = vld [vmem:[#allocation9 + $0xb8] sm:$0xff] }
 0x1b8   : > { %v1090_v26 = vpop.f32.mrf.mxu0  ;;  %v1312_v38 = vpop.f32.mrf.mxu1  ;;  %4129 = vmatmul.mubr.f32.gmra.mxu0 %v7042_v53  ;;  %2902 = vmatprep.subr.mxu0 %v5480_v16 }
 0x1b9   : > { %v1091_v49 = vadd.f32 %v5448_v61, %v1090_v26  ;;  %4131 = vmatprep.mubr.f32.mxu0 %v7045_v25  ;;  %2903 = vmatpush1.msra.mxu0 %v2546_v22  ;;  %v2545_v25 = vld [vmem:[#allocation9 + $0x128] sm:$0xff] }
 0x1ba   : > { %v1092_v4 = vpop.f32.mrf.mxu0  ;;  %v1315_v35 = vpop.f32.mrf.mxu1  ;;  %2904 = vmatprep.subr.mxu0 %v5480_v16  ;;  %2706 = vmatpush2.msra.mxu1 %v2532_v36 }
 0x1bb   : > { %v5652_v58 = vadd.f32 %v1315_v35, %v1091_v49  ;;  %2905 = vmatpush1.msra.mxu0 %v2545_v25  ;;  %2707 = vmatprep.subr.mxu1 %v5480_v16  ;;  %v2540_v4 = vld [vmem:[#allocation9 + $0x100] sm:$0xff] }
 0x1bc   : > { %v1095_v53 = vpop.f32.mrf.mxu0  ;;  %v1317_v47 = vpop.f32.mrf.mxu1  ;;  %4132 = vmatmul.mubr.f32.gmra.mxu0 %v7048_v30  ;;  %2906 = vmatprep.subr.mxu0 %v5480_v16 }
 0x1bd   : > { %v1096_v45 = vadd.f32 %v5448_v61, %v1095_v53  ;;  %4134 = vmatprep.mubr.f32.mxu0 %v7051_v59  ;;  %2907 = vmatpush1.msra.mxu0 %v2544_v43  ;;  %v2543_v59 = vld [vmem:[#allocation9 + $0x118] sm:$0xff]  ;;  %v2530_v47 = vld [vmem:[#allocation9 + $0xb0] sm:$0xff] }
 0x1be   : > { %v1097_v37 = vpop.f32.mrf.mxu0  ;;  %v1320_v21 = vpop.f32.mrf.mxu1  ;;  %2908 = vmatprep.subr.mxu0 %v5480_v16  ;;  %2708 = vmatpush2.msra.mxu1 %v2531_v12  ;;  %v2566_v12 = vld [vmem:[#allocation9 + $0x1d0] sm:$0xff] }
 0x1bf   : > { %v5660_v41 = vadd.f32 %v1320_v21, %v1096_v45  ;;  %2909 = vmatpush1.msra.mxu0 %v2543_v59  ;;  %2709 = vmatprep.subr.mxu1 %v5480_v16  ;;  %v2570_v37 = vld [vmem:[#allocation9 + $0x1f0] sm:$0xff]  ;;  %v2529_v59 = vld [vmem:[#allocation9 + $0xa8] sm:$0xff] }
 0x1c0   : > { %v1100_v30 = vpop.f32.mrf.mxu0  ;;  %v1322_v20 = vpop.f32.mrf.mxu1  ;;  %4135 = vmatmul.mubr.f32.gmra.mxu0 %v7054_v27  ;;  %2910 = vmatprep.subr.mxu0 %v5480_v16 }
 0x1c1   : > { %v1101_v54 = vadd.f32 %v5448_v61, %v1100_v30  ;;  %4137 = vmatprep.mubr.f32.mxu0 %v7056_v52  ;;  %2911 = vmatpush1.msra.mxu0 %v2542_v15  ;;  %v2541_v52 = vld [vmem:[#allocation9 + $0x108] sm:$0xff]  ;;  %v749_v20 = vrot.slane %v5557_v18, 2  ;;  %v2567_v18 = vld [vmem:[#allocation9 + $0x1d8] sm:$0xff] }
 0x1c2   : > { %v1102_v0 = vpop.f32.mrf.mxu0  ;;  %v1325_v32 = vpop.f32.mrf.mxu1  ;;  %2912 = vmatprep.subr.mxu0 %v5480_v16  ;;  %2710 = vmatpush2.msra.mxu1 %v2530_v47  ;;  %v2564_v47 = vld [vmem:[#allocation9 + $0x1c0] sm:$0xff] }
 0x1c3   : > { %v5668_v1 = vadd.f32 %v1325_v32, %v1101_v54  ;;  %2913 = vmatpush1.msra.mxu0 %v2541_v52  ;;  %2711 = vmatprep.subr.mxu1 %v5480_v16  ;;  %v2568_v0 = vld [vmem:[#allocation9 + $0x1e0] sm:$0xff] }
 0x1c4   : > { %v1105_v27 = vpop.f32.mrf.mxu0  ;;  %v1327_v26 = vpop.f32.mrf.mxu1  ;;  %4138 = vmatmul.mubr.f32.gmra.mxu0 %v7059_v55  ;;  %2914 = vmatprep.subr.mxu0 %v5480_v16 }
 0x1c5   : > { %v1106_v38 = vadd.f32 %v5448_v61, %v1105_v27  ;;  %4140 = vmatprep.mubr.f32.mxu0 %v7060_v42  ;;  %2915 = vmatpush1.msra.mxu0 %v2540_v4  ;;  %v2571_v42 = vld [vmem:[#allocation9 + $0x1f8] sm:$0xff]  ;;  %v750_v27 = vsel %vm606_vm1, %v5684_v56, %v749_v20  ;;  %v2528_v26 = vld [vmem:[#allocation9 + $0xa0] sm:$0xff]  ;;  %v2565_v4 = vld [vmem:[#allocation9 + $0x1c8] sm:$0xff] }
 0x1c6   : > { %v1107_v49 = vpop.f32.mrf.mxu0  ;;  %v1330_v19 = vpop.f32.mrf.mxu1  ;;  %2916 = vmatprep.subr.mxu0 %v5480_v16  ;;  %2712 = vmatpush2.msra.mxu1 %v2529_v59  ;;  %v2526_v59 = vld [vmem:[#allocation9 + $0x90] sm:$0xff] }
 0x1c7   : > { %v5676_v35 = vadd.f32 %v1330_v19, %v1106_v38  ;;  %2917 = vmatpush2.msra.mxu0 %v2571_v42  ;;  %2713 = vmatprep.subr.mxu1 %v5480_v16 }
 0x1c8   : > { %v1110_v55 = vpop.f32.mrf.mxu0  ;;  %v1332_v22 = vpop.f32.mrf.mxu1  ;;  %4141 = vmatmul.mubr.f32.gmra.mxu0 %v7062_v13  ;;  %2918 = vmatprep.subr.mxu0 %v5480_v16 }
 0x1c9   : > { %v1111_v53 = vadd.f32 %v5448_v61, %v1110_v55  ;;  %4143 = vmatprep.mubr.f32.mxu0 %v5362_v34  ;;  %2919 = vmatpush2.msra.mxu0 %v2570_v37  ;;  %v2569_v34 = vld [vmem:[#allocation9 + $0x1e8] sm:$0xff]  ;;  %v2527_v22 = vld [vmem:[#allocation9 + $0x98] sm:$0xff] }
 0x1ca   : > { %v1112_v25 = vpop.f32.mrf.mxu0  ;;  %v1335_v45 = vpop.f32.mrf.mxu1  ;;  %2920 = vmatprep.subr.mxu0 %v5480_v16  ;;  %2714 = vmatpush2.msra.mxu1 %v2528_v26  ;;  %v2524_v26 = vld [vmem:[#allocation9 + $0x80] sm:$0xff] }
 0x1cb   : > { %v5687_v21 = vadd.f32 %v1335_v45, %v1111_v53  ;;  %2921 = vmatpush2.msra.mxu0 %v2569_v34  ;;  %2715 = vmatprep.subr.mxu1 %v5480_v16 }
 0x1cc   : > { %v1115_v13 = vpop.f32.mrf.mxu0  ;;  %v1337_v43 = vpop.f32.mrf.mxu1  ;;  %4144 = vmatmul.mubr.f32.gmra.mxu0 %v5373_v3  ;;  %2922 = vmatprep.subr.mxu0 %v5480_v16 }
 0x1cd   : > { %v1116_v30 = vadd.f32 %v5448_v61, %v1115_v13  ;;  %4146 = vmatprep.mubr.f32.mxu0 %v5561_v29  ;;  %2923 = vmatpush2.msra.mxu0 %v2568_v0  ;;  %v2563_v13 = vld [vmem:[#allocation9 + $0x1b8] sm:$0xff]  ;;  %v2561_v0 = vld [vmem:[#allocation9 + $0x1a8] sm:$0xff] }
 0x1ce   : > { %v1117_v54 = vpop.f32.mrf.mxu0  ;;  %v1340_v36 = vpop.f32.mrf.mxu1  ;;  %2924 = vmatprep.subr.mxu0 %v5480_v16  ;;  %2716 = vmatpush2.msra.mxu1 %v2527_v22  ;;  %v2558_v22 = vld [vmem:[#allocation9 + $0x190] sm:$0xff] }
 0x1cf   : > { %v5696_v32 = vadd.f32 %v1340_v36, %v1116_v30  ;;  %2925 = vmatpush2.msra.mxu0 %v2567_v18  ;;  %2717 = vmatprep.subr.mxu1 %v5480_v16  ;;  %v2562_v30 = vld [vmem:[#allocation9 + $0x1b0] sm:$0xff] }
 0x1d0   : > { %v1120_v3 = vpop.f32.mrf.mxu0  ;;  %v1342_v15 = vpop.f32.mrf.mxu1  ;;  %4147 = vmatmul.mubr.f32.gmra.mxu0 %v5572_v40  ;;  %2926 = vmatprep.subr.mxu0 %v5480_v16 }
 0x1d1   : > { %v1121_v29 = vadd.f32 %v5448_v61, %v1120_v3  ;;  %4149 = vmatprep.mubr.f32.mxu0 %v5684_v56  ;;  %2927 = vmatpush2.msra.mxu0 %v2566_v12  ;;  %v5728_v12 = vld [vmem:[#allocation3 + $0x10] sm:$0x3] }
 0x1d2   : > { %v1122_v52 = vpop.f32.mrf.mxu0  ;;  %v1345_v38 = vpop.f32.mrf.mxu1  ;;  %2928 = vmatprep.subr.mxu0 %v5480_v16  ;;  %2718 = vmatpush2.msra.mxu1 %v2526_v59 }
 0x1d3   : > { %v5706_v49 = vadd.f32 %v1345_v38, %v1121_v29  ;;  %2929 = vmatpush2.msra.mxu0 %v2565_v4  ;;  %2719 = vmatprep.subr.mxu1 %v5480_v16  ;;  %v2560_v29 = vld [vmem:[#allocation9 + $0x1a0] sm:$0xff] }
 0x1d4   : > { %v1125_v40 = vpop.f32.mrf.mxu0  ;;  %v1347_v19 = vpop.f32.mrf.mxu1  ;;  %4150 = vmatmul.mubr.f32.gmra.mxu0 %v750_v27  ;;  %2930 = vmatprep.subr.mxu0 %v5480_v16 }
 0x1d5   : > { %v1126_v55 = vadd.f32 %v5448_v61, %v1125_v40  ;;  %2931 = vmatpush2.msra.mxu0 %v2564_v47  ;;  %v2253_v19 = vrot.slane %v5728_v12, 1 }
 0x1d6   : > { %v1127_v42 = vpop.f32.mrf.mxu0  ;;  %v1350_v53 = vpop.f32.mrf.mxu1  ;;  %2932 = vmatprep.subr.mxu0 %v5480_v16 }
 0x1d7   : > { %v5712_v25 = vadd.f32 %v1350_v53, %v1126_v55  ;;  %2933 = vmatpush2.msra.mxu0 %v2563_v13 }
 0x1d8   : > { %v1352_v45 = vpop.f32.mrf.mxu1  ;;  %v1420_v37 = vpop.f32.mrf.mxu0  ;;  %2934 = vmatprep.subr.mxu0 %v5480_v16 }
 0x1d9   : > { %v1421_v61 = vadd.f32 %v1420_v37, %v5455_v51  ;;  %2935 = vmatpush2.msra.mxu0 %v2562_v30  ;;  %v2525_v51 = vld [vmem:[#allocation9 + $0x88] sm:$0xff] }
 0x1da   : > { %v1422_v43 = vpop.f32.mrf.mxu0  ;;  %v1645_v34 = vpop.f32.mrf.mxu1  ;;  %2936 = vmatprep.subr.mxu0 %v5480_v16  ;;  %2720 = vmatpush2.msra.mxu1 %v2525_v51  ;;  %v2557_v45 = vld [vmem:[#allocation9 + $0x188] sm:$0xff] }
 0x1db   : > { %v5718_v20 = vadd.f32 %v1645_v34, %v1421_v61  ;;  %2937 = vmatpush2.msra.mxu0 %v2561_v0  ;;  %2721 = vmatprep.subr.mxu1 %v5480_v16  ;;  %v2556_v43 = vld [vmem:[#allocation9 + $0x180] sm:$0xff] }
 0x1dc   : > { %v1425_v54 = vpop.f32.mrf.mxu0  ;;  %v1647_v36 = vpop.f32.mrf.mxu1  ;;  %2938 = vmatprep.subr.mxu0 %v5480_v16  ;;  %2722 = vmatpush2.msra.mxu1 %v2524_v26 }
 0x1dd   : > { %v1426_v3 = vadd.f32 %v1425_v54, %v5462_v60  ;;  %2939 = vmatpush2.msra.mxu0 %v2560_v29  ;;  %v2559_v60 = vld [vmem:[#allocation9 + $0x198] sm:$0xff]  ;;  %2724 = vmatmul.mubr.f32.vlgmr.msra.gmra.mxu1 %v5480_v16 }
 0x1de   : > { %v1427_v15 = vpop.f32.mrf.mxu0  ;;  %v1650_v18 = vpop.f32.mrf.mxu1  ;;  %2940 = vmatprep.subr.mxu0 %v5480_v16  ;;  %3109 = vmatprep.subr.mxu1 %v5480_v16  ;;  %v2587_v54 = vld [vmem:[#allocation9 + $0x278] sm:$0xff] }
 0x1df   : > { %v5724_v27 = vadd.f32 %v1650_v18, %v1426_v3  ;;  %2941 = vmatpush2.msra.mxu0 %v2559_v60  ;;  %3110 = vmatpush1.msra.mxu1 %v2587_v54  ;;  %v2586_v18 = vld [vmem:[#allocation9 + $0x270] sm:$0xff] }
 0x1e0   : > { %v1430_v52 = vpop.f32.mrf.mxu0  ;;  %v1652_v38 = vpop.f32.mrf.mxu1  ;;  %2942 = vmatprep.subr.mxu0 %v5480_v16  ;;  %3111 = vmatprep.subr.mxu1 %v5480_v16 }
 0x1e1   : > { %v1431_v40 = vadd.f32 %v1430_v52, %v5469_v63  ;;  %2943 = vmatpush2.msra.mxu0 %v2558_v22  ;;  %v2254_v63 = vsel %vm493_vm0, %v5552_v7, %v2253_v19  ;;  %3112 = vmatpush1.msra.mxu1 %v2586_v18  ;;  %v5758_v22 = vld [vmem:[#allocation2] sm:$0xff] }
 0x1e2   : > { %v1432_v4 = vpop.f32.mrf.mxu0  ;;  %v1655_v55 = vpop.f32.mrf.mxu1  ;;  %2944 = vmatprep.subr.mxu0 %v5480_v16  ;;  %2728 = vmatprep.mubr.f32.mxu1 %v2254_v63 }
 0x1e3   : > { %v5735_v42 = vadd.f32 %v1655_v55, %v1431_v40  ;;  %2945 = vmatpush2.msra.mxu0 %v2557_v45  ;;  %2729 = vmatmul.mubr.f32.gmra.mxu1 %v5480_v16  ;;  %v2585_v40 = vld [vmem:[#allocation9 + $0x268] sm:$0xff] }
 0x1e4   : > { %v1435_v53 = vpop.f32.mrf.mxu0  ;;  %v1657_v47 = vpop.f32.mrf.mxu1  ;;  %2946 = vmatprep.subr.mxu0 %v5480_v16  ;;  %3113 = vmatprep.subr.mxu1 %v5480_v16 }
 0x1e5   : > { %v1436_v37 = vadd.f32 %v1435_v53, %v5476_v44  ;;  %2947 = vmatpush2.msra.mxu0 %v2556_v43  ;;  %3114 = vmatpush1.msra.mxu1 %v2585_v40  ;;  %v2584_v47 = vld [vmem:[#allocation9 + $0x260] sm:$0xff]  ;;  %v2583_v43 = vld [vmem:[#allocation9 + $0x258] sm:$0xff] }
 0x1e6   : > { %v1437_v13 = vpop.f32.mrf.mxu0  ;;  %v1660_v61 = vpop.f32.mrf.mxu1  ;;  %3334 = vmatprep.subr.mxu0 %v5480_v16  ;;  %3115 = vmatprep.subr.mxu1 %v5758_v22 }
 0x1e7   : > { %v5744_v34 = vadd.f32 %v1660_v61, %v1436_v37  ;;  %3116 = vmatpush1.msra.mxu1 %v2584_v47 }
 0x1e8   : > { %v1440_v7 = vpop.f32.mrf.mxu0  ;;  %v1662_v30 = vpop.f32.mrf.mxu1  ;;  %3117 = vmatprep.subr.mxu1 %v5758_v22 }
 0x1e9   : > { %v1441_v59 = vadd.f32 %v1440_v7, %v5486_v39  ;;  %3118 = vmatpush1.msra.mxu1 %v2583_v43 }
 0x1ea   : > { %v1442_v36 = vpop.f32.mrf.mxu0  ;;  %v1665_v44 = vpop.f32.mrf.mxu1  ;;  %3119 = vmatprep.subr.mxu1 %v5758_v22 }
 0x1eb   : > { %v5748_v0 = vadd.f32 %v1665_v44, %v1441_v59  ;;  %v2582_v44 = vld [vmem:[#allocation9 + $0x250] sm:$0xff] }
 0x1ec   : > { %v1445_v3 = vpop.f32.mrf.mxu0  ;;  %v1667_v51 = vpop.f32.mrf.mxu1  ;;  %3120 = vmatpush1.msra.mxu1 %v2582_v44 }
 0x1ed   : > { %v1446_v15 = vadd.f32 %v1445_v3, %v5494_v50  ;;  %3121 = vmatprep.subr.mxu1 %v5758_v22 }
 0x1ee   : > { %v1447_v29 = vpop.f32.mrf.mxu0  ;;  %v1670_v26 = vpop.f32.mrf.mxu1 }
 0x1ef   : > { %v5752_v52 = vadd.f32 %v1670_v26, %v1446_v15  ;;  %v2581_v26 = vld [vmem:[#allocation9 + $0x248] sm:$0xff] }
 0x1f0   : > { %v1450_v39 = vpop.f32.mrf.mxu0  ;;  %v1672_v38 = vpop.f32.mrf.mxu1  ;;  %3122 = vmatpush1.msra.mxu1 %v2581_v26 }
 0x1f1   : > { %v1451_v60 = vadd.f32 %v1450_v39, %v5502_v62  ;;  %3123 = vmatprep.subr.mxu1 %v5758_v22 }
 0x1f2   : > { %v1452_v19 = vpop.f32.mrf.mxu0  ;;  %v1675_v4 = vpop.f32.mrf.mxu1 }
 0x1f3   : > { %v5756_v55 = vadd.f32 %v1675_v4, %v1451_v60  ;;  %v2580_v4 = vld [vmem:[#allocation9 + $0x240] sm:$0xff] }
 0x1f4   : > { %v1455_v50 = vpop.f32.mrf.mxu0  ;;  %v1677_v63 = vpop.f32.mrf.mxu1  ;;  %3124 = vmatpush1.msra.mxu1 %v2580_v4 }
 0x1f5   : > { %v1456_v53 = vadd.f32 %v1455_v50, %v5510_v23  ;;  %3125 = vmatprep.subr.mxu1 %v5758_v22 }
 0x1f6   : > { %v1457_v16 = vpop.f32.mrf.mxu0  ;;  %v1680_v45 = vpop.f32.mrf.mxu1 }
 0x1f7   : > { %v5762_v37 = vadd.f32 %v1680_v45, %v1456_v53  ;;  %v2579_v45 = vld [vmem:[#allocation9 + $0x238] sm:$0xff] }
 0x1f8   : > { %v1460_v62 = vpop.f32.mrf.mxu0  ;;  %v1682_v13 = vpop.f32.mrf.mxu1  ;;  %3126 = vmatpush1.msra.mxu1 %v2579_v45 }
 0x1f9   : > { %v1461_v61 = vadd.f32 %v1460_v62, %v5518_v8  ;;  %3127 = vmatprep.subr.mxu1 %v5758_v22 }
 0x1fa   : > { %v1462_v7 = vpop.f32.mrf.mxu0  ;;  %v1685_v30 = vpop.f32.mrf.mxu1 }
 0x1fb   : > { %v5766_v59 = vadd.f32 %v1685_v30, %v1461_v61  ;;  %v2578_v30 = vld [vmem:[#allocation9 + $0x230] sm:$0xff] }
 0x1fc   : > { %v1465_v23 = vpop.f32.mrf.mxu0  ;;  %v1687_v54 = vpop.f32.mrf.mxu1  ;;  %3128 = vmatpush1.msra.mxu1 %v2578_v30 }
 0x1fd   : > { %v1466_v36 = vadd.f32 %v1465_v23, %v5526_v33  ;;  %3129 = vmatprep.subr.mxu1 %v5758_v22 }
 0x1fe   : > { %v1467_v3 = vpop.f32.mrf.mxu0  ;;  %v1690_v51 = vpop.f32.mrf.mxu1 }
 0x1ff   : > { %v5770_v15 = vadd.f32 %v1690_v51, %v1466_v36  ;;  %v2577_v51 = vld [vmem:[#allocation9 + $0x228] sm:$0xff] }
 0x200   : > { %v1470_v8 = vpop.f32.mrf.mxu0  ;;  %v1692_v18 = vpop.f32.mrf.mxu1  ;;  %3130 = vmatpush1.msra.mxu1 %v2577_v51 }
 0x201   : > { %v1471_v29 = vadd.f32 %v1470_v8, %v5536_v24  ;;  %3131 = vmatprep.subr.mxu1 %v5758_v22 }
 0x202   : > { %v1472_v39 = vpop.f32.mrf.mxu0  ;;  %v1695_v38 = vpop.f32.mrf.mxu1 }
 0x203   : > { %v5774_v60 = vadd.f32 %v1695_v38, %v1471_v29  ;;  %v2576_v38 = vld [vmem:[#allocation9 + $0x220] sm:$0xff] }
 0x204   : > { %v1475_v33 = vpop.f32.mrf.mxu0  ;;  %v1697_v40 = vpop.f32.mrf.mxu1  ;;  %3132 = vmatpush1.msra.mxu1 %v2576_v38 }
 0x205   : > { %v1476_v19 = vadd.f32 %v1475_v33, %v5547_v46  ;;  %3133 = vmatprep.subr.mxu1 %v5758_v22 }
 0x206   : > { %v1477_v50 = vpop.f32.mrf.mxu0  ;;  %v1700_v63 = vpop.f32.mrf.mxu1 }
 0x207   : > { %v5778_v53 = vadd.f32 %v1700_v63, %v1476_v19  ;;  %v2575_v63 = vld [vmem:[#allocation9 + $0x218] sm:$0xff] }
 0x208   : > { %v1480_v24 = vpop.f32.mrf.mxu0  ;;  %v1702_v47 = vpop.f32.mrf.mxu1  ;;  %3134 = vmatpush1.msra.mxu1 %v2575_v63 }
 0x209   : > { %v1481_v16 = vadd.f32 %v1480_v24, %v5563_v28  ;;  %3135 = vmatprep.subr.mxu1 %v5758_v22 }
 0x20a   : > { %v1482_v62 = vpop.f32.mrf.mxu0  ;;  %v1705_v13 = vpop.f32.mrf.mxu1 }
 0x20b   : > { %v5782_v61 = vadd.f32 %v1705_v13, %v1481_v16 }
 0x20c   : > { %v1485_v46 = vpop.f32.mrf.mxu0  ;;  %v1707_v43 = vpop.f32.mrf.mxu1 }
 0x20d   : > { %v1486_v7 = vadd.f32 %v1485_v46, %v5574_v9  ;;  %v2573_v46 = vld [vmem:[#allocation9 + $0x208] sm:$0xff] }
 0x20e   : > { %v1487_v23 = vpop.f32.mrf.mxu0  ;;  %v1710_v54 = vpop.f32.mrf.mxu1 }
 0x20f   : > { %v5786_v36 = vadd.f32 %v1710_v54, %v1486_v7 }
 0x210   : > { %v1490_v28 = vpop.f32.mrf.mxu0  ;;  %v1712_v44 = vpop.f32.mrf.mxu1 }
 0x211   : > { %v1491_v3 = vadd.f32 %v1490_v28, %v5583_v57  ;;  %v2572_v28 = vld [vmem:[#allocation9 + $0x200] sm:$0xff] }
 0x212   : > { %v1492_v8 = vpop.f32.mrf.mxu0  ;;  %v1715_v18 = vpop.f32.mrf.mxu1 }
 0x213   : > { %v5790_v29 = vadd.f32 %v1715_v18, %v1491_v3 }
 0x214   : > { %v1495_v9 = vpop.f32.mrf.mxu0  ;;  %v1717_v26 = vpop.f32.mrf.mxu1 }
 0x215   : > { %v1496_v39 = vadd.f32 %v1495_v9, %v5589_v5  ;;  %v2574_v5 = vld [vmem:[#allocation9 + $0x210] sm:$0xff]  ;;  %v2603_v9 = vld [vmem:[#allocation9 + $0x2f8] sm:$0xff] }
 0x216   : > { %v1497_v33 = vpop.f32.mrf.mxu0  ;;  %v1720_v40 = vpop.f32.mrf.mxu1  ;;  %3136 = vmatpush1.msra.mxu1 %v2574_v5  ;;  %v2601_v5 = vld [vmem:[#allocation9 + $0x2e8] sm:$0xff] }
 0x217   : > { %v5794_v19 = vadd.f32 %v1720_v40, %v1496_v39  ;;  %3137 = vmatprep.subr.mxu1 %v5758_v22 }
 0x218   : > { %v1500_v57 = vpop.f32.mrf.mxu0  ;;  %v1722_v4 = vpop.f32.mrf.mxu1  ;;  %3138 = vmatpush1.msra.mxu1 %v2573_v46 }
 0x219   : > { %v1501_v50 = vadd.f32 %v1500_v57, %v5595_v17  ;;  %3139 = vmatprep.subr.mxu1 %v5758_v22  ;;  %v2602_v57 = vld [vmem:[#allocation9 + $0x2f0] sm:$0xff] }
 0x21a   : > { %v1502_v24 = vpop.f32.mrf.mxu0  ;;  %v1725_v47 = vpop.f32.mrf.mxu1  ;;  %3140 = vmatpush1.msra.mxu1 %v2572_v28 }
 0x21b   : > { %v5798_v16 = vadd.f32 %v1725_v47, %v1501_v50  ;;  %3141 = vmatprep.subr.mxu1 %v5758_v22 }
 0x21c   : > { %v1505_v45 = vpop.f32.mrf.mxu0  ;;  %v1727_v62 = vpop.f32.mrf.mxu1  ;;  %3142 = vmatpush2.msra.mxu1 %v2603_v9 }
 0x21d   : > { %v1506_v13 = vadd.f32 %v1505_v45, %v5601_v31  ;;  %3143 = vmatprep.subr.mxu1 %v5758_v22 }
 0x21e   : > { %v1507_v43 = vpop.f32.mrf.mxu0  ;;  %v1730_v7 = vpop.f32.mrf.mxu1  ;;  %3144 = vmatpush2.msra.mxu1 %v2602_v57 }
 0x21f   : > { %v5803_v17 = vadd.f32 %v1730_v7, %v1506_v13  ;;  %3145 = vmatprep.subr.mxu1 %v5758_v22  ;;  %v2600_v7 = vld [vmem:[#allocation9 + $0x2e0] sm:$0xff] }
 0x220   : > { %v1510_v30 = vpop.f32.mrf.mxu0  ;;  %v1732_v23 = vpop.f32.mrf.mxu1  ;;  %3146 = vmatpush2.msra.mxu1 %v2601_v5 }
 0x221   : > { %v1511_v54 = vadd.f32 %v1510_v30, %v5607_v48  ;;  %3147 = vmatprep.subr.mxu1 %v5758_v22 }
 0x222   : > { %v1512_v44 = vpop.f32.mrf.mxu0  ;;  %v1735_v3 = vpop.f32.mrf.mxu1  ;;  %3148 = vmatpush2.msra.mxu1 %v2600_v7 }
 0x223   : > { %v5807_v51 = vadd.f32 %v1735_v3, %v1511_v54  ;;  %3149 = vmatprep.subr.mxu1 %v5758_v22  ;;  %v2599_v3 = vld [vmem:[#allocation9 + $0x2d8] sm:$0xff] }
 0x224   : > { %v1515_v31 = vpop.f32.mrf.mxu0  ;;  %v1737_v8 = vpop.f32.mrf.mxu1  ;;  %3150 = vmatpush2.msra.mxu1 %v2599_v3 }
 0x225   : > { %v1516_v18 = vadd.f32 %v1515_v31, %v5613_v11  ;;  %3151 = vmatprep.subr.mxu1 %v5758_v22 }
 0x226   : > { %v1517_v26 = vpop.f32.mrf.mxu0  ;;  %v1740_v39 = vpop.f32.mrf.mxu1 }
 0x227   : > { %v5811_v38 = vadd.f32 %v1740_v39, %v1516_v18  ;;  %v2598_v39 = vld [vmem:[#allocation9 + $0x2d0] sm:$0xff] }
 0x228   : > { %v1520_v48 = vpop.f32.mrf.mxu0  ;;  %v1742_v33 = vpop.f32.mrf.mxu1  ;;  %3152 = vmatpush2.msra.mxu1 %v2598_v39 }
 0x229   : > { %v1521_v40 = vadd.f32 %v1520_v48, %v5620_v2  ;;  %3153 = vmatprep.subr.mxu1 %v5758_v22 }
 0x22a   : > { %v1522_v4 = vpop.f32.mrf.mxu0  ;;  %v1745_v50 = vpop.f32.mrf.mxu1 }
 0x22b   : > { %v5815_v63 = vadd.f32 %v1745_v50, %v1521_v40  ;;  %v2597_v50 = vld [vmem:[#allocation9 + $0x2c8] sm:$0xff] }
 0x22c   : > { %v1525_v11 = vpop.f32.mrf.mxu0  ;;  %v1747_v24 = vpop.f32.mrf.mxu1  ;;  %3154 = vmatpush2.msra.mxu1 %v2597_v50 }
 0x22d   : > { %v1526_v47 = vadd.f32 %v1525_v11, %v5628_v14  ;;  %3155 = vmatprep.subr.mxu1 %v5758_v22 }
 0x22e   : > { %v1527_v45 = vpop.f32.mrf.mxu0  ;;  %v1750_v62 = vpop.f32.mrf.mxu1 }
 0x22f   : > { %v5819_v13 = vadd.f32 %v1750_v62, %v1526_v47  ;;  %v2596_v62 = vld [vmem:[#allocation9 + $0x2c0] sm:$0xff] }
 0x230   : > { %v1530_v2 = vpop.f32.mrf.mxu0  ;;  %v1752_v46 = vpop.f32.mrf.mxu1  ;;  %3156 = vmatpush2.msra.mxu1 %v2596_v62 }
 0x231   : > { %v1531_v43 = vadd.f32 %v1530_v2, %v5636_v10  ;;  %3157 = vmatprep.subr.mxu1 %v5758_v22 }
 0x232   : > { %v1532_v30 = vpop.f32.mrf.mxu0  ;;  %v1755_v23 = vpop.f32.mrf.mxu1 }
 0x233   : > { %v5823_v54 = vadd.f32 %v1755_v23, %v1531_v43  ;;  %v2595_v23 = vld [vmem:[#allocation9 + $0x2b8] sm:$0xff] }
 0x234   : > { %v1535_v14 = vpop.f32.mrf.mxu0  ;;  %v1757_v28 = vpop.f32.mrf.mxu1  ;;  %3158 = vmatpush2.msra.mxu1 %v2595_v23  ;;  %v2590_v23 = vld [vmem:[#allocation9 + $0x290] sm:$0xff] }
 0x235   : > { %v1536_v44 = vadd.f32 %v1535_v14, %v5644_v6  ;;  %3159 = vmatprep.subr.mxu1 %v5758_v22 }
 0x236   : > { %v1537_v31 = vpop.f32.mrf.mxu0  ;;  %v1760_v8 = vpop.f32.mrf.mxu1 }
 0x237   : > { %v5827_v18 = vadd.f32 %v1760_v8, %v1536_v44  ;;  %v2594_v8 = vld [vmem:[#allocation9 + $0x2b0] sm:$0xff] }
 0x238   : > { %v1540_v10 = vpop.f32.mrf.mxu0  ;;  %v1762_v9 = vpop.f32.mrf.mxu1  ;;  %3160 = vmatpush2.msra.mxu1 %v2594_v8 }
 0x239   : > { %v1541_v26 = vadd.f32 %v1540_v10, %v5652_v58  ;;  %3161 = vmatprep.subr.mxu1 %v5758_v22 }
 0x23a   : > { %v1542_v48 = vpop.f32.mrf.mxu0  ;;  %v1765_v33 = vpop.f32.mrf.mxu1 }
 0x23b   : > { %v5831_v40 = vadd.f32 %v1765_v33, %v1541_v26  ;;  %v2593_v33 = vld [vmem:[#allocation9 + $0x2a8] sm:$0xff] }
 0x23c   : > { %v1545_v6 = vpop.f32.mrf.mxu0  ;;  %v1767_v57 = vpop.f32.mrf.mxu1  ;;  %3162 = vmatpush2.msra.mxu1 %v2593_v33 }
 0x23d   : > { %v1546_v4 = vadd.f32 %v1545_v6, %v5660_v41  ;;  %3163 = vmatprep.subr.mxu1 %v5758_v22 }
 0x23e   : > { %v1547_v11 = vpop.f32.mrf.mxu0  ;;  %v1770_v24 = vpop.f32.mrf.mxu1 }
 0x23f   : > { %v5835_v47 = vadd.f32 %v1770_v24, %v1546_v4  ;;  %v2592_v24 = vld [vmem:[#allocation9 + $0x2a0] sm:$0xff] }
 0x240   : > { %v1550_v58 = vpop.f32.mrf.mxu0  ;;  %v1772_v5 = vpop.f32.mrf.mxu1  ;;  %3164 = vmatpush2.msra.mxu1 %v2592_v24  ;;  %v2365_v24 = vrot.slane %v5728_v12, 2 }
 0x241   : > { %v1551_v45 = vadd.f32 %v1550_v58, %v5668_v1  ;;  %3165 = vmatprep.subr.mxu1 %v5758_v22 }
 0x242   : > { %v1552_v2 = vpop.f32.mrf.mxu0  ;;  %v1775_v46 = vpop.f32.mrf.mxu1 }
 0x243   : > { %v5839_v43 = vadd.f32 %v1775_v46, %v1551_v45  ;;  %v2591_v2 = vld [vmem:[#allocation9 + $0x298] sm:$0xff] }
 0x244   : > { %v1555_v41 = vpop.f32.mrf.mxu0  ;;  %v1777_v7 = vpop.f32.mrf.mxu1  ;;  %3166 = vmatpush2.msra.mxu1 %v2591_v2 }
 0x245   : > { %v1556_v30 = vadd.f32 %v1555_v41, %v5676_v35  ;;  %3167 = vmatprep.subr.mxu1 %v5758_v22 }
 0x246   : > { %v1557_v14 = vpop.f32.mrf.mxu0  ;;  %v1780_v28 = vpop.f32.mrf.mxu1  ;;  %3168 = vmatpush2.msra.mxu1 %v2590_v23 }
 0x247   : > { %v5843_v44 = vadd.f32 %v1780_v28, %v1556_v30  ;;  %3169 = vmatprep.subr.mxu1 %v5758_v22 }
 0x248   : > { %v1560_v1 = vpop.f32.mrf.mxu0  ;;  %v1782_v3 = vpop.f32.mrf.mxu1 }
 0x249   : > { %v1561_v31 = vadd.f32 %v1560_v1, %v5687_v21 }
 0x24a   : > { %v1562_v10 = vpop.f32.mrf.mxu0  ;;  %v1785_v9 = vpop.f32.mrf.mxu1 }
 0x24b   : > { %v5847_v26 = vadd.f32 %v1785_v9, %v1561_v31  ;;  %v2589_v10 = vld [vmem:[#allocation9 + $0x288] sm:$0xff] }
 0x24c   : > { %v1565_v35 = vpop.f32.mrf.mxu0  ;;  %v1787_v39 = vpop.f32.mrf.mxu1  ;;  %3170 = vmatpush2.msra.mxu1 %v2589_v10 }
 0x24d   : > { %v1566_v48 = vadd.f32 %v1565_v35, %v5696_v32  ;;  %3171 = vmatprep.subr.mxu1 %v5758_v22 }
 0x24e   : > { %v1567_v6 = vpop.f32.mrf.mxu0  ;;  %v1790_v57 = vpop.f32.mrf.mxu1 }
 0x24f   : > { %v5851_v4 = vadd.f32 %v1790_v57, %v1566_v48  ;;  %v2588_v48 = vld [vmem:[#allocation9 + $0x280] sm:$0xff] }
 0x250   : > { %v1570_v21 = vpop.f32.mrf.mxu0  ;;  %v1792_v50 = vpop.f32.mrf.mxu1  ;;  %3172 = vmatpush2.msra.mxu1 %v2588_v48  ;;  %v2617_v48 = vld [vmem:[#allocation9 + $0x368] sm:$0xff] }
 0x251   : > { %v1571_v11 = vadd.f32 %v1570_v21, %v5706_v49  ;;  %v2651_v50 = vld [vmem:[#allocation9 + $0x478] sm:$0xff] }
 0x252   : > { %v1572_v58 = vpop.f32.mrf.mxu0  ;;  %v1795_v5 = vpop.f32.mrf.mxu1  ;;  %4152 = vmatprep.subr.mxu1 %v2651_v50 }
 0x253   : > { %v5855_v45 = vadd.f32 %v1795_v5, %v1571_v11 }
 0x254   : > { %v5858_v32 = vpop.f32.mrf.mxu0  ;;  %v1797_v62 = vpop.f32.mrf.mxu1 }
 0x256   : > { %v1577_v46 = vpop.f32.mrf.mxu0  ;;  %v5860_v41 = vpop.f32.mrf.mxu1 }
 0x258   : > { %v4106_v7 = vpop.f32.mrf.mxu0  ;;  %v1802_v49 = vpop.f32.mrf.mxu1 }
 0x259   : > { %v1876_v30 = vadd.f32 %v4106_v7, %v5724_v27 }
 0x25a   : > { %v1870_v14 = vpop.f32.mrf.mxu0 }
 0x25b   : > { %v2030_v28 = vmax.f32 %v1876_v30, 0.0  ;;  %v1871_v1 = vadd.f32 %v1870_v14, %v5718_v20  ;;  %v2618_v30 = vld [vmem:[#allocation9 + $0x370] sm:$0xff]  ;;  %v2366_v14 = vsel %vm606_vm1, %v5684_v56, %v2365_v24 }
 0x25c   : > { %v4109_v3 = vpop.f32.mrf.mxu0 }
 0x25d   : > { %2117 = vst [vmem:[#allocation3 + $0x21] sm:$0xff] %v2030_v28  ;;  %v2029_v31 = vmax.f32 %v1871_v1, 0.0  ;;  %v1886_v8 = vadd.f32 %v4109_v3, %v5744_v34 }
 0x25e   : > { %v1880_v9 = vpop.f32.mrf.mxu0 }
 0x25f   : > { %2116 = vst [vmem:[#allocation3 + $0x19] sm:$0xff] %v2029_v31  ;;  %v2032_v35 = vmax.f32 %v1886_v8, 0.0  ;;  %v1881_v27 = vadd.f32 %v1880_v9, %v5735_v42 }
 0x260   : > { %v4112_v39 = vpop.f32.mrf.mxu0 }
 0x261   : > { %2119 = vst [vmem:[#allocation3 + $0x39] sm:$0xff] %v2032_v35  ;;  %v2031_v20 = vmax.f32 %v1881_v27, 0.0  ;;  %v1896_v33 = vadd.f32 %v4112_v39, %v5752_v52  ;;  %v2619_v52 = vld [vmem:[#allocation9 + $0x378] sm:$0xff] }
 0x262   : > { %v1890_v6 = vpop.f32.mrf.mxu0 }
 0x263   : > { %2118 = vst [vmem:[#allocation3 + $0x31] sm:$0xff] %v2031_v20  ;;  %v2034_v57 = vmax.f32 %v1896_v33, 0.0  ;;  %v1891_v34 = vadd.f32 %v1890_v6, %v5748_v0 }
 0x264   : > { %v4115_v21 = vpop.f32.mrf.mxu0  ;;  %v2153_v0 = vld [vmem:[#allocation3 + $0x28] sm:$0x3] }
 0x265   : > { %2121 = vst [vmem:[#allocation3 + $0x51] sm:$0xff] %v2034_v57  ;;  %v2033_v11 = vmax.f32 %v1891_v34, 0.0  ;;  %v1906_v42 = vadd.f32 %v4115_v21, %v5762_v37  ;;  %v2258_v1 = vrot.slane %v2153_v0, 1 }
 0x266   : > { %v1900_v58 = vpop.f32.mrf.mxu0  ;;  %v2151_v5 = vld [vmem:[#allocation3 + $0x18] sm:$0xff]  ;;  %v5873_v62 = vld [vmem:[#allocation3 + $0x20] sm:$0xff] }
 0x267   : > { %2120 = vst [vmem:[#allocation3 + $0x49] sm:$0xff] %v2033_v11  ;;  %v2036_v2 = vmax.f32 %v1906_v42, 0.0  ;;  %v1901_v46 = vadd.f32 %v1900_v58, %v5756_v55  ;;  %2948 = vmatprep.mubr.f32.mxu0 %v2151_v5  ;;  %v2255_v49 = vrot.slane %v2151_v5, 1  ;;  %v2256_v37 = vrot.slane %v5873_v62, 1  ;;  %v2616_v42 = vld [vmem:[#allocation9 + $0x360] sm:$0xff] }
 0x268   : > { %v4118_v7 = vpop.f32.mrf.mxu0  ;;  %2949 = vmatmul.mubr.f32.vlgmr.msra.gmra.mxu0 %v5684_v56  ;;  %v2367_v8 = vrot.slane %v2151_v5, 2  ;;  %v2368_v10 = vrot.slane %v5873_v62, 2  ;;  %v2156_v21 = vld [vmem:[#allocation3 + $0x40] sm:$0x3]  ;;  %v2370_v11 = vrot.slane %v2153_v0, 2 }
 0x269   : > { %2123 = vst [vmem:[#allocation3 + $0x69] sm:$0xff] %v2036_v2  ;;  %v2035_v12 = vmax.f32 %v1901_v46, 0.0  ;;  %v1916_v23 = vadd.f32 %v4118_v7, %v5770_v15  ;;  %2953 = vmatprep.mubr.f32.mxu0 %v5873_v62  ;;  %3335 = vmatpush1.msra.mxu0 %v2619_v52  ;;  %v5883_v28 = vsel %vm493_vm0, %v2255_v49, %v2256_v37  ;;  %v2263_v52 = vrot.slane %v2156_v21, 1 }
 0x26a   : > { %v1910_v55 = vpop.f32.mrf.mxu0  ;;  %v5885_v3 = vld [vmem:[#allocation3 + $0x30] sm:$0xff]  ;;  %v5887_v31 = vld [vmem:[#allocation3 + $0x38] sm:$0xff]  ;;  %3336 = vmatprep.subr.mxu0 %v5758_v22  ;;  %2733 = vmatprep.mubr.f32.mxu1 %v5883_v28  ;;  %v5894_v35 = vsel %vm493_vm0, %v2256_v37, %v2258_v1  ;;  %v5904_v34 = vsel %vm606_vm1, %v2367_v8, %v2368_v10  ;;  %v5919_v2 = vsel %vm606_vm1, %v2368_v10, %v2370_v11 }
 0x26b   : > { %2122 = vst [vmem:[#allocation3 + $0x61] sm:$0xff] %v2035_v12  ;;  %v2038_v15 = vmax.f32 %v1916_v23, 0.0  ;;  %v1911_v9 = vadd.f32 %v1910_v55, %v5766_v59  ;;  %3337 = vmatpush1.msra.mxu0 %v2618_v30  ;;  %2734 = vmatmul.mubr.f32.gmra.mxu1 %v2151_v5  ;;  %v2260_v27 = vrot.slane %v5885_v3, 1  ;;  %v2261_v39 = vrot.slane %v5887_v31, 1  ;;  %v2615_v23 = vld [vmem:[#allocation9 + $0x358] sm:$0xff] }
 0x26c   : > { %v4121_v56 = vpop.f32.mrf.mxu0  ;;  %2954 = vmatmul.mubr.f32.gmra.mxu0 %v2366_v14  ;;  %2738 = vmatprep.mubr.f32.mxu1 %v5894_v35  ;;  %v2373_v7 = vrot.slane %v5887_v31, 2 }
 0x26d   : > { %2125 = vst [vmem:[#allocation3 + $0x81] sm:$0xff] %v2038_v15  ;;  %v2037_v20 = vmax.f32 %v1911_v9, 0.0  ;;  %v1926_v33 = vadd.f32 %v4121_v56, %v5778_v53  ;;  %2958 = vmatprep.mubr.f32.mxu0 %v5885_v3  ;;  %3338 = vmatprep.subr.mxu0 %v5758_v22  ;;  %v5908_v53 = vsel %vm493_vm0, %v2260_v27, %v2261_v39  ;;  %v2159_v15 = vld [vmem:[#allocation3 + $0x58] sm:$0x3]  ;;  %v2375_v9 = vrot.slane %v2156_v21, 2  ;;  %v2614_v56 = vld [vmem:[#allocation9 + $0x350] sm:$0xff] }
 0x26e   : > { %v1920_v59 = vpop.f32.mrf.mxu0  ;;  %3339 = vmatpush1.msra.mxu0 %v2617_v48  ;;  %v5916_v5 = vld [vmem:[#allocation3 + $0x50] sm:$0xff]  ;;  %v5927_v37 = vsel %vm493_vm0, %v2261_v39, %v2263_v52 }
 0x26f   : > { %2124 = vst [vmem:[#allocation3 + $0x79] sm:$0xff] %v2037_v20  ;;  %v2040_v6 = vmax.f32 %v1926_v33, 0.0  ;;  %v1921_v57 = vadd.f32 %v1920_v59, %v5774_v60  ;;  %2739 = vmatmul.mubr.f32.gmra.mxu1 %v5873_v62  ;;  %v5914_v60 = vld [vmem:[#allocation3 + $0x48] sm:$0xff]  ;;  %3340 = vmatprep.subr.mxu0 %v5758_v22  ;;  %v2266_v12 = vrot.slane %v5916_v5, 1  ;;  %v2268_v20 = vrot.slane %v2159_v15, 1 }
 0x270   : > { %v4124_v50 = vpop.f32.mrf.mxu0  ;;  %2959 = vmatmul.mubr.f32.gmra.mxu0 %v5904_v34  ;;  %2743 = vmatprep.mubr.f32.mxu1 %v5908_v53  ;;  %v2265_v30 = vrot.slane %v5914_v60, 1  ;;  %v5953_v33 = vsel %vm606_vm1, %v2373_v7, %v2375_v9 }
 0x271   : > { %2127 = vst [vmem:[#allocation3 + $0x99] sm:$0xff] %v2040_v6  ;;  %v2039_v24 = vmax.f32 %v1921_v57, 0.0  ;;  %v1936_v58 = vadd.f32 %v4124_v50, %v5786_v36  ;;  %2963 = vmatprep.mubr.f32.mxu0 %v5887_v31  ;;  %v2372_v36 = vrot.slane %v5885_v3, 2  ;;  %3341 = vmatpush1.msra.mxu0 %v2616_v42  ;;  %v2378_v57 = vrot.slane %v5916_v5, 2 }
 0x272   : > { %v1930_v62 = vpop.f32.mrf.mxu0  ;;  %3342 = vmatprep.subr.mxu0 %v5758_v22  ;;  %v5950_v48 = vld [vmem:[#allocation3 + $0x68] sm:$0xff]  ;;  %v5961_v50 = vsel %vm493_vm0, %v2266_v12, %v2268_v20 }
 0x273   : > { %2126 = vst [vmem:[#allocation3 + $0x91] sm:$0xff] %v2039_v24  ;;  %v2042_v46 = vmax.f32 %v1936_v58, 0.0  ;;  %v1931_v0 = vadd.f32 %v1930_v62, %v5782_v61  ;;  %2744 = vmatmul.mubr.f32.gmra.mxu1 %v5885_v3  ;;  %v5938_v8 = vsel %vm606_vm1, %v2372_v36, %v2373_v7  ;;  %3343 = vmatpush1.msra.mxu0 %v2615_v23  ;;  %v2271_v42 = vrot.slane %v5950_v48, 1  ;;  %v2613_v24 = vld [vmem:[#allocation9 + $0x348] sm:$0xff]  ;;  %v2162_v36 = vld [vmem:[#allocation3 + $0x70] sm:$0x3] }
 0x274   : > { %v4127_v49 = vpop.f32.mrf.mxu0  ;;  %2964 = vmatmul.mubr.f32.gmra.mxu0 %v5919_v2  ;;  %2748 = vmatprep.mubr.f32.mxu1 %v5927_v37 }
 0x275   : > { %2129 = vst [vmem:[#allocation3 + $0xb1] sm:$0xff] %v2042_v46  ;;  %v2041_v61 = vmax.f32 %v1931_v0, 0.0  ;;  %v1946_v14 = vadd.f32 %v4127_v49, %v5794_v19  ;;  %2968 = vmatprep.mubr.f32.mxu0 %v5914_v60  ;;  %v5942_v19 = vsel %vm493_vm0, %v2265_v30, %v2266_v12  ;;  %3344 = vmatprep.subr.mxu0 %v5758_v22  ;;  %v2380_v49 = vrot.slane %v2159_v15, 2  ;;  %v2612_v30 = vld [vmem:[#allocation9 + $0x340] sm:$0xff] }
 0x276   : > { %v1940_v55 = vpop.f32.mrf.mxu0  ;;  %3345 = vmatpush1.msra.mxu0 %v2614_v56 }
 0x277   : > { %2128 = vst [vmem:[#allocation3 + $0xa9] sm:$0xff] %v2041_v61  ;;  %v2044_v1 = vmax.f32 %v1946_v14, 0.0  ;;  %v1941_v3 = vadd.f32 %v1940_v55, %v5790_v29  ;;  %2749 = vmatmul.mubr.f32.gmra.mxu1 %v5887_v31  ;;  %v5948_v29 = vld [vmem:[#allocation3 + $0x60] sm:$0xff]  ;;  %3346 = vmatprep.subr.mxu0 %v5758_v22  ;;  %v2273_v55 = vrot.slane %v2162_v36, 1 }
 0x278   : > { %v4130_v10 = vpop.f32.mrf.mxu0  ;;  %2969 = vmatmul.mubr.f32.gmra.mxu0 %v5938_v8  ;;  %2753 = vmatprep.mubr.f32.mxu1 %v5942_v19  ;;  %v2270_v11 = vrot.slane %v5948_v29, 1  ;;  %v5984_v61 = vld [vmem:[#allocation3 + $0x80] sm:$0xff] }
 0x279   : > { %2131 = vst [vmem:[#allocation3 + $0xc9] sm:$0xff] %v2044_v1  ;;  %v2043_v27 = vmax.f32 %v1941_v3, 0.0  ;;  %v1956_v39 = vadd.f32 %v4130_v10, %v5803_v17  ;;  %2973 = vmatprep.mubr.f32.mxu0 %v5916_v5  ;;  %v2377_v17 = vrot.slane %v5914_v60, 2  ;;  %3347 = vmatpush1.msra.mxu0 %v2613_v24  ;;  %v5987_v1 = vsel %vm606_vm1, %v2378_v57, %v2380_v49  ;;  %v2610_v24 = vld [vmem:[#allocation9 + $0x330] sm:$0xff] }
 0x27a   : > { %v1950_v31 = vpop.f32.mrf.mxu0  ;;  %3348 = vmatprep.subr.mxu0 %v5758_v22  ;;  %v2383_v10 = vrot.slane %v5950_v48, 2  ;;  %v5995_v56 = vsel %vm493_vm0, %v2271_v42, %v2273_v55 }
 0x27b   : > { %2130 = vst [vmem:[#allocation3 + $0xc1] sm:$0xff] %v2043_v27  ;;  %v2046_v59 = vmax.f32 %v1956_v39, 0.0  ;;  %v1951_v6 = vadd.f32 %v1950_v31, %v5798_v16  ;;  %2754 = vmatmul.mubr.f32.gmra.mxu1 %v5914_v60  ;;  %v5972_v0 = vsel %vm606_vm1, %v2377_v17, %v2378_v57  ;;  %3349 = vmatpush1.msra.mxu0 %v2612_v30  ;;  %v2276_v39 = vrot.slane %v5984_v61, 1  ;;  %v2611_v31 = vld [vmem:[#allocation9 + $0x338] sm:$0xff] }
 0x27c   : > { %v4133_v21 = vpop.f32.mrf.mxu0  ;;  %2974 = vmatmul.mubr.f32.gmra.mxu0 %v5953_v33  ;;  %2758 = vmatprep.mubr.f32.mxu1 %v5961_v50  ;;  %v2388_v30 = vrot.slane %v5984_v61, 2 }
 0x27d   : > { %2133 = vst [vmem:[#allocation3 + $0xe1] sm:$0xff] %v2046_v59  ;;  %v2045_v16 = vmax.f32 %v1951_v6, 0.0  ;;  %v1966_v58 = vadd.f32 %v4133_v21, %v5811_v38  ;;  %2978 = vmatprep.mubr.f32.mxu0 %v5948_v29  ;;  %v5976_v38 = vsel %vm493_vm0, %v2270_v11, %v2271_v42  ;;  %3350 = vmatprep.subr.mxu0 %v5758_v22  ;;  %v6008_v21 = vld [vmem:[#allocation3 + $0x88] sm:$0x3]  ;;  %v2385_v42 = vrot.slane %v2162_v36, 2 }
 0x27e   : > { %v1960_v62 = vpop.f32.mrf.mxu0  ;;  %3351 = vmatpush1.msra.mxu0 %v2611_v31  ;;  %v6047_v31 = vld [vmem:[#allocation3 + $0xa0] sm:$0x3] }
 0x27f   : > { %2132 = vst [vmem:[#allocation3 + $0xd9] sm:$0xff] %v2045_v16  ;;  %v2048_v52 = vmax.f32 %v1966_v58, 0.0  ;;  %v1961_v46 = vadd.f32 %v1960_v62, %v5807_v51  ;;  %2759 = vmatmul.mubr.f32.gmra.mxu1 %v5916_v5  ;;  %v5982_v51 = vld [vmem:[#allocation3 + $0x78] sm:$0xff]  ;;  %v6018_v58 = vld [vmem:[#allocation3 + $0x90] sm:$0xff]  ;;  %3352 = vmatprep.subr.mxu0 %v5758_v22 }
 0x280   : > { %v4136_v7 = vpop.f32.mrf.mxu0  ;;  %2979 = vmatmul.mubr.f32.gmra.mxu0 %v5972_v0  ;;  %2763 = vmatprep.mubr.f32.mxu1 %v5976_v38  ;;  %v2275_v27 = vrot.slane %v5982_v51, 1  ;;  %v6020_v62 = vld [vmem:[#allocation3 + $0x98] sm:$0xff]  ;;  %v2387_v49 = vrot.slane %v5982_v51, 2 }
 0x281   : > { %2135 = vst [vmem:[#allocation3 + $0xf9] sm:$0xff] %v2048_v52  ;;  %v2047_v12 = vmax.f32 %v1961_v46, 0.0  ;;  %v1976_v23 = vadd.f32 %v4136_v7, %v5819_v13  ;;  %2983 = vmatprep.mubr.f32.mxu0 %v5950_v48  ;;  %v2382_v13 = vrot.slane %v5948_v29, 2  ;;  %v2278_v46 = vrot.slane %v6008_v21, 1  ;;  %3353 = vmatpush1.msra.mxu0 %v2610_v24 }
 0x282   : > { %v1970_v14 = vpop.f32.mrf.mxu0  ;;  %v6012_v11 = vsel %vm493_vm0, %v2275_v27, %v2276_v39  ;;  %v6024_v7 = vsel %vm606_vm1, %v2383_v10, %v2385_v42  ;;  %v2281_v55 = vrot.slane %v6020_v62, 1  ;;  %3354 = vmatprep.subr.mxu0 %v5758_v22  ;;  %v2283_v42 = vrot.slane %v6047_v31, 1 }
 0x283   : > { %2134 = vst [vmem:[#allocation3 + $0xf1] sm:$0xff] %v2047_v12  ;;  %v2050_v3 = vmax.f32 %v1976_v23, 0.0  ;;  %v1971_v15 = vadd.f32 %v1970_v14, %v5815_v63  ;;  %2764 = vmatmul.mubr.f32.gmra.mxu1 %v5948_v29  ;;  %v6006_v57 = vsel %vm606_vm1, %v2382_v13, %v2383_v10  ;;  %v6032_v23 = vsel %vm493_vm0, %v2276_v39, %v2278_v46 }
 0x284   : > { %v4139_v9 = vpop.f32.mrf.mxu0  ;;  %2984 = vmatmul.mubr.f32.gmra.mxu0 %v5987_v1  ;;  %2768 = vmatprep.mubr.f32.mxu1 %v5995_v56  ;;  %v2280_v14 = vrot.slane %v6018_v58, 1  ;;  %v1576_v13 = vadd.f32 %v5858_v32, %v5712_v25  ;;  %v6045_v39 = vsel %vm606_vm1, %v2387_v49, %v2388_v30  ;;  %v2390_v25 = vrot.slane %v6008_v21, 2  ;;  %v2608_v32 = vld [vmem:[#allocation9 + $0x320] sm:$0xff] }
 0x285   : > { %2137 = vst [vmem:[#allocation3 + $0x111] sm:$0xff] %v2050_v3  ;;  %v2049_v63 = vmax.f32 %v1971_v15, 0.0  ;;  %v1986_v20 = vadd.f32 %v4139_v9, %v5827_v18  ;;  %2988 = vmatprep.mubr.f32.mxu0 %v5982_v51  ;;  %v2609_v3 = vld [vmem:[#allocation9 + $0x328] sm:$0xff] }
 0x286   : > { %v1980_v59 = vpop.f32.mrf.mxu0  ;;  %3355 = vmatpush1.msra.mxu0 %v2609_v3  ;;  %v6065_v21 = vsel %vm606_vm1, %v2388_v30, %v2390_v25  ;;  %v6080_v30 = vld [vmem:[#allocation2] sm:$0xff]  ;;  %v2171_v3 = vld [vmem:[#allocation3 + $0xb8] sm:$0x3] }
 0x287   : > { %2136 = vst [vmem:[#allocation3 + $0x109] sm:$0xff] %v2049_v63  ;;  %v2052_v6 = vmax.f32 %v1986_v20, 0.0  ;;  %v1981_v17 = vadd.f32 %v1980_v59, %v5823_v54  ;;  %2769 = vmatmul.mubr.f32.gmra.mxu1 %v5950_v48  ;;  %v6051_v63 = vsel %vm493_vm0, %v2280_v14, %v2281_v55  ;;  %v6058_v59 = vld [vmem:[#allocation3 + $0xa8] sm:$0xff]  ;;  %3356 = vmatprep.subr.mxu0 %v5758_v22 }
 0x288   : > { %v4142_v18 = vpop.f32.mrf.mxu0  ;;  %2989 = vmatmul.mubr.f32.gmra.mxu0 %v6006_v57  ;;  %2773 = vmatprep.mubr.f32.mxu1 %v6012_v11  ;;  %v2285_v46 = vrot.slane %v6058_v59, 1  ;;  %v2397_v25 = vrot.slane %v6058_v59, 2 }
 0x289   : > { %2139 = vst [vmem:[#allocation3 + $0x129] sm:$0xff] %v2052_v6  ;;  %v2051_v16 = vmax.f32 %v1981_v17, 0.0  ;;  %v1996_v54 = vadd.f32 %v4142_v18, %v5835_v47  ;;  %2993 = vmatprep.mubr.f32.mxu0 %v5984_v61  ;;  %v6060_v6 = vld [vmem:[#allocation3 + $0xb0] sm:$0xff]  ;;  %v1801_v17 = vadd.f32 %v5860_v41, %v1576_v13  ;;  %3357 = vmatpush1.msra.mxu0 %v2608_v32 }
 0x28a   : > { %v1990_v52 = vpop.f32.mrf.mxu0  ;;  %v2286_v22 = vrot.slane %v6060_v6, 1  ;;  %3358 = vmatprep.subr.mxu0 %v6080_v30  ;;  %v2398_v32 = vrot.slane %v6060_v6, 2 }
 0x28b   : > { %2138 = vst [vmem:[#allocation3 + $0x121] sm:$0xff] %v2051_v16  ;;  %v2054_v36 = vmax.f32 %v1996_v54, 0.0  ;;  %v1991_v47 = vadd.f32 %v1990_v52, %v5831_v40  ;;  %2774 = vmatmul.mubr.f32.gmra.mxu1 %v5982_v51  ;;  %v2392_v16 = vrot.slane %v6018_v58, 2  ;;  %v2393_v54 = vrot.slane %v6020_v62, 2 }
 0x28c   : > { %v4145_v12 = vpop.f32.mrf.mxu0  ;;  %2994 = vmatmul.mubr.f32.gmra.mxu0 %v6024_v7  ;;  %2778 = vmatprep.mubr.f32.mxu1 %v6032_v23  ;;  %v6073_v52 = vsel %vm493_vm0, %v2281_v55, %v2283_v42  ;;  %v2174_v42 = vld [vmem:[#allocation3 + $0xd0] sm:$0x3] }
 0x28d   : > { %2141 = vst [vmem:[#allocation3 + $0x141] sm:$0xff] %v2054_v36  ;;  %v2053_v40 = vmax.f32 %v1991_v47, 0.0  ;;  %v2006_v15 = vadd.f32 %v4145_v12, %v5843_v44  ;;  %2998 = vmatprep.mubr.f32.mxu0 %v6018_v58  ;;  %v2607_v36 = vld [vmem:[#allocation9 + $0x318] sm:$0xff]  ;;  %v6085_v55 = vsel %vm606_vm1, %v2392_v16, %v2393_v54  ;;  %v2400_v16 = vrot.slane %v2171_v3, 2 }
 0x28e   : > { %v2000_v10 = vpop.f32.mrf.mxu0  ;;  %3359 = vmatpush1.msra.mxu0 %v2607_v36 }
 0x28f   : > { %2140 = vst [vmem:[#allocation3 + $0x139] sm:$0xff] %v2053_v40  ;;  %v2056_v9 = vmax.f32 %v2006_v15, 0.0  ;;  %v2001_v27 = vadd.f32 %v2000_v10, %v5839_v43  ;;  %2779 = vmatmul.mubr.f32.gmra.mxu1 %v5984_v61  ;;  %v6089_v40 = vsel %vm493_vm0, %v2285_v46, %v2286_v22  ;;  %v2606_v15 = vld [vmem:[#allocation9 + $0x310] sm:$0xff]  ;;  %3360 = vmatprep.subr.mxu0 %v6080_v30  ;;  %v2293_v46 = vrot.slane %v2174_v42, 1 }
 0x290   : > { %v4148_v44 = vpop.f32.mrf.mxu0  ;;  %2999 = vmatmul.mubr.f32.gmra.mxu0 %v6045_v39  ;;  %2783 = vmatprep.mubr.f32.mxu1 %v6051_v63  ;;  %v6095_v10 = vld [vmem:[#allocation3 + $0xc0] sm:$0xff]  ;;  %v6133_v36 = vsel %vm606_vm1, %v2398_v32, %v2400_v16 }
 0x291   : > { %2143 = vst [vmem:[#allocation3 + $0x159] sm:$0xff] %v2056_v9  ;;  %v2055_v20 = vmax.f32 %v2001_v27, 0.0  ;;  %v2016_v43 = vadd.f32 %v4148_v44, %v5851_v4  ;;  %3003 = vmatprep.mubr.f32.mxu0 %v6020_v62  ;;  %v6097_v9 = vld [vmem:[#allocation3 + $0xc8] sm:$0xff]  ;;  %v2288_v27 = vrot.slane %v2171_v3, 1  ;;  %3361 = vmatpush1.msra.mxu0 %v2606_v15 }
 0x292   : > { %v2010_v18 = vpop.f32.mrf.mxu0  ;;  %3362 = vmatprep.subr.mxu0 %v6080_v30  ;;  %v2635_v3 = vld [vmem:[#allocation9 + $0x3f8] sm:$0xff] }
 0x293   : > { %2142 = vst [vmem:[#allocation3 + $0x151] sm:$0xff] %v2055_v20  ;;  %v2058_v4 = vmax.f32 %v2016_v43, 0.0  ;;  %v2011_v24 = vadd.f32 %v2010_v18, %v5847_v26  ;;  %2784 = vmatmul.mubr.f32.gmra.mxu1 %v6018_v58  ;;  %v2290_v20 = vrot.slane %v6095_v10, 1  ;;  %v2291_v43 = vrot.slane %v6097_v9, 1 }
 0x294   : > { %v4151_v41 = vpop.f32.mrf.mxu0  ;;  %3004 = vmatmul.mubr.f32.gmra.mxu0 %v6065_v21  ;;  %2788 = vmatprep.mubr.f32.mxu1 %v6073_v52  ;;  %v6116_v18 = vsel %vm606_vm1, %v2397_v25, %v2398_v32  ;;  %v2634_v32 = vld [vmem:[#allocation9 + $0x3f0] sm:$0xff] }
 0x295   : > { %2145 = vst [vmem:[#allocation3 + $0x171] sm:$0xff] %v2058_v4  ;;  %v2057_v26 = vmax.f32 %v2011_v24, 0.0  ;;  %v2026_v47 = vadd.f32 %v4151_v41, %v1801_v17  ;;  %3008 = vmatprep.mubr.f32.mxu0 %v6058_v59  ;;  %v2605_v17 = vld [vmem:[#allocation9 + $0x308] sm:$0xff]  ;;  %v6120_v4 = vsel %vm493_vm0, %v2290_v20, %v2291_v43  ;;  %v2604_v24 = vld [vmem:[#allocation9 + $0x300] sm:$0xff]  ;;  %v6127_v41 = vld [vmem:[#allocation3 + $0xe0] sm:$0xff] }
 0x296   : > { %v2020_v49 = vpop.f32.mrf.mxu0  ;;  %3363 = vmatpush1.msra.mxu0 %v2605_v17  ;;  %7063 = vst [vmem:[#allocation16_spill] sm:$0xff] %v6127_v41  ;;  %v6159_v17 = vld [vmem:[#allocation3 + $0xf0] sm:$0xff] }
 0x297   : > { %2144 = vst [vmem:[#allocation3 + $0x169] sm:$0xff] %v2057_v26  ;;  %v2060_v12 = vmax.f32 %v2026_v47, 0.0  ;;  %v2021_v14 = vadd.f32 %v2020_v49, %v5855_v45  ;;  %2789 = vmatmul.mubr.f32.gmra.mxu1 %v6020_v62  ;;  %v2395_v45 = vrot.slane %v6047_v31, 2  ;;  %v6107_v31 = vsel %vm493_vm0, %v2286_v22, %v2288_v27  ;;  %3364 = vmatprep.subr.mxu0 %v6080_v30  ;;  %v2177_v27 = vld [vmem:[#allocation3 + $0xe8] sm:$0x3] }
 0x298   : > { %3009 = vmatmul.mubr.f32.gmra.mxu0 %v6085_v55  ;;  %2793 = vmatprep.mubr.f32.mxu1 %v6089_v40  ;;  %v2402_v26 = vrot.slane %v6095_v10, 2  ;;  %v2403_v47 = vrot.slane %v6097_v9, 2  ;;  %v6139_v49 = vsel %vm493_vm0, %v2291_v43, %v2293_v46  ;;  %v2405_v43 = vrot.slane %v2174_v42, 2  ;;  %7066 = vst [vmem:[#allocation20_spill] sm:$0xff] %v6159_v17 }
 0x299   : > { %2147 = vst [vmem:[#allocation3 + $0x189] sm:$0xff] %v2060_v12  ;;  %v2059_v13 = vmax.f32 %v2021_v14, 0.0  ;;  %3013 = vmatprep.mubr.f32.mxu0 %v6060_v6  ;;  %v6101_v44 = vsel %vm606_vm1, %v2393_v54, %v2395_v45  ;;  %v6125_v54 = vld [vmem:[#allocation3 + $0xd8] sm:$0xff]  ;;  %3365 = vmatpush1.msra.mxu0 %v2604_v24  ;;  %v2296_v14 = vrot.slane %v6127_v41, 1  ;;  %v2298_v16 = vrot.slane %v2177_v27, 1 }
 0x29a   : > { %v2295_v12 = vrot.slane %v6125_v54, 1  ;;  %3366 = vmatprep.subr.mxu0 %v6080_v30  ;;  %v6150_v45 = vsel %vm606_vm1, %v2402_v26, %v2403_v47  ;;  %v6161_v24 = vld [vmem:[#allocation3 + $0xf8] sm:$0xff]  ;;  %v6165_v46 = vsel %vm606_vm1, %v2403_v47, %v2405_v43  ;;  %v2407_v26 = vrot.slane %v6125_v54, 2  ;;  %v2632_v43 = vld [vmem:[#allocation9 + $0x3e0] sm:$0xff] }
 0x29b   : > { %2146 = vst [vmem:[#allocation3 + $0x181] sm:$0xff] %v2059_v13  ;;  %2794 = vmatmul.mubr.f32.gmra.mxu1 %v6058_v59  ;;  %3367 = vmatpush2.msra.mxu0 %v2635_v3  ;;  %7067 = vst [vmem:[#allocation21_spill] sm:$0xff] %v6161_v24  ;;  %v6171_v3 = vsel %vm493_vm0, %v2296_v14, %v2298_v16  ;;  %v2300_v42 = vrot.slane %v6159_v17, 1  ;;  %v2410_v16 = vrot.slane %v2177_v27, 2 }
 0x29c   : > { %3014 = vmatmul.mubr.f32.gmra.mxu0 %v6101_v44  ;;  %2798 = vmatprep.mubr.f32.mxu1 %v6107_v31  ;;  %v6154_v25 = vsel %vm493_vm0, %v2295_v12, %v2296_v14  ;;  %v2408_v12 = vrot.slane %v6127_v41, 2  ;;  %7068 = vst [vmem:[#allocation14_spill] sm:$0xff] %v6171_v3 }
 0x29d   : > { %3018 = vmatprep.mubr.f32.mxu0 %v6095_v10  ;;  %v6130_v22 = vpop.f32.mrf.mxu1  ;;  %3368 = vmatprep.subr.mxu0 %v6080_v30 }
 0x29e   : > { %7064 = vst [vmem:[#allocation17_spill] sm:$0xff] %v6130_v22  ;;  %3369 = vmatpush2.msra.mxu0 %v2634_v32  ;;  %v6180_v47 = vsel %vm606_vm1, %v2407_v26, %v2408_v12  ;;  %v2180_v32 = vld [vmem:[#allocation3 + $0x100] sm:$0x3]  ;;  %v6191_v22 = vld [vmem:[#allocation3 + $0x110] sm:$0xff] }
 0x29f   : > { %2799 = vmatmul.mubr.f32.gmra.mxu1 %v6060_v6  ;;  %v2727_v15 = vpop.f32.mrf.mxu1  ;;  %3370 = vmatprep.subr.mxu0 %v6080_v30  ;;  %7069 = vst [vmem:[#allocation22_spill] sm:$0xff] %v6180_v47  ;;  %7072 = vst [vmem:[#allocation26_spill] sm:$0xff] %v6191_v22  ;;  %v2303_v26 = vrot.slane %v2180_v32, 1 }
 0x2a0   : > { %3019 = vmatmul.mubr.f32.gmra.mxu0 %v6116_v18  ;;  %2803 = vmatprep.mubr.f32.mxu1 %v6120_v4  ;;  %v2301_v15 = vrot.slane %v6161_v24, 1 }
 0x2a1   : > { %3023 = vmatprep.mubr.f32.mxu0 %v6097_v9 }
 0x2a2   : > { %v6184_v14 = vsel %vm493_vm0, %v2300_v42, %v2301_v15  ;;  %v2412_v42 = vrot.slane %v6159_v17, 2 }
 0x2a3   : > { %2804 = vmatmul.mubr.f32.gmra.mxu1 %v6095_v10  ;;  %v6147_v13 = vpop.f32.mrf.mxu1  ;;  %7070 = vst [vmem:[#allocation23_spill] sm:$0xff] %v6184_v14 }
 0x2a4   : > { %3024 = vmatmul.mubr.f32.gmra.mxu0 %v6133_v36  ;;  %2808 = vmatprep.mubr.f32.mxu1 %v6139_v49  ;;  %7065 = vst [vmem:[#allocation15_spill] sm:$0xff] %v6147_v13  ;;  %v6189_v13 = vld [vmem:[#allocation3 + $0x108] sm:$0xff] }
 0x2a5   : > { %3028 = vmatprep.mubr.f32.mxu0 %v6125_v54  ;;  %v2732_v20 = vpop.f32.mrf.mxu1  ;;  %7071 = vst [vmem:[#allocation19_spill] sm:$0xff] %v6189_v13  ;;  %v2305_v27 = vrot.slane %v6189_v13, 1 }
 0x2a6   : > { %v2633_v20 = vld [vmem:[#allocation9 + $0x3e8] sm:$0xff] }
 0x2a7   : > { %2809 = vmatmul.mubr.f32.gmra.mxu1 %v6097_v9  ;;  %3371 = vmatpush2.msra.mxu0 %v2633_v20  ;;  %v6195_v20 = vsel %vm606_vm1, %v2408_v12, %v2410_v16  ;;  %v2630_v16 = vld [vmem:[#allocation9 + $0x3d0] sm:$0xff] }
 0x2a8   : > { %3029 = vmatmul.mubr.f32.gmra.mxu0 %v6150_v45  ;;  %2813 = vmatprep.mubr.f32.mxu1 %v6154_v25  ;;  %7073 = vst [vmem:[#allocation27_spill] sm:$0xff] %v6195_v20 }
 0x2a9   : > { %3033 = vmatprep.mubr.f32.mxu0 %v6127_v41  ;;  %3372 = vmatprep.subr.mxu0 %v6080_v30 }
 0x2aa   : > { %3373 = vmatpush2.msra.mxu0 %v2632_v43  ;;  %v2183_v43 = vld [vmem:[#allocation3 + $0x118] sm:$0x3] }
 0x2ab   : > { %2814 = vmatmul.mubr.f32.gmra.mxu1 %v6125_v54  ;;  %3374 = vmatprep.subr.mxu0 %v6080_v30 }
 0x2ac   : > { %3034 = vmatmul.mubr.f32.gmra.mxu0 %v6165_v46  ;;  %2818 = vmatprep.mubr.f32.mxu1 %v6171_v3  ;;  %v2306_v3 = vrot.slane %v6191_v22, 1 }
 0x2ad   : > { %3038 = vmatprep.mubr.f32.mxu0 %v6159_v17 }
 0x2af   : > { %2819 = vmatmul.mubr.f32.gmra.mxu1 %v6127_v41  ;;  %v2413_v41 = vrot.slane %v6161_v24, 2 }
 0x2b0   : > { %3039 = vmatmul.mubr.f32.gmra.mxu0 %v6180_v47  ;;  %2823 = vmatprep.mubr.f32.mxu1 %v6184_v14  ;;  %v6201_v14 = vsel %vm493_vm0, %v2301_v15, %v2303_v26  ;;  %v2631_v47 = vld [vmem:[#allocation9 + $0x3d8] sm:$0xff]  ;;  %v6214_v15 = vsel %vm493_vm0, %v2305_v27, %v2306_v3  ;;  %v2415_v26 = vrot.slane %v2180_v32, 2  ;;  %v2417_v27 = vrot.slane %v6189_v13, 2 }
 0x2b1   : > { %3043 = vmatprep.mubr.f32.mxu0 %v6161_v24  ;;  %7074 = vst [vmem:[#allocation18_spill] sm:$0xff] %v6201_v14  ;;  %v6210_v12 = vsel %vm606_vm1, %v2412_v42, %v2413_v41  ;;  %3375 = vmatpush2.msra.mxu0 %v2631_v47  ;;  %7076 = vst [vmem:[#allocation29_spill] sm:$0xff] %v6214_v15  ;;  %v2308_v42 = vrot.slane %v2183_v43, 1 }
 0x2b2   : > { %7075 = vst [vmem:[#allocation28_spill] sm:$0xff] %v6210_v12  ;;  %3376 = vmatprep.subr.mxu0 %v6080_v30  ;;  %v6225_v47 = vsel %vm606_vm1, %v2413_v41, %v2415_v26  ;;  %v2628_v26 = vld [vmem:[#allocation9 + $0x3c0] sm:$0xff] }
 0x2b3   : > { %2824 = vmatmul.mubr.f32.gmra.mxu1 %v6159_v17  ;;  %v6221_v17 = vld [vmem:[#allocation3 + $0x128] sm:$0xff]  ;;  %7079 = vst [vmem:[#allocation33_spill] sm:$0xff] %v6225_v47  ;;  %3377 = vmatpush2.msra.mxu0 %v2630_v16  ;;  %v2186_v16 = vld [vmem:[#allocation3 + $0x130] sm:$0x3] }
 0x2b4   : > { %3044 = vmatmul.mubr.f32.gmra.mxu0 %v6195_v20  ;;  %2828 = vmatprep.mubr.f32.mxu1 %v6201_v14  ;;  %v6219_v14 = vld [vmem:[#allocation3 + $0x120] sm:$0xff]  ;;  %7078 = vst [vmem:[#allocation32_spill] sm:$0xff] %v6221_v17  ;;  %v2629_v20 = vld [vmem:[#allocation9 + $0x3c8] sm:$0xff] }
 0x2b5   : > { %3048 = vmatprep.mubr.f32.mxu0 %v6189_v13  ;;  %7077 = vst [vmem:[#allocation25_spill] sm:$0xff] %v6219_v14  ;;  %v2310_v32 = vrot.slane %v6219_v14, 1  ;;  %3378 = vmatprep.subr.mxu0 %v6080_v30 }
 0x2b6   : > { %3379 = vmatpush2.msra.mxu0 %v2629_v20 }
 0x2b7   : > { %2829 = vmatmul.mubr.f32.gmra.mxu1 %v6161_v24  ;;  %v2418_v24 = vrot.slane %v6191_v22, 2  ;;  %3380 = vmatprep.subr.mxu0 %v6080_v30 }
 0x2b8   : > { %3049 = vmatmul.mubr.f32.gmra.mxu0 %v6210_v12  ;;  %2833 = vmatprep.mubr.f32.mxu1 %v6214_v15  ;;  %v6231_v15 = vsel %vm493_vm0, %v2306_v3, %v2308_v42  ;;  %v2311_v12 = vrot.slane %v6221_v17, 1  ;;  %v2420_v42 = vrot.slane %v2183_v43, 2 }
 0x2b9   : > { %3053 = vmatprep.mubr.f32.mxu0 %v6191_v22  ;;  %7080 = vst [vmem:[#allocation24_spill] sm:$0xff] %v6231_v15  ;;  %v6240_v41 = vsel %vm606_vm1, %v2417_v27, %v2418_v24  ;;  %v2313_v27 = vrot.slane %v2186_v16, 1  ;;  %3381 = vmatpush2.msra.mxu0 %v2628_v26  ;;  %v2189_v26 = vld [vmem:[#allocation3 + $0x148] sm:$0x3] }
 0x2ba   : > { %7081 = vst [vmem:[#allocation34_spill] sm:$0xff] %v6240_v41  ;;  %v6244_v3 = vsel %vm493_vm0, %v2310_v32, %v2311_v12  ;;  %v6255_v20 = vsel %vm606_vm1, %v2418_v24, %v2420_v42  ;;  %v2422_v32 = vrot.slane %v6219_v14, 2  ;;  %3382 = vmatprep.subr.mxu0 %v6080_v30  ;;  %v2626_v42 = vld [vmem:[#allocation9 + $0x3b0] sm:$0xff] }
 0x2bb   : > { %2834 = vmatmul.mubr.f32.gmra.mxu1 %v6189_v13  ;;  %7082 = vst [vmem:[#allocation35_spill] sm:$0xff] %v6244_v3  ;;  %v6251_v13 = vld [vmem:[#allocation3 + $0x140] sm:$0xff]  ;;  %7085 = vst [vmem:[#allocation38_spill] sm:$0xff] %v6255_v20 }
 0x2bc   : > { %3054 = vmatmul.mubr.f32.gmra.mxu0 %v6225_v47  ;;  %2838 = vmatprep.mubr.f32.mxu1 %v6231_v15  ;;  %v6249_v15 = vld [vmem:[#allocation3 + $0x138] sm:$0xff]  ;;  %7084 = vst [vmem:[#allocation37_spill] sm:$0xff] %v6251_v13  ;;  %v2627_v47 = vld [vmem:[#allocation9 + $0x3b8] sm:$0xff] }
 0x2bd   : > { %3058 = vmatprep.mubr.f32.mxu0 %v6219_v14  ;;  %7083 = vst [vmem:[#allocation31_spill] sm:$0xff] %v6249_v15  ;;  %v2315_v43 = vrot.slane %v6249_v15, 1  ;;  %3383 = vmatpush2.msra.mxu0 %v2627_v47 }
 0x2be   : > { %3384 = vmatprep.subr.mxu0 %v6080_v30 }
 0x2bf   : > { %2839 = vmatmul.mubr.f32.gmra.mxu1 %v6191_v22  ;;  %v2423_v22 = vrot.slane %v6221_v17, 2  ;;  %3385 = vmatpush2.msra.mxu0 %v2626_v42  ;;  %v2192_v42 = vld [vmem:[#allocation3 + $0x160] sm:$0x3] }
 0x2c0   : > { %3059 = vmatmul.mubr.f32.gmra.mxu0 %v6240_v41  ;;  %2843 = vmatprep.mubr.f32.mxu1 %v6244_v3  ;;  %v6261_v3 = vsel %vm493_vm0, %v2311_v12, %v2313_v27  ;;  %v2316_v41 = vrot.slane %v6251_v13, 1  ;;  %v2425_v27 = vrot.slane %v2186_v16, 2 }
 0x2c1   : > { %3063 = vmatprep.mubr.f32.mxu0 %v6221_v17  ;;  %7086 = vst [vmem:[#allocation30_spill] sm:$0xff] %v6261_v3  ;;  %v6270_v24 = vsel %vm606_vm1, %v2422_v32, %v2423_v22  ;;  %v2318_v32 = vrot.slane %v2189_v26, 1  ;;  %3386 = vmatprep.subr.mxu0 %v6080_v30 }
 0x2c2   : > { %7087 = vst [vmem:[#allocation39_spill] sm:$0xff] %v6270_v24  ;;  %v6274_v12 = vsel %vm493_vm0, %v2315_v43, %v2316_v41  ;;  %v6285_v47 = vsel %vm606_vm1, %v2423_v22, %v2425_v27  ;;  %v2427_v43 = vrot.slane %v6249_v15, 2  ;;  %v2624_v27 = vld [vmem:[#allocation9 + $0x3a0] sm:$0xff] }
 0x2c3   : > { %2844 = vmatmul.mubr.f32.gmra.mxu1 %v6219_v14  ;;  %7088 = vst [vmem:[#allocation40_spill] sm:$0xff] %v6274_v12  ;;  %v6281_v14 = vld [vmem:[#allocation3 + $0x158] sm:$0xff]  ;;  %7090 = vst [vmem:[#allocation43_spill] sm:$0xff] %v6285_v47 }
 0x2c4   : > { %3064 = vmatmul.mubr.f32.gmra.mxu0 %v6255_v20  ;;  %2848 = vmatprep.mubr.f32.mxu1 %v6261_v3  ;;  %v6279_v3 = vld [vmem:[#allocation3 + $0x150] sm:$0xff]  ;;  %7089 = vst [vmem:[#allocation42_spill] sm:$0xff] %v6281_v14  ;;  %v2625_v20 = vld [vmem:[#allocation9 + $0x3a8] sm:$0xff] }
 0x2c5   : > { %3068 = vmatprep.mubr.f32.mxu0 %v6249_v15  ;;  %v2320_v16 = vrot.slane %v6279_v3, 1  ;;  %3387 = vmatpush2.msra.mxu0 %v2625_v20 }
 0x2c6   : > { %3388 = vmatprep.subr.mxu0 %v6080_v30 }
 0x2c7   : > { %2849 = vmatmul.mubr.f32.gmra.mxu1 %v6221_v17  ;;  %v2428_v17 = vrot.slane %v6251_v13, 2  ;;  %3389 = vmatpush2.msra.mxu0 %v2624_v27  ;;  %v2195_v27 = vld [vmem:[#allocation3 + $0x178] sm:$0x3] }
 0x2c8   : > { %3069 = vmatmul.mubr.f32.gmra.mxu0 %v6270_v24  ;;  %2853 = vmatprep.mubr.f32.mxu1 %v6274_v12  ;;  %v6291_v12 = vsel %vm493_vm0, %v2316_v41, %v2318_v32  ;;  %v2321_v24 = vrot.slane %v6281_v14, 1  ;;  %v2430_v32 = vrot.slane %v2189_v26, 2 }
 0x2c9   : > { %3073 = vmatprep.mubr.f32.mxu0 %v6251_v13  ;;  %7091 = vst [vmem:[#allocation36_spill] sm:$0xff] %v6291_v12  ;;  %v6300_v22 = vsel %vm606_vm1, %v2427_v43, %v2428_v17  ;;  %v2323_v43 = vrot.slane %v2192_v42, 1  ;;  %3390 = vmatprep.subr.mxu0 %v6080_v30 }
 0x2ca   : > { %7092 = vst [vmem:[#allocation44_spill] sm:$0xff] %v6300_v22  ;;  %v6304_v41 = vsel %vm493_vm0, %v2320_v16, %v2321_v24  ;;  %v6315_v20 = vsel %vm606_vm1, %v2428_v17, %v2430_v32  ;;  %v2432_v16 = vrot.slane %v6279_v3, 2  ;;  %v2622_v32 = vld [vmem:[#allocation9 + $0x390] sm:$0xff] }
 0x2cb   : > { %2854 = vmatmul.mubr.f32.gmra.mxu1 %v6249_v15  ;;  %7093 = vst [vmem:[#allocation45_spill] sm:$0xff] %v6304_v41  ;;  %v6311_v15 = vld [vmem:[#allocation3 + $0x170] sm:$0xff] }
 0x2cc   : > { %3074 = vmatmul.mubr.f32.gmra.mxu0 %v6285_v47  ;;  %2858 = vmatprep.mubr.f32.mxu1 %v6291_v12  ;;  %v6309_v12 = vld [vmem:[#allocation3 + $0x168] sm:$0xff] }
 0x2cd   : > { %3078 = vmatprep.mubr.f32.mxu0 %v6279_v3  ;;  %v2325_v26 = vrot.slane %v6309_v12, 1  ;;  %v2623_v47 = vld [vmem:[#allocation9 + $0x398] sm:$0xff] }
 0x2ce   : > { %3391 = vmatpush2.msra.mxu0 %v2623_v47  ;;  %v2437_v47 = vrot.slane %v6309_v12, 2 }
 0x2cf   : > { %2859 = vmatmul.mubr.f32.gmra.mxu1 %v6251_v13  ;;  %v2433_v13 = vrot.slane %v6281_v14, 2  ;;  %3392 = vmatprep.subr.mxu0 %v6080_v30 }
 0x2d0   : > { %3079 = vmatmul.mubr.f32.gmra.mxu0 %v6300_v22  ;;  %2863 = vmatprep.mubr.f32.mxu1 %v6304_v41  ;;  %v6321_v41 = vsel %vm493_vm0, %v2321_v24, %v2323_v43  ;;  %v2326_v22 = vrot.slane %v6311_v15, 1  ;;  %v2435_v43 = vrot.slane %v2192_v42, 2  ;;  %v2621_v42 = vld [vmem:[#allocation9 + $0x388] sm:$0xff] }
 0x2d1   : > { %3083 = vmatprep.mubr.f32.mxu0 %v6281_v14  ;;  %7094 = vst [vmem:[#allocation46_spill] sm:$0xff] %v6321_v41  ;;  %v6330_v17 = vsel %vm606_vm1, %v2432_v16, %v2433_v13  ;;  %3393 = vmatpush2.msra.mxu0 %v2622_v32  ;;  %v2440_v32 = vrot.slane %v2195_v27, 2 }
 0x2d2   : > { %v6334_v24 = vsel %vm493_vm0, %v2325_v26, %v2326_v22  ;;  %v6341_v16 = vsel %vm606_vm1, %v2433_v13, %v2435_v43  ;;  %3394 = vmatprep.subr.mxu0 %v6080_v30 }
 0x2d3   : > { %2864 = vmatmul.mubr.f32.gmra.mxu1 %v6279_v3  ;;  %7095 = vst [vmem:[#allocation41_spill] sm:$0xff] %v6334_v24  ;;  %3395 = vmatpush2.msra.mxu0 %v2621_v42  ;;  %v4309_v42 = vld [vmem:[#allocation9 + $0x478] sm:$0xff] }
 0x2d4   : > { %3084 = vmatmul.mubr.f32.gmra.mxu0 %v6315_v20  ;;  %2868 = vmatprep.mubr.f32.mxu1 %v6321_v41  ;;  %v2328_v41 = vrot.slane %v2195_v27, 1  ;;  %v4310_v27 = vld [vmem:[#allocation3 + $0x30] sm:$0xff] }
 0x2d5   : > { %3088 = vmatprep.mubr.f32.mxu0 %v6309_v12  ;;  %3396 = vmatprep.subr.mxu0 %v6080_v30 }
 0x2d6   : > { %v6347_v26 = vsel %vm493_vm0, %v2326_v22, %v2328_v41  ;;  %v6360_v22 = vld [vmem:[#allocation3 + $0x188] sm:$0xff]  ;;  %v2620_v41 = vld [vmem:[#allocation9 + $0x380] sm:$0xff] }
 0x2d7   : > { %2869 = vmatmul.mubr.f32.gmra.mxu1 %v6281_v14  ;;  %v2438_v14 = vrot.slane %v6311_v15, 2  ;;  %3397 = vmatpush2.msra.mxu0 %v2620_v41  ;;  %v7106_v41 = vld [vmem:[#allocation21_spill] sm:$0xff] }
 0x2d8   : > { %3089 = vmatmul.mubr.f32.gmra.mxu0 %v6330_v17  ;;  %2873 = vmatprep.mubr.f32.mxu1 %v6334_v24  ;;  %v6350_v24 = vld [vmem:[#allocation3 + $0x180] sm:$0xff] }
 0x2d9   : > { %3093 = vmatprep.mubr.f32.mxu0 %v6311_v15  ;;  %v6356_v13 = vsel %vm606_vm1, %v2437_v47, %v2438_v14  ;;  %v6366_v43 = vsel %vm606_vm1, %v2438_v14, %v2440_v32  ;;  %v2650_v47 = vld [vmem:[#allocation9 + $0x470] sm:$0xff] }
 0x2db   : > { %2874 = vmatmul.mubr.f32.gmra.mxu1 %v6309_v12 }
 0x2dc   : > { %3094 = vmatmul.mubr.f32.gmra.mxu0 %v6341_v16  ;;  %2878 = vmatprep.mubr.f32.mxu1 %v6347_v26 }
 0x2dd   : > { %3098 = vmatprep.mubr.f32.mxu0 %v6350_v24 }
 0x2df   : > { %2879 = vmatmul.mubr.f32.gmra.mxu1 %v6311_v15 }
 0x2e0   : > { %3099 = vmatmul.mubr.f32.gmra.mxu0 %v6356_v13  ;;  %3173 = vmatprep.mubr.f32.mxu1 %v5904_v34  ;;  %v2649_v34 = vld [vmem:[#allocation9 + $0x468] sm:$0xff] }
 0x2e1   : > { %3103 = vmatprep.mubr.f32.mxu0 %v6360_v22 }
 0x2e3   : > { %3174 = vmatmul.mubr.f32.vlgmr.msra.gmra.mxu1 %v5883_v28  ;;  %v2648_v28 = vld [vmem:[#allocation9 + $0x460] sm:$0xff] }
 0x2e4   : > { %3104 = vmatmul.mubr.f32.gmra.mxu0 %v6366_v43  ;;  %3178 = vmatprep.mubr.f32.mxu1 %v5919_v2  ;;  %v4311_v2 = vld [vmem:[#allocation3 + $0x38] sm:$0xff] }
 0x2e5   : > { %4153 = vmatpush3.msra.mxu1 %v4309_v42  ;;  %3398 = vmatprep.mubr.f32.mxu0 %v5908_v53  ;;  %v7108_v42 = vld [vmem:[#allocation29_spill] sm:$0xff] }
 0x2e6   : > { %4154 = vmatprep.subr.mxu1 %v2650_v47 }
 0x2e7   : > { %4155 = vmatpush3.msra.mxu1 %v2650_v47  ;;  %v7107_v47 = vld [vmem:[#allocation33_spill] sm:$0xff] }
 0x2e8   : > { %3179 = vmatmul.mubr.f32.gmra.mxu1 %v5894_v35  ;;  %3399 = vmatmul.mubr.f32.vlgmr.msra.gmra.mxu0 %v4310_v27  ;;  %v2647_v35 = vld [vmem:[#allocation9 + $0x458] sm:$0xff] }
 0x2e9   : > { %3183 = vmatprep.mubr.f32.mxu1 %v5938_v8  ;;  %3403 = vmatprep.mubr.f32.mxu0 %v5927_v37 }
 0x2ea   : > { %4156 = vmatprep.subr.mxu1 %v2649_v34 }
 0x2eb   : > { %4157 = vmatpush3.msra.mxu1 %v2649_v34 }
 0x2ec   : > { %3184 = vmatmul.mubr.f32.gmra.mxu1 %v5908_v53  ;;  %3404 = vmatmul.mubr.f32.gmra.mxu0 %v4311_v2  ;;  %v2646_v53 = vld [vmem:[#allocation9 + $0x450] sm:$0xff] }
 0x2ed   : > { %3188 = vmatprep.mubr.f32.mxu1 %v5953_v33  ;;  %3408 = vmatprep.mubr.f32.mxu0 %v5942_v19 }
 0x2ee   : > { %4158 = vmatprep.subr.mxu1 %v2648_v28 }
 0x2ef   : > { %4159 = vmatpush3.msra.mxu1 %v2648_v28 }
 0x2f0   : > { %3189 = vmatmul.mubr.f32.gmra.mxu1 %v5927_v37  ;;  %3409 = vmatmul.mubr.f32.gmra.mxu0 %v5914_v60  ;;  %v2645_v37 = vld [vmem:[#allocation9 + $0x448] sm:$0xff]  ;;  %v2644_v60 = vld [vmem:[#allocation9 + $0x440] sm:$0xff] }
 0x2f1   : > { %3193 = vmatprep.mubr.f32.mxu1 %v5972_v0  ;;  %3413 = vmatprep.mubr.f32.mxu0 %v5961_v50 }
 0x2f2   : > { %4160 = vmatprep.subr.mxu1 %v2647_v35 }
 0x2f3   : > { %4161 = vmatpush3.msra.mxu1 %v2647_v35 }
 0x2f4   : > { %3194 = vmatmul.mubr.f32.gmra.mxu1 %v5942_v19  ;;  %3414 = vmatmul.mubr.f32.gmra.mxu0 %v5916_v5  ;;  %v2643_v5 = vld [vmem:[#allocation9 + $0x438] sm:$0xff]  ;;  %v2642_v19 = vld [vmem:[#allocation9 + $0x430] sm:$0xff] }
 0x2f5   : > { %3198 = vmatprep.mubr.f32.mxu1 %v5987_v1  ;;  %3418 = vmatprep.mubr.f32.mxu0 %v5976_v38 }
 0x2f6   : > { %4162 = vmatprep.subr.mxu1 %v2646_v53 }
 0x2f7   : > { %4163 = vmatpush3.msra.mxu1 %v2646_v53  ;;  %v7109_v53 = vld [vmem:[#allocation19_spill] sm:$0xff] }
 0x2f8   : > { %3199 = vmatmul.mubr.f32.gmra.mxu1 %v5961_v50  ;;  %3419 = vmatmul.mubr.f32.gmra.mxu0 %v5948_v29  ;;  %v2641_v29 = vld [vmem:[#allocation9 + $0x428] sm:$0xff]  ;;  %v2639_v50 = vld [vmem:[#allocation9 + $0x418] sm:$0xff] }
 0x2f9   : > { %3203 = vmatprep.mubr.f32.mxu1 %v6006_v57  ;;  %3423 = vmatprep.mubr.f32.mxu0 %v5995_v56 }
 0x2fa   : > { %4164 = vmatprep.subr.mxu1 %v2645_v37 }
 0x2fb   : > { %4165 = vmatpush3.msra.mxu1 %v2645_v37 }
 0x2fc   : > { %3204 = vmatmul.mubr.f32.gmra.mxu1 %v5976_v38  ;;  %3424 = vmatmul.mubr.f32.gmra.mxu0 %v5950_v48  ;;  %v2640_v48 = vld [vmem:[#allocation9 + $0x420] sm:$0xff]  ;;  %v2638_v38 = vld [vmem:[#allocation9 + $0x410] sm:$0xff] }
 0x2fd   : > { %3208 = vmatprep.mubr.f32.mxu1 %v6024_v7  ;;  %3428 = vmatprep.mubr.f32.mxu0 %v6012_v11 }
 0x2fe   : > { %4166 = vmatprep.subr.mxu1 %v2644_v60 }
 0x2ff   : > { %4167 = vmatpush3.msra.mxu1 %v2644_v60  ;;  %v7110_v60 = vld [vmem:[#allocation34_spill] sm:$0xff] }
 0x300   : > { %3209 = vmatmul.mubr.f32.gmra.mxu1 %v5995_v56  ;;  %3429 = vmatmul.mubr.f32.gmra.mxu0 %v5982_v51  ;;  %v2637_v51 = vld [vmem:[#allocation9 + $0x408] sm:$0xff]  ;;  %v7096_v56 = vld [vmem:[#allocation22_spill] sm:$0xff] }
 0x301   : > { %3213 = vmatprep.mubr.f32.mxu1 %v6045_v39  ;;  %3433 = vmatprep.mubr.f32.mxu0 %v6032_v23 }
 0x302   : > { %4168 = vmatprep.subr.mxu1 %v2643_v5 }
 0x303   : > { %4169 = vmatpush3.msra.mxu1 %v2643_v5  ;;  %v7111_v5 = vld [vmem:[#allocation24_spill] sm:$0xff] }
 0x304   : > { %3214 = vmatmul.mubr.f32.gmra.mxu1 %v6012_v11  ;;  %3434 = vmatmul.mubr.f32.gmra.mxu0 %v5984_v61  ;;  %v2636_v61 = vld [vmem:[#allocation9 + $0x400] sm:$0xff] }
 0x305   : > { %3218 = vmatprep.mubr.f32.mxu1 %v6065_v21  ;;  %3438 = vmatprep.mubr.f32.mxu0 %v6051_v63  ;;  %v7097_v11 = vld [vmem:[#allocation14_spill] sm:$0xff] }
 0x306   : > { %4170 = vmatprep.subr.mxu1 %v2642_v19 }
 0x307   : > { %4171 = vmatpush3.msra.mxu1 %v2642_v19 }
 0x308   : > { %3219 = vmatmul.mubr.f32.gmra.mxu1 %v6032_v23  ;;  %3439 = vmatmul.mubr.f32.gmra.mxu0 %v6018_v58  ;;  %v6433_v58 = vld [vmem:[%s6867_s4] ss:$0 sm:$0xff]  ;;  %v7099_v23 = vld [vmem:[#allocation27_spill] sm:$0xff] }
 0x309   : > { %3223 = vmatprep.mubr.f32.mxu1 %v6085_v55  ;;  %3443 = vmatprep.mubr.f32.mxu0 %v6073_v52 }
 0x30a   : > { %4172 = vmatprep.subr.mxu1 %v2641_v29 }
 0x30b   : > { %4173 = vmatpush3.msra.mxu1 %v2641_v29 }
 0x30c   : > { %3224 = vmatmul.mubr.f32.gmra.mxu1 %v6051_v63  ;;  %3444 = vmatmul.mubr.f32.gmra.mxu0 %v6020_v62  ;;  %v7098_v62 = vld [vmem:[#allocation16_spill] sm:$0xff]  ;;  %v7100_v63 = vld [vmem:[#allocation23_spill] sm:$0xff] }
 0x30d   : > { %3228 = vmatprep.mubr.f32.mxu1 %v6101_v44  ;;  %3448 = vmatprep.mubr.f32.mxu0 %v6089_v40 }
 0x30e   : > { %4174 = vmatprep.subr.mxu1 %v2640_v48 }
 0x30f   : > { %4175 = vmatpush3.msra.mxu1 %v2640_v48 }
 0x310   : > { %3229 = vmatmul.mubr.f32.gmra.mxu1 %v6073_v52  ;;  %3449 = vmatmul.mubr.f32.gmra.mxu0 %v6058_v59  ;;  %v7101_v59 = vld [vmem:[#allocation17_spill] sm:$0xff] }
 0x311   : > { %3233 = vmatprep.mubr.f32.mxu1 %v6116_v18  ;;  %3453 = vmatprep.mubr.f32.mxu0 %v6107_v31 }
 0x312   : > { %4176 = vmatprep.subr.mxu1 %v2639_v50 }
 0x313   : > { %4177 = vmatpush3.msra.mxu1 %v2639_v50 }
 0x314   : > { %3234 = vmatmul.mubr.f32.gmra.mxu1 %v6089_v40  ;;  %3454 = vmatmul.mubr.f32.gmra.mxu0 %v6060_v6  ;;  %v2726_v6 = vadd.f32 %v6433_v58, %v7101_v59  ;;  %v7102_v40 = vld [vmem:[#allocation20_spill] sm:$0xff] }
 0x315   : > { %3238 = vmatprep.mubr.f32.mxu1 %v6133_v36  ;;  %3458 = vmatprep.mubr.f32.mxu0 %v6120_v4 }
 0x316   : > { %4178 = vmatprep.subr.mxu1 %v2638_v38 }
 0x317   : > { %4179 = vmatpush3.msra.mxu1 %v2638_v38 }
 0x318   : > { %3239 = vmatmul.mubr.f32.gmra.mxu1 %v6107_v31  ;;  %3459 = vmatmul.mubr.f32.gmra.mxu0 %v6095_v10  ;;  %v7104_v31 = vld [vmem:[#allocation18_spill] sm:$0xff] }
 0x319   : > { %3243 = vmatprep.mubr.f32.mxu1 %v6150_v45  ;;  %3463 = vmatprep.mubr.f32.mxu0 %v6139_v49 }
 0x31a   : > { %4180 = vmatprep.subr.mxu1 %v2637_v51 }
 0x31b   : > { %4181 = vmatpush3.msra.mxu1 %v2637_v51  ;;  %v7112_v51 = vld [vmem:[#allocation26_spill] sm:$0xff] }
 0x31c   : > { %3244 = vmatmul.mubr.f32.gmra.mxu1 %v6120_v4  ;;  %3464 = vmatmul.mubr.f32.gmra.mxu0 %v6097_v9  ;;  %v7103_v9 = vld [vmem:[#allocation28_spill] sm:$0xff] }
 0x31d   : > { %3248 = vmatprep.mubr.f32.mxu1 %v6165_v46  ;;  %3468 = vmatprep.mubr.f32.mxu0 %v6154_v25 }
 0x31e   : > { %4182 = vmatprep.subr.mxu1 %v2636_v61 }
 0x31f   : > { %4183 = vmatpush3.msra.mxu1 %v2636_v61 }
 0x320   : > { %3249 = vmatmul.mubr.f32.gmra.mxu1 %v6139_v49  ;;  %3469 = vmatmul.mubr.f32.gmra.mxu0 %v6125_v54  ;;  %v7105_v54 = vld [vmem:[#allocation15_spill] sm:$0xff] }
 0x321   : > { %3253 = vmatprep.mubr.f32.mxu1 %v7096_v56  ;;  %3473 = vmatprep.mubr.f32.mxu0 %v7097_v11  ;;  %v2731_v49 = vadd.f32 %v6433_v58, %v7105_v54  ;;  %v7116_v54 = vld [vmem:[#allocation39_spill] sm:$0xff] }
 0x324   : > { %3254 = vmatmul.mubr.f32.gmra.mxu1 %v6154_v25  ;;  %3474 = vmatmul.mubr.f32.gmra.mxu0 %v7098_v62  ;;  %v7114_v62 = vld [vmem:[#allocation35_spill] sm:$0xff] }
 0x325   : > { %3258 = vmatprep.mubr.f32.mxu1 %v7099_v23  ;;  %3478 = vmatprep.mubr.f32.mxu0 %v7100_v63 }
 0x328   : > { %3259 = vmatmul.mubr.f32.gmra.mxu1 %v7097_v11  ;;  %v2950_v52 = vpop.f32.mrf.mxu0  ;;  %3479 = vmatmul.mubr.f32.gmra.mxu0 %v7102_v40  ;;  %v7113_v11 = vld [vmem:[#allocation38_spill] sm:$0xff] }
 0x329   : > { %v6443_v10 = vadd.f32 %v2950_v52, %v2726_v6  ;;  %3263 = vmatprep.mubr.f32.mxu1 %v7103_v9  ;;  %3483 = vmatprep.mubr.f32.mxu0 %v7104_v31 }
 0x32a   : > { %v2952_v4 = vpop.f32.mrf.mxu0 }
 0x32b   : > { %v2735_v25 = vpop.f32.mrf.mxu1 }
 0x32c   : > { %3264 = vmatmul.mubr.f32.gmra.mxu1 %v7100_v63  ;;  %v2955_v14 = vpop.f32.mrf.mxu0  ;;  %3484 = vmatmul.mubr.f32.gmra.mxu0 %v7106_v41  ;;  %v2736_v28 = vadd.f32 %v6433_v58, %v2735_v25 }
 0x32d   : > { %v6451_v32 = vadd.f32 %v2955_v14, %v2731_v49  ;;  %3268 = vmatprep.mubr.f32.mxu1 %v7107_v47  ;;  %3488 = vmatprep.mubr.f32.mxu0 %v7108_v42  ;;  %v2737_v34 = vpop.f32.mrf.mxu1  ;;  %v7117_v49 = vld [vmem:[#allocation30_spill] sm:$0xff] }
 0x32e   : > { %v2957_v27 = vpop.f32.mrf.mxu0 }
 0x32f   : > { %v2740_v2 = vpop.f32.mrf.mxu1  ;;  %v7118_v27 = vld [vmem:[#allocation32_spill] sm:$0xff] }
 0x330   : > { %3269 = vmatmul.mubr.f32.gmra.mxu1 %v7104_v31  ;;  %v2960_v35 = vpop.f32.mrf.mxu0  ;;  %3489 = vmatmul.mubr.f32.gmra.mxu0 %v7109_v53  ;;  %v2741_v48 = vadd.f32 %v6433_v58, %v2740_v2  ;;  %v7115_v31 = vld [vmem:[#allocation25_spill] sm:$0xff]  ;;  %v7119_v2 = vld [vmem:[#allocation43_spill] sm:$0xff] }
 0x331   : > { %v6458_v37 = vadd.f32 %v2960_v35, %v2736_v28  ;;  %3273 = vmatprep.mubr.f32.mxu1 %v7110_v60  ;;  %3493 = vmatprep.mubr.f32.mxu0 %v7111_v5  ;;  %v2742_v19 = vpop.f32.mrf.mxu1  ;;  %v7120_v35 = vld [vmem:[#allocation40_spill] sm:$0xff] }
 0x332   : > { %v2962_v29 = vpop.f32.mrf.mxu0 }
 0x333   : > { %v2745_v50 = vpop.f32.mrf.mxu1 }
 0x334   : > { %3274 = vmatmul.mubr.f32.gmra.mxu1 %v7108_v42  ;;  %v2965_v38 = vpop.f32.mrf.mxu0  ;;  %3494 = vmatmul.mubr.f32.gmra.mxu0 %v7112_v51  ;;  %v2746_v6 = vadd.f32 %v6433_v58, %v2745_v50  ;;  %v7121_v50 = vld [vmem:[#allocation31_spill] sm:$0xff]  ;;  %v7122_v51 = vld [vmem:[#allocation44_spill] sm:$0xff] }
 0x335   : > { %v6465_v61 = vadd.f32 %v2965_v38, %v2741_v48  ;;  %3278 = vmatprep.mubr.f32.mxu1 %v7113_v11  ;;  %3498 = vmatprep.mubr.f32.mxu0 %v7114_v62  ;;  %v2747_v63 = vpop.f32.mrf.mxu1 }
 0x336   : > { %v2967_v59 = vpop.f32.mrf.mxu0 }
 0x337   : > { %v2750_v52 = vpop.f32.mrf.mxu1 }
 0x338   : > { %3279 = vmatmul.mubr.f32.gmra.mxu1 %v7111_v5  ;;  %v2970_v40 = vpop.f32.mrf.mxu0  ;;  %3499 = vmatmul.mubr.f32.gmra.mxu0 %v7115_v31  ;;  %v2751_v41 = vadd.f32 %v6433_v58, %v2750_v52  ;;  %v7124_v31 = vld [vmem:[#allocation37_spill] sm:$0xff] }
 0x339   : > { %v6472_v4 = vadd.f32 %v2970_v40, %v2746_v6  ;;  %3283 = vmatprep.mubr.f32.mxu1 %v7116_v54  ;;  %3503 = vmatprep.mubr.f32.mxu0 %v7117_v49  ;;  %v2752_v25 = vpop.f32.mrf.mxu1 }
 0x33a   : > { %v2972_v14 = vpop.f32.mrf.mxu0  ;;  %v7125_v25 = vld [vmem:[#allocation45_spill] sm:$0xff] }
 0x33b   : > { %v2755_v42 = vpop.f32.mrf.mxu1 }
 0x33c   : > { %3284 = vmatmul.mubr.f32.gmra.mxu1 %v7114_v62  ;;  %v2975_v34 = vpop.f32.mrf.mxu0  ;;  %3504 = vmatmul.mubr.f32.gmra.mxu0 %v7118_v27  ;;  %v2756_v19 = vadd.f32 %v6433_v58, %v2755_v42  ;;  %v7123_v62 = vld [vmem:[#allocation36_spill] sm:$0xff] }
 0x33d   : > { %v6479_v28 = vadd.f32 %v2975_v34, %v2751_v41  ;;  %3288 = vmatprep.mubr.f32.mxu1 %v7119_v2  ;;  %3508 = vmatprep.mubr.f32.mxu0 %v7120_v35  ;;  %v2757_v53 = vpop.f32.mrf.mxu1 }
 0x33e   : > { %v2977_v5 = vpop.f32.mrf.mxu0  ;;  %v7126_v53 = vld [vmem:[#allocation46_spill] sm:$0xff] }
 0x33f   : > { %v2760_v29 = vpop.f32.mrf.mxu1 }
 0x340   : > { %3289 = vmatmul.mubr.f32.gmra.mxu1 %v7117_v49  ;;  %v2980_v48 = vpop.f32.mrf.mxu0  ;;  %3509 = vmatmul.mubr.f32.gmra.mxu0 %v7121_v50  ;;  %v2761_v6 = vadd.f32 %v6433_v58, %v2760_v29 }
 0x341   : > { %v6486_v38 = vadd.f32 %v2980_v48, %v2756_v19  ;;  %3293 = vmatprep.mubr.f32.mxu1 %v7122_v51  ;;  %3513 = vmatprep.mubr.f32.mxu0 %v7123_v62  ;;  %v2762_v63 = vpop.f32.mrf.mxu1 }
 0x342   : > { %v2982_v59 = vpop.f32.mrf.mxu0  ;;  %v7127_v63 = vld [vmem:[#allocation42_spill] sm:$0xff] }
 0x343   : > { %v2765_v52 = vpop.f32.mrf.mxu1 }
 0x344   : > { %3294 = vmatmul.mubr.f32.gmra.mxu1 %v7120_v35  ;;  %v2985_v40 = vpop.f32.mrf.mxu0  ;;  %3514 = vmatmul.mubr.f32.gmra.mxu0 %v7124_v31  ;;  %v2766_v42 = vadd.f32 %v6433_v58, %v2765_v52 }
 0x345   : > { %v6493_v49 = vadd.f32 %v2985_v40, %v2761_v6  ;;  %3298 = vmatprep.mubr.f32.mxu1 %v6315_v20  ;;  %3518 = vmatprep.mubr.f32.mxu0 %v7125_v25  ;;  %v2767_v14 = vpop.f32.mrf.mxu1 }
 0x346   : > { %v2987_v41 = vpop.f32.mrf.mxu0  ;;  %v2478_v14 = vrot.slane %v6360_v22, 1 }
 0x347   : > { %v2770_v34 = vpop.f32.mrf.mxu1 }
 0x348   : > { %3299 = vmatmul.mubr.f32.gmra.mxu1 %v7123_v62  ;;  %v2990_v27 = vpop.f32.mrf.mxu0  ;;  %3519 = vmatmul.mubr.f32.gmra.mxu0 %v6279_v3  ;;  %v2771_v29 = vadd.f32 %v6433_v58, %v2770_v34  ;;  %v7128_v3 = vld [vmem:[#allocation41_spill] sm:$0xff] }
 0x349   : > { %v6500_v35 = vadd.f32 %v2990_v27, %v2766_v42  ;;  %3303 = vmatprep.mubr.f32.mxu1 %v6330_v17  ;;  %3523 = vmatprep.mubr.f32.mxu0 %v7126_v53  ;;  %v2772_v5 = vpop.f32.mrf.mxu1 }
 0x34a   : > { %v2992_v19 = vpop.f32.mrf.mxu0  ;;  %v2198_v5 = vld [vmem:[#allocation3 + $0x190] sm:$0x3] }
 0x34b   : > { %v2775_v48 = vpop.f32.mrf.mxu1 }
 0x34c   : > { %3304 = vmatmul.mubr.f32.gmra.mxu1 %v7125_v25  ;;  %v2995_v50 = vpop.f32.mrf.mxu0  ;;  %3524 = vmatmul.mubr.f32.gmra.mxu0 %v7127_v63  ;;  %v2776_v52 = vadd.f32 %v6433_v58, %v2775_v48  ;;  %v2477_v25 = vrot.slane %v6350_v24, 1  ;;  %v2485_v48 = vrot.slane %v6360_v22, 2 }
 0x34d   : > { %v6507_v62 = vadd.f32 %v2995_v50, %v2771_v29  ;;  %3308 = vmatprep.mubr.f32.mxu1 %v6341_v16  ;;  %3528 = vmatprep.mubr.f32.mxu0 %v7128_v3  ;;  %v2777_v59 = vpop.f32.mrf.mxu1  ;;  %v2484_v29 = vrot.slane %v6350_v24, 2 }
 0x34e   : > { %v2997_v6 = vpop.f32.mrf.mxu0 }
 0x34f   : > { %v2780_v40 = vpop.f32.mrf.mxu1  ;;  %v2480_v6 = vrot.slane %v2198_v5, 1 }
 0x350   : > { %3309 = vmatmul.mubr.f32.gmra.mxu1 %v7126_v53  ;;  %v3000_v31 = vpop.f32.mrf.mxu0  ;;  %3529 = vmatmul.mubr.f32.gmra.mxu0 %v6309_v12  ;;  %v2781_v27 = vadd.f32 %v6433_v58, %v2780_v40  ;;  %v2479_v12 = vsel %vm493_vm0, %v2477_v25, %v2478_v14  ;;  %v6531_v40 = vld [vmem:[#allocation3 + $0x1a8] sm:$0x3]  ;;  %v6535_v25 = vsel %vm606_vm1, %v2484_v29, %v2485_v48 }
 0x351   : > { %v6516_v41 = vadd.f32 %v3000_v31, %v2776_v52  ;;  %3313 = vmatprep.mubr.f32.mxu1 %v6356_v13  ;;  %3533 = vmatprep.mubr.f32.mxu0 %v6347_v26  ;;  %v2782_v42 = vpop.f32.mrf.mxu1  ;;  %v2494_v52 = vrot.slane %v6080_v30, 1 }
 0x352   : > { %v3002_v34 = vpop.f32.mrf.mxu0  ;;  %v2481_v42 = vsel %vm493_vm0, %v2478_v14, %v2480_v6 }
 0x353   : > { %v2785_v19 = vpop.f32.mrf.mxu1 }
 0x354   : > { %3314 = vmatmul.mubr.f32.gmra.mxu1 %v7128_v3  ;;  %v3005_v53 = vpop.f32.mrf.mxu0  ;;  %3534 = vmatmul.mubr.f32.gmra.mxu0 %v6311_v15  ;;  %v2786_v3 = vadd.f32 %v6433_v58, %v2785_v19  ;;  %v2487_v19 = vrot.slane %v2198_v5, 2 }
 0x355   : > { %v6526_v50 = vadd.f32 %v3005_v53, %v2781_v27  ;;  %3318 = vmatprep.mubr.f32.mxu1 %v6366_v43  ;;  %3538 = vmatprep.mubr.f32.mxu0 %v2479_v12  ;;  %v2787_v63 = vpop.f32.mrf.mxu1  ;;  %v2497_v53 = vrot.slane %v6531_v40, 1 }
 0x356   : > { %v3007_v59 = vpop.f32.mrf.mxu0 }
 0x357   : > { %v2790_v15 = vpop.f32.mrf.mxu1  ;;  %v6545_v59 = vsel %vm606_vm1, %v2485_v48, %v2487_v19  ;;  %v2498_v5 = vsel %vm493_vm0, %v2494_v52, %v2497_v53 }
 0x358   : > { %3319 = vmatmul.mubr.f32.gmra.mxu1 %v6347_v26  ;;  %v3010_v31 = vpop.f32.mrf.mxu0  ;;  %3539 = vmatmul.mubr.f32.gmra.mxu0 %v6350_v24  ;;  %v2791_v26 = vadd.f32 %v6433_v58, %v2790_v15 }
 0x359   : > { %v6539_v34 = vadd.f32 %v3010_v31, %v2786_v3  ;;  %3323 = vmatprep.mubr.f32.mxu1 %v6535_v25  ;;  %3543 = vmatprep.mubr.f32.mxu0 %v2481_v42  ;;  %v2792_v30 = vpop.f32.mrf.mxu1  ;;  %v6553_v31 = vld [vmem:[#allocation2] sm:$0xff] }
 0x35a   : > { %v3012_v27 = vpop.f32.mrf.mxu0 }
 0x35b   : > { %v2795_v63 = vpop.f32.mrf.mxu1 }
 0x35c   : > { %3324 = vmatmul.mubr.f32.gmra.mxu1 %v2479_v12  ;;  %v3015_v29 = vpop.f32.mrf.mxu0  ;;  %3544 = vmatmul.mubr.f32.gmra.mxu0 %v6360_v22  ;;  %v2796_v3 = vadd.f32 %v6433_v58, %v2795_v63 }
 0x35d   : > { %v6548_v24 = vadd.f32 %v3015_v29, %v2791_v26  ;;  %3328 = vmatprep.mubr.f32.mxu1 %v6545_v59  ;;  %3548 = vmatprep.mubr.f32.mxu0 %v2494_v52  ;;  %v2797_v14 = vpop.f32.mrf.mxu1 }
 0x35e   : > { %v3017_v6 = vpop.f32.mrf.mxu0 }
 0x35f   : > { %v2800_v15 = vpop.f32.mrf.mxu1 }
 0x360   : > { %3329 = vmatmul.mubr.f32.gmra.mxu1 %v2481_v42  ;;  %v3020_v12 = vpop.f32.mrf.mxu0  ;;  %3549 = vmatmul.mubr.f32.gmra.mxu0 %v6553_v31  ;;  %v2801_v27 = vadd.f32 %v6433_v58, %v2800_v15 }
 0x361   : > { %v6556_v48 = vadd.f32 %v3020_v12, %v2796_v3  ;;  %4184 = vmatprep.mubr.f32.mxu1 %v5938_v8  ;;  %3553 = vmatprep.mubr.f32.mxu0 %v2498_v5  ;;  %v2802_v22 = vpop.f32.mrf.mxu1 }
 0x362   : > { %v3022_v30 = vpop.f32.mrf.mxu0 }
 0x363   : > { %v2805_v19 = vpop.f32.mrf.mxu1 }
 0x364   : > { %4185 = vmatmul.mubr.f32.vlgmr.msra.gmra.mxu1 %v5953_v33  ;;  %v3025_v52 = vpop.f32.mrf.mxu0  ;;  %3554 = vmatmul.mubr.f32.gmra.mxu0 %v6553_v31  ;;  %v2806_v63 = vadd.f32 %v6433_v58, %v2805_v19 }
 0x365   : > { %v6562_v42 = vadd.f32 %v3025_v52, %v2801_v27  ;;  %4187 = vmatprep.mubr.f32.mxu1 %v5972_v0  ;;  %v2807_v53 = vpop.f32.mrf.mxu1 }
 0x366   : > { %v3027_v26 = vpop.f32.mrf.mxu0 }
 0x367   : > { %v2810_v8 = vpop.f32.mrf.mxu1 }
 0x368   : > { %4188 = vmatmul.mubr.f32.gmra.mxu1 %v5987_v1  ;;  %v3030_v29 = vpop.f32.mrf.mxu0  ;;  %v2811_v5 = vadd.f32 %v6433_v58, %v2810_v8 }
 0x369   : > { %v6567_v14 = vadd.f32 %v3030_v29, %v2806_v63  ;;  %4190 = vmatprep.mubr.f32.mxu1 %v6006_v57  ;;  %v2812_v33 = vpop.f32.mrf.mxu1 }
 0x36a   : > { %v3032_v6 = vpop.f32.mrf.mxu0 }
 0x36b   : > { %v2815_v3 = vpop.f32.mrf.mxu1 }
 0x36c   : > { %4191 = vmatmul.mubr.f32.gmra.mxu1 %v6024_v7  ;;  %v3035_v0 = vpop.f32.mrf.mxu0  ;;  %v2816_v1 = vadd.f32 %v6433_v58, %v2815_v3 }
 0x36d   : > { %v6572_v15 = vadd.f32 %v3035_v0, %v2811_v5  ;;  %4193 = vmatprep.mubr.f32.mxu1 %v6045_v39  ;;  %v2817_v12 = vpop.f32.mrf.mxu1 }
 0x36e   : > { %v3037_v22 = vpop.f32.mrf.mxu0 }
 0x36f   : > { %v2820_v30 = vpop.f32.mrf.mxu1 }
 0x370   : > { %4194 = vmatmul.mubr.f32.gmra.mxu1 %v6065_v21  ;;  %v3040_v57 = vpop.f32.mrf.mxu0  ;;  %v2821_v7 = vadd.f32 %v6433_v58, %v2820_v30 }
 0x371   : > { %v6577_v27 = vadd.f32 %v3040_v57, %v2816_v1  ;;  %4196 = vmatprep.mubr.f32.mxu1 %v6085_v55  ;;  %v2822_v19 = vpop.f32.mrf.mxu1 }
 0x372   : > { %v3042_v52 = vpop.f32.mrf.mxu0 }
 0x373   : > { %v2825_v53 = vpop.f32.mrf.mxu1 }
 0x374   : > { %4197 = vmatmul.mubr.f32.gmra.mxu1 %v6101_v44  ;;  %v3045_v39 = vpop.f32.mrf.mxu0  ;;  %v2826_v21 = vadd.f32 %v6433_v58, %v2825_v53 }
 0x375   : > { %v6582_v26 = vadd.f32 %v3045_v39, %v2821_v7  ;;  %4199 = vmatprep.mubr.f32.mxu1 %v6116_v18  ;;  %v2827_v63 = vpop.f32.mrf.mxu1 }
 0x376   : > { %v3047_v8 = vpop.f32.mrf.mxu0 }
 0x377   : > { %v2830_v29 = vpop.f32.mrf.mxu1 }
 0x378   : > { %4200 = vmatmul.mubr.f32.gmra.mxu1 %v6133_v36  ;;  %v3050_v55 = vpop.f32.mrf.mxu0  ;;  %v2831_v44 = vadd.f32 %v6433_v58, %v2830_v29 }
 0x379   : > { %v6587_v33 = vadd.f32 %v3050_v55, %v2826_v21  ;;  %4202 = vmatprep.mubr.f32.mxu1 %v6150_v45  ;;  %v2832_v6 = vpop.f32.mrf.mxu1 }
 0x37a   : > { %v3052_v5 = vpop.f32.mrf.mxu0 }
 0x37b   : > { %v2835_v3 = vpop.f32.mrf.mxu1 }
 0x37c   : > { %4203 = vmatmul.mubr.f32.gmra.mxu1 %v6165_v46  ;;  %v3055_v18 = vpop.f32.mrf.mxu0  ;;  %v2836_v36 = vadd.f32 %v6433_v58, %v2835_v3 }
 0x37d   : > { %v6592_v0 = vadd.f32 %v3055_v18, %v2831_v44  ;;  %4205 = vmatprep.mubr.f32.mxu1 %v7096_v56  ;;  %v2837_v12 = vpop.f32.mrf.mxu1 }
 0x37e   : > { %v3057_v22 = vpop.f32.mrf.mxu0 }
 0x37f   : > { %v2840_v1 = vpop.f32.mrf.mxu1 }
 0x380   : > { %4206 = vmatmul.mubr.f32.gmra.mxu1 %v7099_v23  ;;  %v3060_v45 = vpop.f32.mrf.mxu0  ;;  %v2841_v46 = vadd.f32 %v6433_v58, %v2840_v1 }
 0x381   : > { %v6597_v30 = vadd.f32 %v3060_v45, %v2836_v36  ;;  %4208 = vmatprep.mubr.f32.mxu1 %v7103_v9  ;;  %v2842_v57 = vpop.f32.mrf.mxu1 }
 0x382   : > { %v3062_v19 = vpop.f32.mrf.mxu0 }
 0x383   : > { %v2845_v52 = vpop.f32.mrf.mxu1 }
 0x384   : > { %4209 = vmatmul.mubr.f32.gmra.mxu1 %v7107_v47  ;;  %v3065_v56 = vpop.f32.mrf.mxu0  ;;  %v2846_v23 = vadd.f32 %v6433_v58, %v2845_v52 }
 0x385   : > { %v6602_v7 = vadd.f32 %v3065_v56, %v2841_v46  ;;  %4211 = vmatprep.mubr.f32.mxu1 %v7110_v60  ;;  %v2847_v53 = vpop.f32.mrf.mxu1 }
 0x386   : > { %v3067_v39 = vpop.f32.mrf.mxu0 }
 0x387   : > { %v2850_v63 = vpop.f32.mrf.mxu1 }
 0x388   : > { %4212 = vmatmul.mubr.f32.gmra.mxu1 %v7113_v11  ;;  %v3070_v9 = vpop.f32.mrf.mxu0  ;;  %v2851_v47 = vadd.f32 %v6433_v58, %v2850_v63 }
 0x389   : > { %v6607_v8 = vadd.f32 %v3070_v9, %v2846_v23  ;;  %4214 = vmatprep.mubr.f32.mxu1 %v7116_v54  ;;  %v2852_v21 = vpop.f32.mrf.mxu1 }
 0x38a   : > { %v3072_v29 = vpop.f32.mrf.mxu0 }
 0x38b   : > { %v2855_v55 = vpop.f32.mrf.mxu1 }
 0x38c   : > { %4215 = vmatmul.mubr.f32.gmra.mxu1 %v7119_v2  ;;  %v3075_v60 = vpop.f32.mrf.mxu0  ;;  %v2856_v11 = vadd.f32 %v6433_v58, %v2855_v55 }
 0x38d   : > { %v6612_v6 = vadd.f32 %v3075_v60, %v2851_v47  ;;  %4217 = vmatprep.mubr.f32.mxu1 %v7122_v51  ;;  %v2857_v5 = vpop.f32.mrf.mxu1 }
 0x38e   : > { %v3077_v44 = vpop.f32.mrf.mxu0 }
 0x38f   : > { %v2860_v3 = vpop.f32.mrf.mxu1 }
 0x390   : > { %4218 = vmatmul.mubr.f32.gmra.mxu1 %v6315_v20  ;;  %v3080_v54 = vpop.f32.mrf.mxu0  ;;  %v2861_v2 = vadd.f32 %v6433_v58, %v2860_v3  ;;  %v2501_v20 = vrot.slane %v6553_v31, 2 }
 0x391   : > { %v6617_v18 = vadd.f32 %v3080_v54, %v2856_v11  ;;  %4220 = vmatprep.mubr.f32.mxu1 %v6330_v17  ;;  %v2862_v12 = vpop.f32.mrf.mxu1 }
 0x392   : > { %v3082_v22 = vpop.f32.mrf.mxu0 }
 0x393   : > { %v2865_v36 = vpop.f32.mrf.mxu1 }
 0x394   : > { %4221 = vmatmul.mubr.f32.gmra.mxu1 %v6341_v16  ;;  %v3085_v51 = vpop.f32.mrf.mxu0  ;;  %v2866_v19 = vadd.f32 %v6433_v58, %v2865_v36  ;;  %v2504_v16 = vrot.slane %v6531_v40, 2 }
 0x395   : > { %v6622_v1 = vadd.f32 %v3085_v51, %v2861_v2  ;;  %4223 = vmatprep.mubr.f32.mxu1 %v6356_v13  ;;  %v2867_v45 = vpop.f32.mrf.mxu1 }
 0x396   : > { %v3087_v57 = vpop.f32.mrf.mxu0 }
 0x397   : > { %v2870_v46 = vpop.f32.mrf.mxu1 }
 0x398   : > { %4224 = vmatmul.mubr.f32.gmra.mxu1 %v6366_v43  ;;  %v3090_v17 = vpop.f32.mrf.mxu0  ;;  %v2871_v13 = vadd.f32 %v6433_v58, %v2870_v46  ;;  %v2505_v43 = vsel %vm606_vm1, %v2501_v20, %v2504_v16 }
 0x399   : > { %v6628_v52 = vadd.f32 %v3090_v17, %v2866_v19  ;;  %4226 = vmatprep.mubr.f32.mxu1 %v6535_v25  ;;  %v2872_v56 = vpop.f32.mrf.mxu1 }
 0x39a   : > { %v3092_v53 = vpop.f32.mrf.mxu0 }
 0x39b   : > { %v2875_v39 = vpop.f32.mrf.mxu1 }
 0x39c   : > { %4227 = vmatmul.mubr.f32.gmra.mxu1 %v6545_v59  ;;  %v3095_v31 = vpop.f32.mrf.mxu0  ;;  %v2876_v21 = vadd.f32 %v6433_v58, %v2875_v39 }
 0x39d   : > { %v6634_v23 = vadd.f32 %v3095_v31, %v2871_v13  ;;  %4229 = vmatprep.mubr.f32.mxu1 %v2501_v20  ;;  %v2877_v63 = vpop.f32.mrf.mxu1 }
 0x39e   : > { %v3097_v9 = vpop.f32.mrf.mxu0 }
 0x39f   : > { %v2880_v25 = vpop.f32.mrf.mxu1 }
 0x3a0   : > { %4230 = vmatmul.mubr.f32.gmra.mxu1 %v2505_v43  ;;  %v3100_v40 = vpop.f32.mrf.mxu0  ;;  %v2881_v60 = vadd.f32 %v6433_v58, %v2880_v25 }
 0x3a1   : > { %v6638_v29 = vadd.f32 %v3100_v40, %v2876_v21  ;;  %v2882_v47 = vpop.f32.mrf.mxu1 }
 0x3a2   : > { %v3102_v55 = vpop.f32.mrf.mxu0 }
 0x3a3   : > { %v3175_v59 = vpop.f32.mrf.mxu1 }
 0x3a4   : > { %v3105_v5 = vpop.f32.mrf.mxu0  ;;  %v3176_v44 = vadd.f32 %v3175_v59, %v6443_v10 }
 0x3a5   : > { %v6642_v11 = vadd.f32 %v3105_v5, %v2881_v60  ;;  %v3177_v3 = vpop.f32.mrf.mxu1 }
 0x3a6   : > { %v3107_v54 = vpop.f32.mrf.mxu0 }
 0x3a8   : > { %v3180_v12 = vpop.f32.mrf.mxu1  ;;  %v3400_v22 = vpop.f32.mrf.mxu0 }
 0x3a9   : > { %v3181_v2 = vadd.f32 %v3180_v12, %v6451_v32  ;;  %v6645_v36 = vadd.f32 %v3400_v22, %v3176_v44 }
 0x3aa   : > { %v3182_v51 = vpop.f32.mrf.mxu1  ;;  %v3402_v45 = vpop.f32.mrf.mxu0 }
 0x3ac   : > { %v3185_v57 = vpop.f32.mrf.mxu1  ;;  %v3405_v20 = vpop.f32.mrf.mxu0 }
 0x3ad   : > { %v3186_v58 = vadd.f32 %v3185_v57, %v6458_v37  ;;  %v6648_v19 = vadd.f32 %v3405_v20, %v3181_v2 }
 0x3ae   : > { %v3187_v46 = vpop.f32.mrf.mxu1  ;;  %v3407_v10 = vpop.f32.mrf.mxu0 }
 0x3b0   : > { %v3190_v17 = vpop.f32.mrf.mxu1  ;;  %v3410_v16 = vpop.f32.mrf.mxu0 }
 0x3b1   : > { %v3191_v56 = vadd.f32 %v3190_v17, %v6465_v61  ;;  %v6651_v53 = vadd.f32 %v3410_v16, %v3186_v58 }
 0x3b2   : > { %v3192_v13 = vpop.f32.mrf.mxu1  ;;  %v3412_v32 = vpop.f32.mrf.mxu0 }
 0x3b4   : > { %v3195_v39 = vpop.f32.mrf.mxu1  ;;  %v3415_v31 = vpop.f32.mrf.mxu0 }
 0x3b5   : > { %v3196_v43 = vadd.f32 %v3195_v39, %v6472_v4  ;;  %v6654_v63 = vadd.f32 %v3415_v31, %v3191_v56 }
 0x3b6   : > { %v3197_v9 = vpop.f32.mrf.mxu1  ;;  %v3417_v37 = vpop.f32.mrf.mxu0 }
 0x3b8   : > { %v3200_v21 = vpop.f32.mrf.mxu1  ;;  %v3420_v25 = vpop.f32.mrf.mxu0 }
 0x3b9   : > { %v3201_v40 = vadd.f32 %v3200_v21, %v6479_v28  ;;  %v6657_v47 = vadd.f32 %v3420_v25, %v3196_v43 }
 0x3ba   : > { %v3202_v55 = vpop.f32.mrf.mxu1  ;;  %v3422_v61 = vpop.f32.mrf.mxu0 }
 0x3bc   : > { %v3205_v60 = vpop.f32.mrf.mxu1  ;;  %v3425_v59 = vpop.f32.mrf.mxu0 }
 0x3bd   : > { %v3206_v5 = vadd.f32 %v3205_v60, %v6486_v38  ;;  %v6660_v44 = vadd.f32 %v3425_v59, %v3201_v40 }
 0x3be   : > { %v3207_v3 = vpop.f32.mrf.mxu1  ;;  %v3427_v4 = vpop.f32.mrf.mxu0 }
 0x3c0   : > { %v3210_v54 = vpop.f32.mrf.mxu1  ;;  %v3430_v12 = vpop.f32.mrf.mxu0 }
 0x3c1   : > { %v3211_v22 = vadd.f32 %v3210_v54, %v6493_v49  ;;  %v6663_v2 = vadd.f32 %v3430_v12, %v3206_v5 }
 0x3c2   : > { %v3212_v51 = vpop.f32.mrf.mxu1  ;;  %v3432_v28 = vpop.f32.mrf.mxu0 }
 0x3c4   : > { %v3215_v45 = vpop.f32.mrf.mxu1  ;;  %v3435_v57 = vpop.f32.mrf.mxu0 }
 0x3c5   : > { %v3216_v20 = vadd.f32 %v3215_v45, %v6500_v35  ;;  %v6666_v58 = vadd.f32 %v3435_v57, %v3211_v22 }
 0x3c6   : > { %v3217_v46 = vpop.f32.mrf.mxu1  ;;  %v3437_v38 = vpop.f32.mrf.mxu0 }
 0x3c8   : > { %v3220_v10 = vpop.f32.mrf.mxu1  ;;  %v3440_v17 = vpop.f32.mrf.mxu0 }
 0x3c9   : > { %v3221_v16 = vadd.f32 %v3220_v10, %v6507_v62  ;;  %v6669_v56 = vadd.f32 %v3440_v17, %v3216_v20 }
 0x3ca   : > { %v3222_v13 = vpop.f32.mrf.mxu1  ;;  %v3442_v49 = vpop.f32.mrf.mxu0 }
 0x3cc   : > { %v3225_v32 = vpop.f32.mrf.mxu1  ;;  %v3445_v39 = vpop.f32.mrf.mxu0 }
 0x3cd   : > { %v3226_v31 = vadd.f32 %v3225_v32, %v6516_v41  ;;  %v6672_v43 = vadd.f32 %v3445_v39, %v3221_v16 }
 0x3ce   : > { %v3227_v9 = vpop.f32.mrf.mxu1  ;;  %v3447_v35 = vpop.f32.mrf.mxu0 }
 0x3d0   : > { %v3230_v37 = vpop.f32.mrf.mxu1  ;;  %v3450_v21 = vpop.f32.mrf.mxu0 }
 0x3d1   : > { %v3231_v25 = vadd.f32 %v3230_v37, %v6526_v50  ;;  %v6675_v40 = vadd.f32 %v3450_v21, %v3226_v31 }
 0x3d2   : > { %v3232_v55 = vpop.f32.mrf.mxu1  ;;  %v3452_v62 = vpop.f32.mrf.mxu0 }
 0x3d4   : > { %v3235_v61 = vpop.f32.mrf.mxu1  ;;  %v3455_v60 = vpop.f32.mrf.mxu0 }
 0x3d5   : > { %v3236_v59 = vadd.f32 %v3235_v61, %v6539_v34  ;;  %v6678_v5 = vadd.f32 %v3455_v60, %v3231_v25 }
 0x3d6   : > { %v3237_v3 = vpop.f32.mrf.mxu1  ;;  %v3457_v41 = vpop.f32.mrf.mxu0 }
 0x3d8   : > { %v3240_v4 = vpop.f32.mrf.mxu1  ;;  %v3460_v54 = vpop.f32.mrf.mxu0 }
 0x3d9   : > { %v3241_v12 = vadd.f32 %v3240_v4, %v6548_v24  ;;  %v6681_v22 = vadd.f32 %v3460_v54, %v3236_v59 }
 0x3da   : > { %v3242_v51 = vpop.f32.mrf.mxu1  ;;  %v3462_v50 = vpop.f32.mrf.mxu0 }
 0x3dc   : > { %v3245_v28 = vpop.f32.mrf.mxu1  ;;  %v3465_v45 = vpop.f32.mrf.mxu0 }
 0x3dd   : > { %v3246_v57 = vadd.f32 %v3245_v28, %v6556_v48  ;;  %v6684_v20 = vadd.f32 %v3465_v45, %v3241_v12 }
 0x3de   : > { %v3247_v46 = vpop.f32.mrf.mxu1  ;;  %v3467_v34 = vpop.f32.mrf.mxu0 }
 0x3e0   : > { %v3250_v38 = vpop.f32.mrf.mxu1  ;;  %v3470_v10 = vpop.f32.mrf.mxu0 }
 0x3e1   : > { %v3251_v17 = vadd.f32 %v3250_v38, %v6562_v42  ;;  %v6687_v16 = vadd.f32 %v3470_v10, %v3246_v57 }
 0x3e2   : > { %v3252_v13 = vpop.f32.mrf.mxu1  ;;  %v3472_v24 = vpop.f32.mrf.mxu0 }
 0x3e4   : > { %v3255_v49 = vpop.f32.mrf.mxu1  ;;  %v3475_v32 = vpop.f32.mrf.mxu0 }
 0x3e5   : > { %v3256_v39 = vadd.f32 %v3255_v49, %v6567_v14  ;;  %v6690_v31 = vadd.f32 %v3475_v32, %v3251_v17 }
 0x3e6   : > { %v3257_v9 = vpop.f32.mrf.mxu1  ;;  %v3477_v48 = vpop.f32.mrf.mxu0 }
 0x3e8   : > { %v3260_v35 = vpop.f32.mrf.mxu1  ;;  %v3480_v37 = vpop.f32.mrf.mxu0 }
 0x3e9   : > { %v3261_v21 = vadd.f32 %v3260_v35, %v6572_v15  ;;  %v6693_v25 = vadd.f32 %v3480_v37, %v3256_v39 }
 0x3ea   : > { %v3262_v55 = vpop.f32.mrf.mxu1  ;;  %v3482_v42 = vpop.f32.mrf.mxu0 }
 0x3ec   : > { %v3265_v62 = vpop.f32.mrf.mxu1  ;;  %v3485_v61 = vpop.f32.mrf.mxu0 }
 0x3ed   : > { %v3266_v60 = vadd.f32 %v3265_v62, %v6577_v27  ;;  %v6696_v59 = vadd.f32 %v3485_v61, %v3261_v21 }
 0x3ee   : > { %v3267_v3 = vpop.f32.mrf.mxu1  ;;  %v3487_v14 = vpop.f32.mrf.mxu0 }
 0x3f0   : > { %v3270_v41 = vpop.f32.mrf.mxu1  ;;  %v3490_v4 = vpop.f32.mrf.mxu0 }
 0x3f1   : > { %v3271_v54 = vadd.f32 %v3270_v41, %v6582_v26  ;;  %v6699_v12 = vadd.f32 %v3490_v4, %v3266_v60 }
 0x3f2   : > { %v3272_v51 = vpop.f32.mrf.mxu1  ;;  %v3492_v15 = vpop.f32.mrf.mxu0 }
 0x3f4   : > { %v3275_v50 = vpop.f32.mrf.mxu1  ;;  %v3495_v28 = vpop.f32.mrf.mxu0 }
 0x3f5   : > { %v3276_v45 = vadd.f32 %v3275_v50, %v6587_v33  ;;  %v6702_v57 = vadd.f32 %v3495_v28, %v3271_v54 }
 0x3f6   : > { %v3277_v46 = vpop.f32.mrf.mxu1  ;;  %v3497_v27 = vpop.f32.mrf.mxu0 }
 0x3f8   : > { %v3280_v34 = vpop.f32.mrf.mxu1  ;;  %v3500_v38 = vpop.f32.mrf.mxu0 }
 0x3f9   : > { %v3281_v10 = vadd.f32 %v3280_v34, %v6592_v0  ;;  %v6705_v17 = vadd.f32 %v3500_v38, %v3276_v45 }
 0x3fa   : > { %v3282_v13 = vpop.f32.mrf.mxu1  ;;  %v3502_v26 = vpop.f32.mrf.mxu0 }
 0x3fc   : > { %v3285_v24 = vpop.f32.mrf.mxu1  ;;  %v3505_v49 = vpop.f32.mrf.mxu0 }
 0x3fd   : > { %v3286_v32 = vadd.f32 %v3285_v24, %v6597_v30  ;;  %v6708_v39 = vadd.f32 %v3505_v49, %v3281_v10 }
 0x3fe   : > { %v3287_v9 = vpop.f32.mrf.mxu1  ;;  %v3507_v33 = vpop.f32.mrf.mxu0 }
 0x400   : > { %v3290_v48 = vpop.f32.mrf.mxu1  ;;  %v3510_v35 = vpop.f32.mrf.mxu0 }
 0x401   : > { %v3291_v37 = vadd.f32 %v3290_v48, %v6602_v7  ;;  %v6711_v21 = vadd.f32 %v3510_v35, %v3286_v32 }
 0x402   : > { %v3292_v55 = vpop.f32.mrf.mxu1  ;;  %v3512_v0 = vpop.f32.mrf.mxu0 }
 0x404   : > { %v3295_v42 = vpop.f32.mrf.mxu1  ;;  %v3515_v62 = vpop.f32.mrf.mxu0 }
 0x405   : > { %v3296_v61 = vadd.f32 %v3295_v42, %v6607_v8  ;;  %v6714_v60 = vadd.f32 %v3515_v62, %v3291_v37 }
 0x406   : > { %v3297_v3 = vpop.f32.mrf.mxu1  ;;  %v3517_v30 = vpop.f32.mrf.mxu0 }
 0x408   : > { %v3300_v14 = vpop.f32.mrf.mxu1  ;;  %v3520_v41 = vpop.f32.mrf.mxu0 }
 0x409   : > { %v3301_v4 = vadd.f32 %v3300_v14, %v6612_v6  ;;  %v6717_v54 = vadd.f32 %v3520_v41, %v3296_v61 }
 0x40a   : > { %v3302_v51 = vpop.f32.mrf.mxu1  ;;  %v3522_v7 = vpop.f32.mrf.mxu0 }
 0x40c   : > { %v3305_v15 = vpop.f32.mrf.mxu1  ;;  %v3525_v50 = vpop.f32.mrf.mxu0 }
 0x40d   : > { %v3306_v28 = vadd.f32 %v3305_v15, %v6617_v18  ;;  %v6720_v45 = vadd.f32 %v3525_v50, %v3301_v4 }
 0x40e   : > { %v3307_v46 = vpop.f32.mrf.mxu1  ;;  %v3527_v8 = vpop.f32.mrf.mxu0 }
 0x410   : > { %v3310_v27 = vpop.f32.mrf.mxu1  ;;  %v3530_v34 = vpop.f32.mrf.mxu0 }
 0x411   : > { %v3311_v38 = vadd.f32 %v3310_v27, %v6622_v1  ;;  %v6723_v10 = vadd.f32 %v3530_v34, %v3306_v28  ;;  %v4313_v28 = vld [vmem:[#allocation2 + $0x21] sm:$0xff]  ;;  %v4314_v27 = vld [vmem:[#allocation2 + $0x19] sm:$0xff] }
 0x412   : > { %v3312_v13 = vpop.f32.mrf.mxu1  ;;  %v3532_v6 = vpop.f32.mrf.mxu0 }
 0x413   : > { %v4315_v13 = vld [vmem:[#allocation2 + $0x39] sm:$0xff] }
 0x414   : > { %v3315_v26 = vpop.f32.mrf.mxu1  ;;  %v3535_v24 = vpop.f32.mrf.mxu0 }
 0x415   : > { %v3316_v49 = vadd.f32 %v3315_v26, %v6628_v52  ;;  %v6726_v32 = vadd.f32 %v3535_v24, %v3311_v38  ;;  %v4316_v24 = vld [vmem:[#allocation2 + $0x31] sm:$0xff] }
 0x416   : > { %v3317_v9 = vpop.f32.mrf.mxu1  ;;  %v3537_v18 = vpop.f32.mrf.mxu0 }
 0x418   : > { %v3320_v33 = vpop.f32.mrf.mxu1  ;;  %v3540_v48 = vpop.f32.mrf.mxu0 }
 0x419   : > { %v6729_v35 = vadd.f32 %v3320_v33, %v6634_v23  ;;  %v6731_v37 = vadd.f32 %v3540_v48, %v3316_v49  ;;  %v4317_v33 = vld [vmem:[#allocation2 + $0x51] sm:$0xff] }
 0x41a   : > { %v3322_v1 = vpop.f32.mrf.mxu1  ;;  %v3542_v55 = vpop.f32.mrf.mxu0 }
 0x41b   : > { %v4318_v55 = vld [vmem:[#allocation2 + $0x49] sm:$0xff] }
 0x41c   : > { %v3325_v0 = vpop.f32.mrf.mxu1  ;;  %v6733_v42 = vpop.f32.mrf.mxu0 }
 0x41d   : > { %v3326_v62 = vadd.f32 %v3325_v0, %v6638_v29 }
 0x41e   : > { %v3327_v61 = vpop.f32.mrf.mxu1  ;;  %v3547_v52 = vpop.f32.mrf.mxu0 }
 0x41f   : > { %v4319_v61 = vld [vmem:[#allocation2 + $0x69] sm:$0xff] }
 0x420   : > { %v6736_v3 = vpop.f32.mrf.mxu1  ;;  %v3550_v30 = vpop.f32.mrf.mxu0 }
 0x421   : > { %v6738_v14 = vadd.f32 %v3550_v30, %v3326_v62 }
 0x422   : > { %v3332_v41 = vpop.f32.mrf.mxu1  ;;  %v3552_v23 = vpop.f32.mrf.mxu0 }
 0x423   : > { %v4320_v41 = vld [vmem:[#allocation2 + $0x61] sm:$0xff] }
 0x424   : > { %v4186_v4 = vpop.f32.mrf.mxu1  ;;  %v6740_v51 = vpop.f32.mrf.mxu0 }
 0x425   : > { %v3631_v7 = vadd.f32 %v4186_v4, %v6648_v19 }
 0x426   : > { %v3625_v15 = vpop.f32.mrf.mxu1  ;;  %v3557_v50 = vpop.f32.mrf.mxu0 }
 0x427   : > { %v3785_v46 = vadd.f32 %v4313_v28, %v3631_v7  ;;  %v3626_v29 = vadd.f32 %v3625_v15, %v6645_v36  ;;  %v4321_v7 = vld [vmem:[#allocation2 + $0x81] sm:$0xff]  ;;  %v4322_v28 = vld [vmem:[#allocation2 + $0x79] sm:$0xff] }
 0x428   : > { %v4189_v8 = vpop.f32.mrf.mxu1 }
 0x429   : > { %3817 = vst [vmem:[%s6746_s12 + $0x8] sm:$0xff] %v3785_v46  ;;  %v3784_v34 = vadd.f32 %v4314_v27, %v3626_v29  ;;  %v3641_v38 = vadd.f32 %v4189_v8, %v6654_v63  ;;  %v4323_v8 = vld [vmem:[#allocation2 + $0x99] sm:$0xff] }
 0x42a   : > { %v3635_v19 = vpop.f32.mrf.mxu1 }
 0x42b   : > { %3816 = vst [vmem:[%s6746_s12] sm:$0xff] %v3784_v34  ;;  %v3787_v6 = vadd.f32 %v4315_v13, %v3641_v38  ;;  %v3636_v36 = vadd.f32 %v3635_v19, %v6651_v53  ;;  %v4324_v38 = vld [vmem:[#allocation2 + $0x91] sm:$0xff] }
 0x42c   : > { %v4192_v26 = vpop.f32.mrf.mxu1 }
 0x42d   : > { %3819 = vst [vmem:[%s6746_s12 + $0x18] sm:$0xff] %v3787_v6  ;;  %v3786_v49 = vadd.f32 %v4316_v24, %v3636_v36  ;;  %v3651_v9 = vadd.f32 %v4192_v26, %v6660_v44  ;;  %v4325_v6 = vld [vmem:[#allocation2 + $0xb1] sm:$0xff]  ;;  %v4326_v24 = vld [vmem:[#allocation2 + $0xa9] sm:$0xff] }
 0x42e   : > { %v3645_v18 = vpop.f32.mrf.mxu1 }
 0x42f   : > { %3818 = vst [vmem:[%s6746_s12 + $0x10] sm:$0xff] %v3786_v49  ;;  %v3789_v48 = vadd.f32 %v4317_v33, %v3651_v9  ;;  %v3646_v63 = vadd.f32 %v3645_v18, %v6657_v47  ;;  %v4327_v18 = vld [vmem:[#allocation2 + $0xc9] sm:$0xff] }
 0x430   : > { %v4195_v1 = vpop.f32.mrf.mxu1 }
 0x431   : > { %3821 = vst [vmem:[%s6746_s12 + $0x28] sm:$0xff] %v3789_v48  ;;  %v3788_v0 = vadd.f32 %v4318_v55, %v3646_v63  ;;  %v3661_v53 = vadd.f32 %v4195_v1, %v6666_v58  ;;  %v4328_v63 = vld [vmem:[#allocation2 + $0xc1] sm:$0xff] }
 0x432   : > { %v3655_v62 = vpop.f32.mrf.mxu1 }
 0x433   : > { %3820 = vst [vmem:[%s6746_s12 + $0x20] sm:$0xff] %v3788_v0  ;;  %v3791_v52 = vadd.f32 %v4319_v61, %v3661_v53  ;;  %v3656_v44 = vadd.f32 %v3655_v62, %v6663_v2  ;;  %v4329_v0 = vld [vmem:[#allocation2 + $0xe1] sm:$0xff]  ;;  %v4330_v61 = vld [vmem:[#allocation2 + $0xd9] sm:$0xff] }
 0x434   : > { %v4198_v30 = vpop.f32.mrf.mxu1 }
 0x435   : > { %3823 = vst [vmem:[%s6746_s12 + $0x38] sm:$0xff] %v3791_v52  ;;  %v3790_v23 = vadd.f32 %v4320_v41, %v3656_v44  ;;  %v3671_v47 = vadd.f32 %v4198_v30, %v6672_v43  ;;  %v4331_v30 = vld [vmem:[#allocation2 + $0xf9] sm:$0xff] }
 0x436   : > { %v3665_v4 = vpop.f32.mrf.mxu1 }
 0x437   : > { %3822 = vst [vmem:[%s6746_s12 + $0x30] sm:$0xff] %v3790_v23  ;;  %v3793_v15 = vadd.f32 %v4321_v7, %v3671_v47  ;;  %v3666_v58 = vadd.f32 %v3665_v4, %v6669_v56  ;;  %v4332_v47 = vld [vmem:[#allocation2 + $0xf1] sm:$0xff] }
 0x438   : > { %v4201_v50 = vpop.f32.mrf.mxu1 }
 0x439   : > { %3825 = vst [vmem:[%s6746_s12 + $0x48] sm:$0xff] %v3793_v15  ;;  %v3792_v46 = vadd.f32 %v4322_v28, %v3666_v58  ;;  %v3681_v2 = vadd.f32 %v4201_v50, %v6678_v5  ;;  %v4333_v15 = vld [vmem:[#allocation2 + $0x111] sm:$0xff]  ;;  %v4334_v28 = vld [vmem:[#allocation2 + $0x109] sm:$0xff] }
 0x43a   : > { %v3675_v29 = vpop.f32.mrf.mxu1 }
 0x43b   : > { %3824 = vst [vmem:[%s6746_s12 + $0x40] sm:$0xff] %v3792_v46  ;;  %v3795_v27 = vadd.f32 %v4323_v8, %v3681_v2  ;;  %v3676_v43 = vadd.f32 %v3675_v29, %v6675_v40  ;;  %v4335_v29 = vld [vmem:[#allocation2 + $0x129] sm:$0xff] }
 0x43c   : > { %v4204_v34 = vpop.f32.mrf.mxu1 }
 0x43d   : > { %3827 = vst [vmem:[%s6746_s12 + $0x58] sm:$0xff] %v3795_v27  ;;  %v3794_v19 = vadd.f32 %v4324_v38, %v3676_v43  ;;  %v3691_v56 = vadd.f32 %v4204_v34, %v6684_v20  ;;  %v4336_v43 = vld [vmem:[#allocation2 + $0x121] sm:$0xff] }
 0x43e   : > { %v3685_v13 = vpop.f32.mrf.mxu1 }
 0x43f   : > { %3826 = vst [vmem:[%s6746_s12 + $0x50] sm:$0xff] %v3794_v19  ;;  %v3797_v36 = vadd.f32 %v4325_v6, %v3691_v56  ;;  %v3686_v5 = vadd.f32 %v3685_v13, %v6681_v22  ;;  %v4337_v19 = vld [vmem:[#allocation2 + $0x141] sm:$0xff]  ;;  %v4338_v6 = vld [vmem:[#allocation2 + $0x139] sm:$0xff] }
 0x440   : > { %v4207_v26 = vpop.f32.mrf.mxu1 }
 0x441   : > { %3829 = vst [vmem:[%s6746_s12 + $0x68] sm:$0xff] %v3797_v36  ;;  %v3796_v49 = vadd.f32 %v4326_v24, %v3686_v5  ;;  %v3701_v40 = vadd.f32 %v4207_v26, %v6690_v31  ;;  %v3546_v26 = vadd.f32 %v6733_v42, %v6729_v35  ;;  %v4341_v42 = vld [vmem:[#allocation2 + $0x171] sm:$0xff] }
 0x442   : > { %v3695_v9 = vpop.f32.mrf.mxu1 }
 0x443   : > { %3828 = vst [vmem:[%s6746_s12 + $0x60] sm:$0xff] %v3796_v49  ;;  %v3799_v33 = vadd.f32 %v4327_v18, %v3701_v40  ;;  %v3696_v20 = vadd.f32 %v3695_v9, %v6687_v16  ;;  %v4340_v9 = vld [vmem:[#allocation2 + $0x151] sm:$0xff] }
 0x444   : > { %v4210_v48 = vpop.f32.mrf.mxu1 }
 0x445   : > { %3831 = vst [vmem:[%s6746_s12 + $0x78] sm:$0xff] %v3799_v33  ;;  %v3798_v1 = vadd.f32 %v4328_v63, %v3696_v20  ;;  %v3711_v22 = vadd.f32 %v4210_v48, %v6696_v59 }
 0x446   : > { %v3705_v55 = vpop.f32.mrf.mxu1 }
 0x447   : > { %3830 = vst [vmem:[%s6746_s12 + $0x70] sm:$0xff] %v3798_v1  ;;  %v3801_v53 = vadd.f32 %v4329_v0, %v3711_v22  ;;  %v3706_v31 = vadd.f32 %v3705_v55, %v6693_v25  ;;  %v4343_v22 = vld [vmem:[#allocation2 + $0x189] sm:$0xff] }
 0x448   : > { %v4213_v62 = vpop.f32.mrf.mxu1 }
 0x449   : > { %3833 = vst [vmem:[%s6746_s12 + $0x88] sm:$0xff] %v3801_v53  ;;  %v3800_v52 = vadd.f32 %v4330_v61, %v3706_v31  ;;  %v3721_v16 = vadd.f32 %v4213_v62, %v6702_v57 }
 0x44a   : > { %v3715_v44 = vpop.f32.mrf.mxu1 }
 0x44b   : > { %3832 = vst [vmem:[%s6746_s12 + $0x80] sm:$0xff] %v3800_v52  ;;  %v3803_v41 = vadd.f32 %v4331_v30, %v3721_v16  ;;  %v3716_v59 = vadd.f32 %v3715_v44, %v6699_v12 }
 0x44c   : > { %v4216_v23 = vpop.f32.mrf.mxu1 }
 0x44d   : > { %3835 = vst [vmem:[%s6746_s12 + $0x98] sm:$0xff] %v3803_v41  ;;  %v3802_v4 = vadd.f32 %v4332_v47, %v3716_v59  ;;  %v3731_v25 = vadd.f32 %v4216_v23, %v6708_v39 }
 0x44e   : > { %v3725_v7 = vpop.f32.mrf.mxu1 }
 0x44f   : > { %3834 = vst [vmem:[%s6746_s12 + $0x90] sm:$0xff] %v3802_v4  ;;  %v3805_v58 = vadd.f32 %v4333_v15, %v3731_v25  ;;  %v3726_v57 = vadd.f32 %v3725_v7, %v6705_v17 }
 0x450   : > { %v4219_v50 = vpop.f32.mrf.mxu1 }
 0x451   : > { %3837 = vst [vmem:[%s6746_s12 + $0xa8] sm:$0xff] %v3805_v58  ;;  %v3804_v46 = vadd.f32 %v4334_v28, %v3726_v57  ;;  %v3741_v12 = vadd.f32 %v4219_v50, %v6714_v60 }
 0x452   : > { %v3735_v2 = vpop.f32.mrf.mxu1 }
 0x453   : > { %3836 = vst [vmem:[%s6746_s12 + $0xa0] sm:$0xff] %v3804_v46  ;;  %v3807_v8 = vadd.f32 %v4335_v29, %v3741_v12  ;;  %v3736_v39 = vadd.f32 %v3735_v2, %v6711_v21 }
 0x454   : > { %v4222_v27 = vpop.f32.mrf.mxu1 }
 0x455   : > { %3839 = vst [vmem:[%s6746_s12 + $0xb8] sm:$0xff] %v3807_v8  ;;  %v3806_v34 = vadd.f32 %v4336_v43, %v3736_v39  ;;  %v3751_v17 = vadd.f32 %v4222_v27, %v6720_v45  ;;  %v4339_v45 = vld [vmem:[#allocation2 + $0x159] sm:$0xff] }
 0x456   : > { %v3745_v38 = vpop.f32.mrf.mxu1 }
 0x457   : > { %3838 = vst [vmem:[%s6746_s12 + $0xb0] sm:$0xff] %v3806_v34  ;;  %v3809_v56 = vadd.f32 %v4337_v19, %v3751_v17  ;;  %v3746_v60 = vadd.f32 %v3745_v38, %v6717_v54  ;;  %v3331_v54 = vadd.f32 %v6736_v3, %v6642_v11  ;;  %v4342_v11 = vld [vmem:[#allocation2 + $0x169] sm:$0xff] }
 0x458   : > { %v4225_v13 = vpop.f32.mrf.mxu1 }
 0x459   : > { %3841 = vst [vmem:[%s6746_s12 + $0xc8] sm:$0xff] %v3809_v56  ;;  %v3808_v36 = vadd.f32 %v4338_v6, %v3746_v60  ;;  %v3761_v21 = vadd.f32 %v4225_v13, %v6726_v32  ;;  %v3556_v35 = vadd.f32 %v6740_v51, %v3331_v54 }
 0x45a   : > { %v3755_v5 = vpop.f32.mrf.mxu1 }
 0x45b   : > { %3840 = vst [vmem:[%s6746_s12 + $0xc0] sm:$0xff] %v3808_v36  ;;  %v3811_v24 = vadd.f32 %v4339_v45, %v3761_v21  ;;  %v3756_v49 = vadd.f32 %v3755_v5, %v6723_v10 }
 0x45c   : > { %v4228_v40 = vpop.f32.mrf.mxu1 }
 0x45d   : > { %3843 = vst [vmem:[%s6746_s12 + $0xd8] sm:$0xff] %v3811_v24  ;;  %v3810_v18 = vadd.f32 %v4340_v9, %v3756_v49  ;;  %v3771_v32 = vadd.f32 %v4228_v40, %v3546_v26 }
 0x45e   : > { %v3765_v33 = vpop.f32.mrf.mxu1 }
 0x45f   : > { %3842 = vst [vmem:[%s6746_s12 + $0xd0] sm:$0xff] %v3810_v18  ;;  %v3813_v20 = vadd.f32 %v4341_v42, %v3771_v32  ;;  %v3766_v10 = vadd.f32 %v3765_v33, %v6731_v37  ;;  %v4344_v37 = vld [vmem:[#allocation2 + $0x181] sm:$0xff] }
 0x460   : > { %v4231_v48 = vpop.f32.mrf.mxu1 }
 0x461   : > { %3845 = vst [vmem:[%s6746_s12 + $0xe8] sm:$0xff] %v3813_v20  ;;  %v3812_v3 = vadd.f32 %v4342_v11, %v3766_v10  ;;  %v3781_v63 = vadd.f32 %v4231_v48, %v3556_v35 }
 0x462   : > { %v3775_v1 = vpop.f32.mrf.mxu1 }
 0x463   : > { %3844 = vst [vmem:[%s6746_s12 + $0xe0] sm:$0xff] %v3812_v3  ;;  %v3815_v51 = vadd.f32 %v4343_v22, %v3781_v63  ;;  %v3776_v55 = vadd.f32 %v3775_v1, %v6738_v14 }
 0x465   : > { %3847 = vst [vmem:[%s6746_s12 + $0xf8] sm:$0xff] %v3815_v51  ;;  %v3814_v0 = vadd.f32 %v4344_v37, %v3776_v55 }
 0x467   : > { %3846 = vst [vmem:[%s6746_s12 + $0xf0] sm:$0xff] %v3814_v0 }
 0x468   : > { %4438 = shalt.err (!%p4435_p3)
}
 0x469   : > { %s4439_s13 = scalar_lea.hbm %s6816_s11, 4096  ;;  %s4443_s9 = scalar_lea.hbm %s6868_s5, 8192 }
 0x46a   : > { %p4440_p11 = scmp.ne.s32.totalorder %s6816_s11, %s4439_s13  ;;  %p4444_p4 = scmp.lt.s32.totalorder %s6816_s11, %s6868_s5 }
 0x46b   : > { %p4445_p6 = scmp.lt.s32.totalorder %s4443_s9, %s4439_s13 }
 0x46c   : > { %p4441_p9 = pnand %p4440_p11, %p7129_p2 }
 0x46d   : > { %p4446_p8 = por %p4445_p6, %p4444_p4 }
 0x46e   : > { %p4442_p1 = pneg %p4441_p9 }
 0x470   : > { %p4447_p5 = pnand %p4446_p8, %p4442_p1 }
 0x472   : > { %4450 = shalt.err (!%p4447_p5)
}
 0x473   : > { %s4502_s14 = smov 128   ;;  %s4503_s7 = smov 8  }
 0x474   : > { %4242 = dma.vmem_to_hbm [thread:$0]  (%p7129_p2), %s6818_s6, 4096, %s6816_s11, %s3849_s22, %s4502_s14, %s4502_s14, %s4503_s7  }
 0x475 PF: > { %s3877_s28 = sand.u32 1, %s4481_s18   ;;  %p7130_p7 = scmp.ne.s32.totalorder %s6985_s25, 0 }
 0x476   : > { %p7131_p12 = scmp.ge.s32.totalorder %s4493_s21, 2  ;;  %s3878_s17 = scalar_lea.sflag [#allocation6], %s3877_s28 }
 0x478   : > { %p4256_p13 = pnand %p7131_p12, %p7130_p7 }
 0x47a   : > { %p4257_p0 = pneg %p4256_p13 }
 0x47c   : > { %4476 = dma.done.wait (%p4257_p0), %s3878_s17, 4096  }
 0x47d   : > { %4478 = vsyncadd (%p4257_p0), %s3878_s17, 4294963200  ;;  %p19_p10 = scmp.ge.s32.totalorder %s4612_s15, 4   ;;  %s7132_s18 = smov %s4485_s19 }
 0x47e   : > { %s7133_s19 = smov %s4489_s20  ;;  %s7134_s20 = smov %s4628_s27 }
 0x47f   : > { %s7135_s21 = smov %s4612_s15  ;;  %21 = sbr.rel (!%p19_p10) target bundleno = 6 (0x6), region = 95 }
 0x484   :  { %3883 = vsyncpa [#allocation5], 1 }
 0x485   :  { %3885 = vsyncpa [#allocation5 + $0x1], 1 }
 0x486   :  { %3886 = vsyncpa [#allocation8], 1 }
 0x487   :  { %3887 = vsyncpa [#allocation6], 1 }
 0x488   :  { %3889 = vsyncpa [#allocation6 + $0x1], 1 }

</bundles_post_ra>
